<compile_context>
chip_gen: v6e
topology: v6e:2x2x1
jax: 0.10.0
libtpu: 0.0.40
codegen_flags: <defaults>
</compile_context>

<pallas_src>
import functools

import jax
import jax.numpy as jnp
import numpy as np
from jax.experimental import pallas as pl
from jax.experimental.pallas import tpu as pltpu


# ----------------------------------------------------------------------------
# small static helpers (trace-time, numpy)
# ----------------------------------------------------------------------------
def _round_up(x, m):
    return (x + m - 1) // m * m


def _reflect(idx, n):
    idx = np.asarray(idx)
    idx = np.where(idx < 0, -idx, idx)
    idx = np.where(idx >= n, 2 * (n - 1) - idx, idx)
    return idx


def _choose_rows_chunk(th, wc, target_m=256):
    """Largest divisor of th whose M-chunk (rows*wc) stays near target_m."""
    best = 1
    for d in range(1, th + 1):
        if th % d == 0 and d * wc <= max(target_m, wc):
            best = d
    return best


def _vmem_footprint(th, u_k, halo_e, wcv, wc, cinp, kh, kw, cp):
    """Rough per-grid-step VMEM bytes for the chosen tile size."""
    bpe = 2  # bf16
    re = th // u_k + halo_e
    r = th + kh - 1
    rows_chunk = _choose_rows_chunk(th, wc)
    x_blk = re * wcv * cinp * bpe                     # input block
    xe_tmp = (u_k * re) * wcv * cinp * bpe if u_k > 1 else 0   # row repeat temp
    xw_tmp = r * wc * kw * cinp * bpe                 # KW-folded patch
    w_buf = kh * kw * cinp * cp * bpe                 # weights
    out_blk = th * wc * cp * bpe                      # output tile
    acc = rows_chunk * wc * cp * 4                    # f32 chunk accumulator
    patch = rows_chunk * wc * kw * cinp * bpe         # chunk patch
    return 2 * x_blk + xe_tmp + xw_tmp + 2 * w_buf + 2 * out_blk + 2 * (acc + patch)


def _choose_tile_rows(ho, u_k, target, budget, halo_e, wcv, wc, cinp, kh, kw, cp):
    """Largest divisor of ho (multiple of u_k) that fits the VMEM budget and
    leaves >=2 row tiles when possible (both v7x TensorCores busy at N=1)."""
    cands = [t for t in range(u_k, ho + 1, u_k) if ho % t == 0]
    if not cands:
        cands = [ho]
    target = min(target, max(ho // 2, min(cands)))
    fitting = [t for t in cands if t <= target and
               _vmem_footprint(t, u_k, halo_e, wcv, wc, cinp, kh, kw, cp) <= budget]
    if fitting:
        return max(fitting)
    small = [t for t in cands
             if _vmem_footprint(t, u_k, halo_e, wcv, wc, cinp, kh, kw, cp) <= budget]
    # TODO(synk): add a column-tile grid axis for images too wide for any
    # row-tile to fit the VMEM budget.
    return min(small) if small else min(cands)


# ----------------------------------------------------------------------------
# kernel: fused row-upsample + KW-folded conv for one (image, row tile)
# ----------------------------------------------------------------------------
def _conv_kernel(u, s, kh_sz, kw_sz, th, rows_chunk, wc,
                 x_ref, w_ref, b_ref, o_ref):
    # x_ref : (re, Wcv, Cinp)    original-resolution rows incl. halo (bf16)
    # w_ref : (KH, KW*Cinp, Cp)  weights with KW folded into contraction (bf16)
    # b_ref : (1, Cp)            float32 bias
    # o_ref : (TH*Wc, Cp)        lane-dense bf16 output tile
    r = th + kh_sz - 1                               # conv-input rows this tile

    xe = x_ref[...]
    if u > 1:                                        # fused nearest row upsample
        xe = jnp.repeat(xe, u, axis=0)
    xe = xe[s:s + r]                                 # (R, Wcv, Cinp)

    # KW fold: one concat per tile (lane offsets are multiples of Cinp=128)
    # instead of KH*KW misaligned slices + small-K dots.
    xw = jnp.concatenate([xe[:, kw:kw + wc, :] for kw in range(kw_sz)],
                         axis=-1)                    # (R, Wc, KW*Cinp)

    bias = b_ref[...]                                # (1, Cp) f32
    n_chunks = th // rows_chunk
    cm = rows_chunk * wc
    for ci in range(n_chunks):
        r0 = ci * rows_chunk
        acc = None
        for kh in range(kh_sz):                      # KH dots, K = KW*Cinp
            patch = xw[r0 + kh:r0 + kh + rows_chunk].reshape(cm, -1)
            d = jnp.dot(patch, w_ref[kh], preferred_element_type=jnp.float32)
            acc = d if acc is None else acc + d
        # bias folded into the epilogue; single store per chunk, no VMEM RMW.
        o_ref[r0 * wc:(r0 + rows_chunk) * wc, :] = (acc + bias).astype(o_ref.dtype)


# ----------------------------------------------------------------------------
# wrapper: PyTorch-style NCHW / OIHW in, NCHW out
# ----------------------------------------------------------------------------
def upsample_conv_layer(x_nchw, weight_oihw, bias, kernel_size, stride,
                        up_sample=None, *, tile_rows=32,
                        compute_dtype=jnp.bfloat16):
    """Forward pass equivalent to PyTorch UpSampleConvLayer (stride must be 1).

    Note: operands/output of the kernel are bf16 (f32 MXU accumulation); the
    result is cast back to the input dtype, so precision is bf16-level.
    """
    # TODO(synk): strided conv (stride > 1) not implemented; TransformerNet's
    # upsample layers always use stride=1.
    assert stride == 1, "only stride=1 supported"
    n, cin, h, w = x_nchw.shape
    cout = weight_oihw.shape[0]
    kh = kw = int(kernel_size)
    pad = kh // 2
    u = int(up_sample) if up_sample else 1
    hu, wu = h * u, w * u
    ho = hu + 2 * pad - kh + 1
    wo = wu + 2 * pad - kw + 1

    # --- row index plumbing (fuse the row upsample when possible) --------------
    jr = ho + kh - 1                                   # conv-input rows
    row_map = _reflect(np.arange(jr) - pad, hu) // u   # conv row -> original row
    ph = -(-pad // u)
    s = int(ph * u - pad)                              # sub-row phase offset
    grp = (np.arange(jr) + s) // u
    fused = (ho % u == 0)
    ext_rows = []
    if fused:
        for k in range(int(grp[-1]) + 1):
            vals = np.unique(row_map[grp == k])
            if len(vals) != 1:
                fused = False
                break
            ext_rows.append(int(vals[0]))
    if fused:
        u_k, s_k = u, s
        ext_rows = np.asarray(ext_rows, np.int32)
    else:
        # fallback (e.g. pad >= up_sample): pre-expanded rows, still correct,
        # just no in-kernel row fusion.
        u_k, s_k = 1, 0
        ext_rows = row_map.astype(np.int32)

    halo_e = max((kh - 2 + s_k) // u_k + 1, 1)         # halo rows per tile

    # --- column index plumbing (upsample + reflect = one gather, small tensor) -
    wc = _round_up(wo, 8)                              # stored output cols / row
    jw = wo + kw - 1                                   # real conv-input cols
    wcv = _round_up(wc + kw - 1, 8)                    # conv-input cols materialized
    col_idx = np.minimum(np.arange(wcv), jw - 1)
    col_map = (_reflect(col_idx - pad, wu) // u).astype(np.int32)

    cinp = _round_up(cin, 128)                         # lane-dense input channels
    cp = _round_up(cout, 128)                          # lane-dense output channels

    # --- generation-aware tiling / VMEM budget ----------------------------------
    try:
        info = pltpu.get_tpu_info()
        vmem_phys = int(getattr(info, "vmem_capacity_bytes", 64 * 1024 * 1024))
    except Exception:
        vmem_phys = 64 * 1024 * 1024                   # conservative (v7x)
    vmem_limit = min(int(vmem_phys * 0.75), 100 * 1024 * 1024)
    budget = int(vmem_limit * 0.6)

    th = _choose_tile_rows(ho, u_k, tile_rows, budget,
                           halo_e, wcv, wc, cinp, kh, kw, cp)
    t_tiles = ho // th
    th_e = th // u_k                                   # original-res rows per tile
    re = th_e + halo_e                                 # rows incl. halo per tile
    rows_chunk = _choose_rows_chunk(th, wc)

    # per-tile row windows (halo baked in; pad ext_rows defensively at the end)
    need = (t_tiles - 1) * th_e + re
    if len(ext_rows) < need:
        ext_rows = np.concatenate(
            [ext_rows, np.full(need - len(ext_rows), ext_rows[-1], np.int32)])
    tile_row_idx = np.arange(t_tiles)[:, None] * th_e + np.arange(re)[None, :]
    row_gather = ext_rows[tile_row_idx].reshape(-1).astype(np.int32)

    # --- wrapper-side data prep (all on the small, un-row-upsampled x) ----------
    x = jnp.transpose(x_nchw, (0, 2, 3, 1)).astype(compute_dtype)     # NHWC bf16
    x = jnp.take(x, jnp.asarray(row_gather), axis=1)                  # tile rows+halo
    x = jnp.take(x, jnp.asarray(col_map), axis=2)                     # col upsample+reflect
    x_ext = jnp.pad(x, ((0, 0), (0, 0), (0, 0), (0, cinp - cin)))     # (N,T*re,Wcv,Cinp)

    wt = jnp.transpose(weight_oihw, (2, 3, 1, 0))                     # (KH,KW,Cin,Cout)
    wt = jnp.pad(wt, ((0, 0), (0, 0), (0, cinp - cin), (0, cp - cout)))
    wt = wt.reshape(kh, kw * cinp, cp).astype(compute_dtype)          # KW folded into K
    b = jnp.pad(bias, (0, cp - cout)).astype(jnp.float32).reshape(1, cp)

    kernel = functools.partial(_conv_kernel, u_k, s_k, kh, kw, th, rows_chunk, wc)

    out = pl.pallas_call(
        kernel,
        out_shape=jax.ShapeDtypeStruct((n, ho * wc, cp), compute_dtype),
        grid=(n, t_tiles),
        in_specs=[
            # one block per tile: th_e main rows + halo_e halo rows, contiguous
            pl.BlockSpec((None, re, wcv, cinp), lambda b_, t: (b_, t, 0, 0)),
            # TODO(synk): weights/bias could be single-buffered
            # (pipeline_mode=pl.Buffered(1)) to shave a little VMEM.
            pl.BlockSpec((kh, kw * cinp, cp), lambda b_, t: (0, 0, 0)),
            pl.BlockSpec((1, cp), lambda b_, t: (0, 0)),
        ],
        out_specs=pl.BlockSpec((None, th * wc, cp), lambda b_, t: (b_, t, 0)),
        compiler_params=pltpu.CompilerParams(
            dimension_semantics=("parallel", "parallel"),
            vmem_limit_bytes=vmem_limit),
    )(x_ext, wt, b)

    # slice off channel/column padding, cast back to caller dtype, NCHW.
    # TODO(synk): if the consumer accepts NHWC / bf16, return `out` directly
    # and skip this transpose + cast round trip.
    out = out.reshape(n, ho, wc, cp)[:, :, :wo, :cout].astype(x_nchw.dtype)
    return jnp.transpose(out, (0, 3, 1, 2))


# ----------------------------------------------------------------------------
# self-test
# ----------------------------------------------------------------------------
if __name__ == "__main__":
    in_channels, out_channels = 4, 8
    N, H, W = 2, 16, 16

    key = jax.random.PRNGKey(0)
    kx, kw3, kb3, kw5, kb5 = jax.random.split(key, 5)
    x = jax.random.normal(kx, (N, in_channels, H, W), dtype=jnp.float32)

    def make_params(kk, key_w, key_b):
        fan_in = in_channels * kk * kk
        bound = 1.0 / np.sqrt(fan_in)
        wgt = jax.random.uniform(key_w, (out_channels, in_channels, kk, kk),
                                 minval=-bound, maxval=bound, dtype=jnp.float32)
        bs = jax.random.uniform(key_b, (out_channels,),
                                minval=-bound, maxval=bound, dtype=jnp.float32)
        return wgt, bs

    def reference(xr, wr, br, ksz, st, up):
        # mirror the kernel's bf16 operands so the comparison is apples-to-apples
        xr = xr.astype(jnp.bfloat16).astype(jnp.float32)
        wr = wr.astype(jnp.bfloat16).astype(jnp.float32)
        if up:
            xr = jnp.repeat(jnp.repeat(xr, up, axis=2), up, axis=3)
        p = ksz // 2
        xr = jnp.pad(xr, ((0, 0), (0, 0), (p, p), (p, p)), mode="reflect")
        out = jax.lax.conv_general_dilated(
            xr, wr, window_strides=(st, st), padding="VALID",
            dimension_numbers=("NCHW", "OIHW", "NCHW"),
            precision=jax.lax.Precision.HIGHEST)
        return out + br.reshape(1, -1, 1, 1)

    # case 1: fused in-kernel row upsample (k=3, up=2), multiple row tiles
    w3, b3 = make_params(3, kw3, kb3)
    out = jax.block_until_ready(
        upsample_conv_layer(x, w3, b3, 3, 1, 2, tile_rows=16))
    ref = jax.block_until_ready(reference(x, w3, b3, 3, 1, 2))
    assert out.shape == (N, out_channels, 2 * H, 2 * W), out.shape
    np.testing.assert_allclose(np.asarray(out), np.asarray(ref),
                               rtol=1e-2, atol=1e-2)

    # case 2: plain reflect-pad conv (no upsample)
    out2 = jax.block_until_ready(
        upsample_conv_layer(x, w3, b3, 3, 1, None, tile_rows=8))
    ref2 = jax.block_until_ready(reference(x, w3, b3, 3, 1, None))
    assert out2.shape == (N, out_channels, H, W), out2.shape
    np.testing.assert_allclose(np.asarray(out2), np.asarray(ref2),
                               rtol=1e-2, atol=1e-2)

    # case 3: non-fused fallback (pad >= up_sample: k=5, up=2)
    w5, b5 = make_params(5, kw5, kb5)
    out3 = jax.block_until_ready(upsample_conv_layer(x, w5, b5, 5, 1, 2))
    ref3 = jax.block_until_ready(reference(x, w5, b5, 5, 1, 2))
    assert out3.shape == (N, out_channels, 2 * H, 2 * W), out3.shape
    np.testing.assert_allclose(np.asarray(out3), np.asarray(ref3),
                               rtol=1e-2, atol=1e-2)

    print("KERNEL_OK")
</pallas_src>

<mosaic_0001>
module attributes {stable_mosaic.version = 11 : i64} {
  func.func @_conv_kernel(%arg0: i32, %arg1: i32, %arg2: memref<1x10x40x128xbf16, #tpu.memory_space<vmem>>, %arg3: memref<3x384x128xbf16, #tpu.memory_space<vmem>>, %arg4: memref<1x128xf32, #tpu.memory_space<vmem>>, %arg5: memref<1x512x128xbf16, #tpu.memory_space<vmem>>) attributes {dimension_semantics = [#tpu.dimension_semantics<parallel>, #tpu.dimension_semantics<parallel>], iteration_bounds = array<i64: 2, 2>, scalar_prefetch = 0 : i64, scratch_operands = 0 : i64, tpu.core_type = #tpu.core_type<tc>, window_params = [{transform_indices = @transform_0, window_bounds = array<i64: 1, 10, 40, 128>}, {pipeline_mode = #tpu.pipeline_mode<synchronous>, transform_indices = @transform_1, window_bounds = array<i64: 3, 384, 128>}, {pipeline_mode = #tpu.pipeline_mode<synchronous>, transform_indices = @transform_2, window_bounds = array<i64: 1, 128>}, {transform_indices = @transform_3, window_bounds = array<i64: 1, 512, 128>}]} {
    %c0 = arith.constant 0 : index
    %c0_0 = arith.constant 0 : index
    %c0_1 = arith.constant 0 : index
    %c0_2 = arith.constant 0 : index
    %0 = vector.load %arg2[%c0, %c0_0, %c0_1, %c0_2] : memref<1x10x40x128xbf16, #tpu.memory_space<vmem>>, vector<1x10x40x128xbf16>
    %1 = vector.shape_cast %0 : vector<1x10x40x128xbf16> to vector<10x40x128xbf16>
    %2 = vector.shape_cast %1 : vector<10x40x128xbf16> to vector<10x1x40x128xbf16>
    %3 = vector.broadcast %2 : vector<10x1x40x128xbf16> to vector<10x2x40x128xbf16>
    %4 = vector.shape_cast %3 : vector<10x2x40x128xbf16> to vector<20x40x128xbf16>
    %5 = vector.extract_strided_slice %4 {offsets = [1, 0, 0], sizes = [18, 40, 128], strides = [1, 1, 1]} : vector<20x40x128xbf16> to vector<18x40x128xbf16>
    %6 = vector.extract_strided_slice %5 {offsets = [0, 0, 0], sizes = [18, 32, 128], strides = [1, 1, 1]} : vector<18x40x128xbf16> to vector<18x32x128xbf16>
    %7 = vector.extract_strided_slice %5 {offsets = [0, 1, 0], sizes = [18, 32, 128], strides = [1, 1, 1]} : vector<18x40x128xbf16> to vector<18x32x128xbf16>
    %8 = vector.extract_strided_slice %5 {offsets = [0, 2, 0], sizes = [18, 32, 128], strides = [1, 1, 1]} : vector<18x40x128xbf16> to vector<18x32x128xbf16>
    %9 = tpu.concatenate %6, %7, %8 in 2 : vector<18x32x128xbf16>, vector<18x32x128xbf16>, vector<18x32x128xbf16> -> vector<18x32x384xbf16>
    %c0_3 = arith.constant 0 : index
    %c0_4 = arith.constant 0 : index
    %10 = vector.load %arg4[%c0_3, %c0_4] : memref<1x128xf32, #tpu.memory_space<vmem>>, vector<1x128xf32>
    %11 = vector.extract_strided_slice %9 {offsets = [0, 0, 0], sizes = [8, 32, 384], strides = [1, 1, 1]} : vector<18x32x384xbf16> to vector<8x32x384xbf16>
    %12 = vector.shape_cast %11 : vector<8x32x384xbf16> to vector<256x384xbf16>
    %c0_5 = arith.constant 0 : index
    %c0_6 = arith.constant 0 : index
    %c0_7 = arith.constant 0 : index
    %13 = vector.load %arg3[%c0_5, %c0_6, %c0_7] : memref<3x384x128xbf16, #tpu.memory_space<vmem>>, vector<1x384x128xbf16>
    %14 = vector.shape_cast %13 : vector<1x384x128xbf16> to vector<384x128xbf16>
    %cst = arith.constant dense<0.000000e+00> : vector<256x128xf32>
    %15 = tpu.matmul %12, %14, %cst {dimension_numbers = #tpu.dot_dimension_numbers<[1], [0], [0], [1], [0, 0, 1, 1], [], []>} : vector<256x384xbf16>, vector<384x128xbf16>, vector<256x128xf32> -> vector<256x128xf32>
    %16 = vector.extract_strided_slice %9 {offsets = [1, 0, 0], sizes = [8, 32, 384], strides = [1, 1, 1]} : vector<18x32x384xbf16> to vector<8x32x384xbf16>
    %17 = vector.shape_cast %16 : vector<8x32x384xbf16> to vector<256x384xbf16>
    %c1 = arith.constant 1 : index
    %c0_8 = arith.constant 0 : index
    %c0_9 = arith.constant 0 : index
    %18 = vector.load %arg3[%c1, %c0_8, %c0_9] : memref<3x384x128xbf16, #tpu.memory_space<vmem>>, vector<1x384x128xbf16>
    %19 = vector.shape_cast %18 : vector<1x384x128xbf16> to vector<384x128xbf16>
    %cst_10 = arith.constant dense<0.000000e+00> : vector<256x128xf32>
    %20 = tpu.matmul %17, %19, %cst_10 {dimension_numbers = #tpu.dot_dimension_numbers<[1], [0], [0], [1], [0, 0, 1, 1], [], []>} : vector<256x384xbf16>, vector<384x128xbf16>, vector<256x128xf32> -> vector<256x128xf32>
    %21 = arith.addf %15, %20 : vector<256x128xf32>
    %22 = vector.extract_strided_slice %9 {offsets = [2, 0, 0], sizes = [8, 32, 384], strides = [1, 1, 1]} : vector<18x32x384xbf16> to vector<8x32x384xbf16>
    %23 = vector.shape_cast %22 : vector<8x32x384xbf16> to vector<256x384xbf16>
    %c2 = arith.constant 2 : index
    %c0_11 = arith.constant 0 : index
    %c0_12 = arith.constant 0 : index
    %24 = vector.load %arg3[%c2, %c0_11, %c0_12] : memref<3x384x128xbf16, #tpu.memory_space<vmem>>, vector<1x384x128xbf16>
    %25 = vector.shape_cast %24 : vector<1x384x128xbf16> to vector<384x128xbf16>
    %cst_13 = arith.constant dense<0.000000e+00> : vector<256x128xf32>
    %26 = tpu.matmul %23, %25, %cst_13 {dimension_numbers = #tpu.dot_dimension_numbers<[1], [0], [0], [1], [0, 0, 1, 1], [], []>} : vector<256x384xbf16>, vector<384x128xbf16>, vector<256x128xf32> -> vector<256x128xf32>
    %27 = arith.addf %21, %26 : vector<256x128xf32>
    %28 = vector.broadcast %10 : vector<1x128xf32> to vector<256x128xf32>
    %29 = arith.addf %27, %28 : vector<256x128xf32>
    %30 = arith.truncf %29 : vector<256x128xf32> to vector<256x128xbf16>
    %c0_14 = arith.constant 0 : index
    %c0_15 = arith.constant 0 : index
    %c0_16 = arith.constant 0 : index
    %31 = vector.load %arg5[%c0_14, %c0_15, %c0_16] : memref<1x512x128xbf16, #tpu.memory_space<vmem>>, vector<1x256x128xbf16>
    %32 = vector.shape_cast %31 : vector<1x256x128xbf16> to vector<256x128xbf16>
    %33 = vector.shape_cast %30 : vector<256x128xbf16> to vector<1x256x128xbf16>
    tpu.vector_store %arg5[%c0_14, %c0_15, %c0_16], %33 {strides = array<i32>} : memref<1x512x128xbf16, #tpu.memory_space<vmem>>, vector<1x256x128xbf16>,
    %34 = vector.extract_strided_slice %9 {offsets = [8, 0, 0], sizes = [8, 32, 384], strides = [1, 1, 1]} : vector<18x32x384xbf16> to vector<8x32x384xbf16>
    %35 = vector.shape_cast %34 : vector<8x32x384xbf16> to vector<256x384xbf16>
    %c0_17 = arith.constant 0 : index
    %c0_18 = arith.constant 0 : index
    %c0_19 = arith.constant 0 : index
    %36 = vector.load %arg3[%c0_17, %c0_18, %c0_19] : memref<3x384x128xbf16, #tpu.memory_space<vmem>>, vector<1x384x128xbf16>
    %37 = vector.shape_cast %36 : vector<1x384x128xbf16> to vector<384x128xbf16>
    %cst_20 = arith.constant dense<0.000000e+00> : vector<256x128xf32>
    %38 = tpu.matmul %35, %37, %cst_20 {dimension_numbers = #tpu.dot_dimension_numbers<[1], [0], [0], [1], [0, 0, 1, 1], [], []>} : vector<256x384xbf16>, vector<384x128xbf16>, vector<256x128xf32> -> vector<256x128xf32>
    %39 = vector.extract_strided_slice %9 {offsets = [9, 0, 0], sizes = [8, 32, 384], strides = [1, 1, 1]} : vector<18x32x384xbf16> to vector<8x32x384xbf16>
    %40 = vector.shape_cast %39 : vector<8x32x384xbf16> to vector<256x384xbf16>
    %c1_21 = arith.constant 1 : index
    %c0_22 = arith.constant 0 : index
    %c0_23 = arith.constant 0 : index
    %41 = vector.load %arg3[%c1_21, %c0_22, %c0_23] : memref<3x384x128xbf16, #tpu.memory_space<vmem>>, vector<1x384x128xbf16>
    %42 = vector.shape_cast %41 : vector<1x384x128xbf16> to vector<384x128xbf16>
    %cst_24 = arith.constant dense<0.000000e+00> : vector<256x128xf32>
    %43 = tpu.matmul %40, %42, %cst_24 {dimension_numbers = #tpu.dot_dimension_numbers<[1], [0], [0], [1], [0, 0, 1, 1], [], []>} : vector<256x384xbf16>, vector<384x128xbf16>, vector<256x128xf32> -> vector<256x128xf32>
    %44 = arith.addf %38, %43 : vector<256x128xf32>
    %45 = vector.extract_strided_slice %9 {offsets = [10, 0, 0], sizes = [8, 32, 384], strides = [1, 1, 1]} : vector<18x32x384xbf16> to vector<8x32x384xbf16>
    %46 = vector.shape_cast %45 : vector<8x32x384xbf16> to vector<256x384xbf16>
    %c2_25 = arith.constant 2 : index
    %c0_26 = arith.constant 0 : index
    %c0_27 = arith.constant 0 : index
    %47 = vector.load %arg3[%c2_25, %c0_26, %c0_27] : memref<3x384x128xbf16, #tpu.memory_space<vmem>>, vector<1x384x128xbf16>
    %48 = vector.shape_cast %47 : vector<1x384x128xbf16> to vector<384x128xbf16>
    %cst_28 = arith.constant dense<0.000000e+00> : vector<256x128xf32>
    %49 = tpu.matmul %46, %48, %cst_28 {dimension_numbers = #tpu.dot_dimension_numbers<[1], [0], [0], [1], [0, 0, 1, 1], [], []>} : vector<256x384xbf16>, vector<384x128xbf16>, vector<256x128xf32> -> vector<256x128xf32>
    %50 = arith.addf %44, %49 : vector<256x128xf32>
    %51 = vector.broadcast %10 : vector<1x128xf32> to vector<256x128xf32>
    %52 = arith.addf %50, %51 : vector<256x128xf32>
    %53 = arith.truncf %52 : vector<256x128xf32> to vector<256x128xbf16>
    %c0_29 = arith.constant 0 : index
    %c256 = arith.constant 256 : index
    %c0_30 = arith.constant 0 : index
    %54 = vector.load %arg5[%c0_29, %c256, %c0_30] : memref<1x512x128xbf16, #tpu.memory_space<vmem>>, vector<1x256x128xbf16>
    %55 = vector.shape_cast %54 : vector<1x256x128xbf16> to vector<256x128xbf16>
    %56 = vector.shape_cast %53 : vector<256x128xbf16> to vector<1x256x128xbf16>
    tpu.vector_store %arg5[%c0_29, %c256, %c0_30], %56 {strides = array<i32>} : memref<1x512x128xbf16, #tpu.memory_space<vmem>>, vector<1x256x128xbf16>,
    return
  }
  func.func @transform_0(%arg0: i32, %arg1: i32) -> (i32, i32, i32, i32) {
    %c0_i32 = arith.constant 0 : i32
    %c0_i32_0 = arith.constant 0 : i32
    %c0_i32_1 = arith.constant 0 : i32
    return %arg0, %arg1, %c0_i32, %c0_i32_0 : i32, i32, i32, i32
  }
  func.func @transform_1(%arg0: i32, %arg1: i32) -> (i32, i32, i32) {
    %c0_i32 = arith.constant 0 : i32
    %c0_i32_0 = arith.constant 0 : i32
    %c0_i32_1 = arith.constant 0 : i32
    %c0_i32_2 = arith.constant 0 : i32
    return %c0_i32, %c0_i32_0, %c0_i32_1 : i32, i32, i32
  }
  func.func @transform_2(%arg0: i32, %arg1: i32) -> (i32, i32) {
    %c0_i32 = arith.constant 0 : i32
    %c0_i32_0 = arith.constant 0 : i32
    %c0_i32_1 = arith.constant 0 : i32
    return %c0_i32, %c0_i32_0 : i32, i32
  }
  func.func @transform_3(%arg0: i32, %arg1: i32) -> (i32, i32, i32) {
    %c0_i32 = arith.constant 0 : i32
    %c0_i32_0 = arith.constant 0 : i32
    return %arg0, %arg1, %c0_i32 : i32, i32, i32
  }
}

</mosaic_0001>

<bundles_post_ra>
// kernel: tpu_custom_call.1
= control target key start
LH: loop header
LB: loop body
LE: loop exit
PB: predicated region body
PF: predicated region fallthrough
CT: control target
= control target key end

     0   :  { %s8196_s0 = inlined_call_operand.hbm [shape: bf16[2,20,40,128], index: 0, kind: input, shape index: {}]   ;;  %s8197_s1 = inlined_call_operand.hbm [shape: bf16[3,384,128], index: 1, kind: input, shape index: {}]   ;;  %s8198_s2 = inlined_call_operand.vmem [shape: f32[1,128], index: 2, kind: input, shape index: {}]   ;;  %s8199_s3 = inlined_call_operand.hbm [shape: bf16[2,1024,128], index: 3, kind: output, shape index: {}]  }
   0x1   :  { %8227 = sst [smem:[#allocation31_spill]] %s8197_s1 }
   0x2   :  { %8228 = sst [smem:[#allocation32_spill]] %s8199_s3 }
   0x3   :  { %8 = vsyncpa [#allocation3], 0 }
   0x4   :  { %10 = vsyncpa [#allocation3 + $0x1], 0 }
   0x5   :  { %11 = vsyncpa [#allocation6], 0 }
   0x6   :  { %12 = vsyncpa [#allocation4], 0 }
   0x7   :  { %14 = vsyncpa [#allocation4 + $0x1], 0  ;;  %s6460_s12 = smov 0   ;;  %s6462_s13 = smov 0  }
   0x8   :  { %s6464_s14 = smov 0   ;;  %s6466_s15 = smov 0  }
   0x9   :  { %s6468_s16 = smov 0   ;;  %s6470_s17 = smov 0  }
   0xa   :  { %s6472_s18 = smov 0   ;;  %s6474_s19 = smov 0  }
   0xb LB: > { %8229 = sst [smem:[#allocation11_spill]] %s6403_s12  ;;  %s4375_s20 = sadd.s32 4294967295, %s6431_s19   ;;  %s6431_s19 = sphi %s6474_s19, %s20_s19   ;;  %s6427_s18 = sphi %s6472_s18, %s8321_s18   ;;  %s6423_s17 = sphi %s6470_s17, %s8320_s17   ;;  %s6419_s16 = sphi %s6468_s16, %s8319_s16   ;;  %s6415_s15 = sphi %s6466_s15, %s8318_s15   ;;  %s6411_s14 = sphi %s6464_s14, %s8317_s14   ;;  %s6407_s13 = sphi %s6462_s13, %s8316_s13   ;;  %s6403_s12 = sphi %s6460_s12, %s8315_s12  }
   0xc   : > { %s4376_s21 = sadd.s32 4294967294, %s6431_s19   ;;  %p54_p0 = scmp.ne.s32.totalorder %s6407_s13, %s6403_s12 }
   0xd   : > { %p6504_p1 = scmp.eq.s32.totalorder %s4375_s20, 0  ;;  %p6508_p2 = scmp.eq.s32.totalorder %s4375_s20, 3 }
   0xe   : > { %p128_p3 = scmp.eq.s32.totalorder %s4376_s21, 3  ;;  %p4377_p5 = scmp.ge.s32.totalorder %s6431_s19, 1 }
   0xf   : > { %p6514_p4 = por %p6504_p1, %p54_p0  ;;  %p135_p7 = scmp.lt.s32.totalorder %s6431_s19, 5 }
  0x10   : > { %p6519_p6 = por %p128_p3, %p54_p0  ;;  %s6433_s27 = smov [#allocation5]  }
  0x11   : > { %s8232_s24 = scalar_select %p6514_p4, 1, 0 }
  0x12   : > { %s8233_s25 = scalar_select %p6519_p6, 1, 0 }
  0x13   : > { %p6524_p8 = pnand %p4377_p5, %p135_p7  ;;  %s147_s28 = sshll.u32 %s6433_s27, 4  ;;  %s148_s28 = int_to_ptr.vmem [resolvable:$true] %s147_s28 }
  0x14   : > { %8234 = sst [smem:[#allocation12_spill]] %s8233_s25  ;;  %s6288_s29 = scalar_lea.vmem %s148_s28, 9216 }
  0x15   : > { %p6000_p9 = pneg %p6524_p8  ;;  %p6289_p12 = scmp.ne.s32.totalorder %s148_s28, %s6288_s29 }
  0x16   : > { %p6296_p3 = scmp.lt.s32.totalorder %s148_s28, %s148_s28  ;;  %p6297_p6 = scmp.lt.s32.totalorder %s6288_s29, %s6288_s29 }
  0x17   : > { %p6001_p10 = pnand %p6000_p9, %p6504_p1 }
  0x18   : > { %p6298_p4 = por %p6297_p6, %p6296_p3 }
  0x19   : > { %p6279_p11 = pneg %p6001_p10 }
  0x1b   : > { %p6291_p13 = pnand %p6289_p12, %p6279_p11 }
  0x1d   : > { %p6292_p0 = pneg %p6291_p13 }
  0x1f   : > { %p6299_p5 = pnand %p6298_p4, %p6292_p0 }
  0x21   : > { %6302 = shalt.err (!%p6299_p5)
}
  0x22   : > { %s8201_s30 = smov 64   ;;  %s8202_s4 = smov 4  }
  0x23   : > { %s8236_s1 = sld [smem:[#allocation31_spill]]  ;;  %s29_s7 = sadd.s32 1, %s6423_s17 }
  0x24   : > { %p30_p4 = scmp.ge.s32.totalorder %s29_s7, 2  ;;  %s32_s8 = sadd.s32 1, %s6427_s18 }
  0x25   : > { %s41_s9 = sadd.s32 1, %s6411_s14  ;;  %p48_p6 = scmp.ne.s32.totalorder %s6411_s14, %s6407_s13 }
  0x26   : > { %s8323_s7 = smov (%p30_p4, %s29_s7), 0  ;;  %s8325_s8 = smov (!%p30_p4, %s32_s8), %s6427_s18 }
  0x27   : > { %8237 = sst [smem:[#allocation13_spill]] %s8323_s7  ;;  %s37_s10 = ssub.s32 %s6423_s17, %s8323_s7 }
  0x28   : > { %p49_p7 = scmp.eq.s32.totalorder %s6431_s19, 0  ;;  %p34_p9 = scmp.ge.s32.totalorder %s8325_s8, 2 }
  0x29   : > { %6003 = dma.hbm_to_vmem [thread:$0]  (!%p6001_p10), %s8236_s1, 9216, %s148_s28, [#allocation6], %s8201_s30, %s8201_s30, %s8202_s4  }
  0x2a   : > { %p6551_p11 = por %p6508_p2, %p48_p6  ;;  %p6555_p10 = por %p49_p7, %p48_p6 }
  0x2b   : > { %p6013_p12 = scmp.lt.s32.totalorder %s6431_s19, 4  ;;  %s8327_s8 = smov (%p34_p9, %s8325_s8), 0 }
  0x2c   : > { %8240 = sst [smem:[#allocation14_spill]] %s8327_s8  ;;  %s164_s21 = sand.u32 1, %s6411_s14  }
  0x2d   : > { %s36_s27 = ssub.s32 %s6427_s18, %s8327_s8  ;;  %s5988_s29 = smul.u32 200, %s164_s21 }
  0x2e   : > { %s38_s28 = sor.u32 %s37_s10, %s36_s27  ;;  %s6014_s23 = smul.u32 50, %s6423_s17 }
  0x2f   : > { %p39_p13 = scmp.eq.s32.totalorder %s38_s28, 0  ;;  %s5990_s5 = smul.u32 100, %s6427_s18 }
  0x30   : > { %s168_s4 = scalar_lea.vmem [#allocation2], %s5988_s29  ;;  %p6577_p2 = pnand %p6013_p12, %p6555_p10 }
  0x31   : > { %s6568_s6 = scalar_select %p39_p13, %s6411_s14, %s41_s9  }
  0x32   : > { %s175_s30 = sadd.s32 %s6014_s23, %s5990_s5  ;;  %s178_s1 = sshll.u32 %s168_s4, 4  ;;  %s179_s1 = int_to_ptr.vmem [resolvable:$true] %s178_s1 }
  0x33   : > { %s4380_s7 = sshll.u32 %s175_s30, 6  ;;  %s165_s10 = scalar_lea.sflag [#allocation3], %s164_s21 }
  0x34   : > { %s177_s3 = scalar_lea.hbm %s8196_s0, %s4380_s7  ;;  %p6305_p0 = pneg %p6577_p2 }
  0x35   : > { %s6316_s9 = scalar_lea.vmem %s179_s1, 3200  ;;  %s6436_s30 = smov [#allocation2]  }
  0x36   : > { %p6317_p3 = scmp.ne.s32.totalorder %s179_s1, %s6316_s9  ;;  %s6321_s4 = sshll.u32 %s6436_s30, 4  ;;  %s6322_s4 = int_to_ptr.vmem [resolvable:$false] %s6321_s4 }
  0x37   : > { %s6323_s27 = scalar_lea.vmem %s6322_s4, 6400  ;;  %p6324_p6 = scmp.lt.s32.totalorder %s179_s1, %s6322_s4 }
  0x38   : > { %p6319_p5 = pnand %p6317_p3, %p6305_p0  ;;  %p6325_p7 = scmp.lt.s32.totalorder %s6323_s27, %s6316_s9 }
  0x3a   : > { %p6320_p4 = pneg %p6319_p5  ;;  %p6326_p9 = por %p6325_p7, %p6324_p6 }
  0x3c   : > { %p6327_p13 = pnand %p6326_p9, %p6320_p4 }
  0x3e   : > { %6330 = shalt.err (!%p6327_p13)
}
  0x3f   : > { %s8242_s12 = smov 4   ;;  %s8243_s25 = smov 64  }
  0x40   : > { %6007 = dma.hbm_to_vmem [thread:$0]  (!%p6577_p2), %s177_s3, 3200, %s179_s1, %s165_s10, %s8243_s25, %s8243_s25, %s8242_s12  }
  0x41   : > { %190 = sbr.rel (%p6524_p8) target bundleno = 902 (0x386), region = 32 }
  0x46   : > { %s6591_s7 = sand.u32 1, %s6407_s13   ;;  %p8244_p10 = scmp.ne.s32.totalorder %s8232_s24, 0 }
  0x47   : > { %s5991_s20 = smul.u32 200, %s6591_s7  ;;  %s193_s21 = scalar_lea.sflag [#allocation3], %s6591_s7 }
  0x49   : > { %s6595_s28 = scalar_lea.vmem [#allocation2], %s5991_s20 }
  0x4a   : > { %6390 = dma.done.wait (%p8244_p10), %s193_s21, 3200  }
  0x4b   : > { %6392 = vsyncadd (%p8244_p10), %s193_s21, 4294964096 }
  0x4c   : > { %6394 = dma.done.wait (%p6504_p1), [#allocation6], 9216  }
  0x4d   : > { %6396 = vsyncadd (%p6504_p1), [#allocation6], 4294958080  ;;  %v6086_v0 = vld [vmem:[#allocation5 + $0x138] sm:$0xff]   ;;  %v6089_v3 = vld [vmem:[#allocation5 + $0x130] sm:$0xff]   ;;  %vm426_vm0 = vsmask.f32 7424 }
  0x4e   : > { %v6087_v1 = vld [vmem:[#allocation5 + $0x178] sm:$0xff]   ;;  %4884 = vmatprep.subr.bf16.mxu0 %v6086_v0  ;;  %v6090_v4 = vld [vmem:[#allocation5 + $0x170] sm:$0xff]   ;;  %v6092_v6 = vld [vmem:[#allocation5 + $0x128] sm:$0xff]   ;;  %vm647_vm1 = vcmask 1046528   ;;  %s4383_s22 = sshll.u32 %s6591_s7, 8  ;;  %s4624_s29 = sshll.u32 %s6415_s15, 6 }
  0x4f   : > { %v6088_v2 = vld [vmem:[#allocation5 + $0xf8] sm:$0xff]   ;;  %5700 = vmatprep.subr.bf16.mxu1 %v6087_v1  ;;  %v6091_v5 = vld [vmem:[#allocation5 + $0xf0] sm:$0xff]   ;;  %v6093_v7 = vld [vmem:[#allocation5 + $0x168] sm:$0xff]   ;;  %s7379_s24 = scalar_lea.vmem [#allocation7], %s4383_s22  ;;  %s4625_s23 = sshll.u32 %s6419_s16, 7 }
  0x50   : > { %4885 = vmatpush3.bf16.msra.mxu0 %v6088_v2  ;;  %5701 = vmatpush3.bf16.msra.mxu1 %v6087_v1  ;;  %v6094_v8 = vld [vmem:[#allocation5 + $0xe8] sm:$0xff]   ;;  %v6095_v9 = vld [vmem:[#allocation5 + $0x120] sm:$0xff]   ;;  %v6098_v12 = vld [vmem:[#allocation5 + $0x118] sm:$0xff]   ;;  %s4272_s5 = sadd.s32 %s4625_s23, %s4624_s29  ;;  %s4275_s16 = sshll.u32 %s7379_s24, 4  ;;  %s8141_s16 = int_to_ptr.vmem [resolvable:$true] %s4275_s16 }
  0x51   : > { %4886 = vmatprep.subr.bf16.mxu0 %v6089_v3  ;;  %5702 = vmatprep.subr.bf16.mxu1 %v6090_v4  ;;  %v6096_v10 = vld [vmem:[#allocation5 + $0x160] sm:$0xff]   ;;  %v6099_v13 = vld [vmem:[#allocation5 + $0x158] sm:$0xff]   ;;  %v6101_v15 = vld [vmem:[#allocation5 + $0x110] sm:$0xff]   ;;  %s4626_s15 = sshll.u32 %s4272_s5, 6  ;;  %s8309_s30 = sld [smem:[#allocation32_spill]] }
  0x52   : > { %v6097_v11 = vld [vmem:[#allocation5 + $0xe0] sm:$0xff]   ;;  %v6100_v14 = vld [vmem:[#allocation5 + $0xd8] sm:$0xff]   ;;  %v6102_v16 = vld [vmem:[#allocation5 + $0x150] sm:$0xff]   ;;  %s4260_s27 = scalar_lea.sflag [#allocation4], %s6591_s7  ;;  %s6331_s12 = scalar_lea.vmem %s8141_s16, 4096 }
  0x53   : > { %v6103_v17 = vld [vmem:[#allocation5 + $0xd0] sm:$0xff]   ;;  %v6104_v18 = vld [vmem:[#allocation5 + $0x108] sm:$0xff]   ;;  %v6107_v21 = vld [vmem:[#allocation5 + $0x100] sm:$0xff]   ;;  %p6332_p1 = scmp.ne.s32.totalorder %s8141_s16, %s6331_s12  ;;  %s6437_s25 = smov [#allocation7]  }
  0x54   : > { %4887 = vmatpush3.bf16.msra.mxu0 %v6091_v5  ;;  %5703 = vmatpush3.bf16.msra.mxu1 %v6090_v4  ;;  %v6105_v19 = vld [vmem:[#allocation5 + $0x148] sm:$0xff]   ;;  %v6108_v22 = vld [vmem:[#allocation5 + $0x140] sm:$0xff]   ;;  %v6112_v25 = vld [vmem:[%s6595_s28 + $0x24] ss:$0 sps:$4 sm:$0xff]   ;;  %s6335_s20 = sshll.u32 %s6437_s25, 4  ;;  %s6336_s20 = int_to_ptr.vmem [resolvable:$false] %s6335_s20 }
  0x55   : > { %4888 = vmatprep.subr.bf16.mxu0 %v6092_v6  ;;  %5704 = vmatprep.subr.bf16.mxu1 %v6093_v7  ;;  %v6106_v20 = vld [vmem:[#allocation5 + $0xc8] sm:$0xff]   ;;  %v6109_v30 = vld [vmem:[#allocation5 + $0xc0] sm:$0xff]   ;;  %v656_v32 = vrot.slane %v6112_v25, 1  ;;  %v6113_v33 = vld [vmem:[#allocation5 + $0x78] sm:$0xff]   ;;  %v463_v40 = vshll.u32 %v6112_v25, 16  ;;  %p6333_p8 = pnand %p6332_p1, %p6551_p11  ;;  %s6337_s21 = scalar_lea.vmem %s6336_s20, 8192 }
  0x56   : > { %v6606_v23 = vld [vmem:[%s6595_s28 + $0x14] sm:$0xff]   ;;  %v6609_v24 = vld [vmem:[%s6595_s28 + $0x1c] sm:$0xff]   ;;  %v6633_v48 = vld [vmem:[%s6595_s28 + $0x28] sm:$0xff]   ;;  %p6338_p2 = scmp.lt.s32.totalorder %s8141_s16, %s6336_s20  ;;  %p6339_p0 = scmp.lt.s32.totalorder %s6337_s21, %s6331_s12 }
  0x57   : > { %v448_v26 = vshrl.u32 %v6606_v23, 16  ;;  %v450_v27 = vshll.u32 %v6606_v23, 16  ;;  %v455_v28 = vshll.u32 %v6609_v24, 16  ;;  %v653_v29 = vrot.slane %v6606_v23, 1  ;;  %v6114_v37 = vld [vmem:[#allocation5 + $0x38] sm:$0xff]   ;;  %v6116_v45 = vld [vmem:[#allocation5 + $0x70] sm:$0xff]   ;;  %s8139_s4 = scalar_lea.hbm %s8309_s30, %s4626_s15  ;;  %p6334_p12 = pneg %p6333_p8 }
  0x58   : > { %4889 = vmatpush3.bf16.msra.mxu0 %v6094_v8  ;;  %5705 = vmatpush3.bf16.msra.mxu1 %v6093_v7  ;;  %v654_v31 = vrot.slane %v6609_v24, 1  ;;  %v6115_v38 = vld [vmem:[#allocation5 + $0xb8] sm:$0xff]   ;;  %v459_v39 = vshrl.u32 %v6609_v24, 16  ;;  %v465_v44 = vrot.slane %v463_v40, 1  ;;  %v6636_v49 = vld [vmem:[%s6595_s28 + $0x30] sm:$0xff]   ;;  %v6117_v50 = vld [vmem:[#allocation5 + $0x30] sm:$0xff]   ;;  %p6340_p3 = por %p6339_p0, %p6338_p2 }
  0x59   : > { %4890 = vmatprep.subr.bf16.mxu0 %v6095_v9  ;;  %5706 = vmatprep.subr.bf16.mxu1 %v6096_v10  ;;  %v452_v34 = vrot.slane %v450_v27, 1  ;;  %v457_v35 = vrot.slane %v455_v28, 1  ;;  %v658_v51 = vrot.slane %v6633_v48, 1  ;;  %v6121_v52 = vld [vmem:[#allocation5 + $0x68] sm:$0xff]   ;;  %v659_v53 = vrot.slane %v6636_v49, 1  ;;  %v6123_v54 = vld [vmem:[#allocation5 + $0xb0] sm:$0xff]  }
  0x5a   : > { %v6618_v36 = vsel %vm647_vm1, %v653_v29, %v654_v31  ;;  %v6623_v42 = vsel %vm647_vm1, %v654_v31, %v656_v32  ;;  %v6120_v55 = vld [vmem:[%s6595_s28 + $0x38] ss:$0 sps:$4 sm:$0xff]   ;;  %v6124_v58 = vld [vmem:[#allocation5 + $0x60] sm:$0xff]   ;;  %v470_v61 = vshll.u32 %v6633_v48, 16  ;;  %v475_v62 = vshll.u32 %v6636_v49, 16  ;;  %v6655_v63 = vld [vmem:[%s6595_s28 + $0x3c] sm:$0xff]   ;;  %p6341_p5 = pnand %p6340_p3, %p6334_p12 }
  0x5b   : > { %v453_v41 = vor.u32 %v452_v34, %v448_v26  ;;  %5716 = vmatprep.mubr.bf16.mxu1 %v6618_v36  ;;  %v461_v43 = vor.u32 %v459_v39, %v457_v35  ;;  %v6122_v56 = vld [vmem:[#allocation5 + $0x28] sm:$0xff]   ;;  %v6646_v57 = vsel %vm647_vm1, %v658_v51, %v659_v53  ;;  %v661_v59 = vrot.slane %v6120_v55, 1  ;;  %v6125_v60 = vld [vmem:[#allocation5 + $0x20] sm:$0xff]   ;;  %v6129_v0 = vld [vmem:[#allocation5 + $0x58] sm:$0xff]  }
  0x5c   : > { %4891 = vmatpush3.bf16.msra.mxu0 %v6097_v11  ;;  %5707 = vmatpush3.bf16.msra.mxu1 %v6096_v10  ;;  %v6131_v1 = vld [vmem:[#allocation5 + $0xa8] sm:$0xff]   ;;  %v468_v3 = vshrl.u32 %v6633_v48, 16  ;;  %v6662_v4 = vld [vmem:[%s6595_s28 + $0x44] sm:$0xff]   ;;  %v472_v5 = vrot.slane %v470_v61, 1  ;;  %v477_v8 = vrot.slane %v475_v62, 1  ;;  %v663_v9 = vrot.slane %v6655_v63, 1 }
  0x5d   : > { %4892 = vmatprep.subr.bf16.mxu0 %v6098_v12  ;;  %5708 = vmatprep.subr.bf16.mxu1 %v6099_v13  ;;  %v6626_v46 = vsel %vm426_vm0, %v453_v41, %v457_v35  ;;  %v6630_v47 = vsel %vm426_vm0, %v461_v43, %v465_v44  ;;  %v6658_v2 = vsel %vm647_vm1, %v659_v53, %v661_v59  ;;  %v6130_v6 = vld [vmem:[#allocation5 + $0x18] sm:$0xff]   ;;  %v6132_v7 = vld [vmem:[#allocation5 + $0x50] sm:$0xff]   ;;  %v664_v12 = vrot.slane %v6662_v4, 1  ;;  %v6686_v28 = vld [vmem:[%s6595_s28 + $0x50] sm:$0xff]  }
  0x5e   : > { %992 = vmatprep.mubr.bf16.mxu0 %v6626_v46  ;;  %v6133_v10 = vld [vmem:[#allocation5 + $0x10] sm:$0xff]   ;;  %v473_v11 = vor.u32 %v472_v5, %v468_v3  ;;  %v6141_v29 = vld [vmem:[#allocation5] sm:$0xff]   ;;  %v6150_v39 = vld [vmem:[#allocation5 + $0x88] sm:$0xff]  }
  0x5f   : > { %v6691_v31 = vld [vmem:[%s6595_s28 + $0x58] sm:$0xff]   ;;  %v6697_v34 = vld [vmem:[%s6595_s28] sm:$0xff]   ;;  %v6146_v40 = vld [vmem:[%s6595_s28 + $0x10] ss:$0 sps:$4 sm:$0xff]  }
  0x60   : > { %4893 = vmatpush3.bf16.msra.mxu0 %v6100_v14  ;;  %5709 = vmatpush3.bf16.msra.mxu1 %v6099_v13  ;;  %v6137_v13 = vld [vmem:[#allocation5 + $0x48] sm:$0xff]   ;;  %v6139_v14 = vld [vmem:[#allocation5 + $0xa0] sm:$0xff]   ;;  %v6148_v32 = vld [vmem:[#allocation5 + $0x90] sm:$0xff]   ;;  %v669_v41 = vrot.slane %v6691_v31, 1  ;;  %v648_v44 = vrot.slane %v6697_v34, 1  ;;  %v430_v59 = vshll.u32 %v6697_v34, 16 }
  0x61   : > { %4894 = vmatprep.subr.bf16.mxu0 %v6101_v15  ;;  %5710 = vmatprep.subr.bf16.mxu1 %v6102_v16  ;;  %v6671_v15 = vld [vmem:[%s6595_s28 + $0x4c] ss:$0 sps:$4 sm:$0xff]   ;;  %v6722_v53 = vld [vmem:[%s6595_s28 + $0x60] ss:$0 sps:$4 sm:$0xff]  }
  0x62   : > { %v666_v25 = vrot.slane %v6671_v15, 1  ;;  %v6152_v43 = vld [vmem:[#allocation5 + $0x80] sm:$0xff]   ;;  %v432_v3 = vrot.slane %v430_v59, 1 }
  0x64   : > { %4895 = vmatpush3.bf16.msra.mxu0 %v6103_v17  ;;  %5711 = vmatpush3.bf16.msra.mxu1 %v6102_v16  ;;  %v479_v16 = vshrl.u32 %v6636_v49, 16  ;;  %v6675_v17 = vsel %vm426_vm0, %v473_v11, %v477_v8  ;;  %v503_v11 = vshll.u32 %v6671_v15, 16  ;;  %v6147_v15 = vld [vmem:[#allocation5 + $0x230] sm:$0xff]  }
  0x65   : > { %4896 = vmatprep.subr.bf16.mxu0 %v6104_v18  ;;  %5712 = vmatprep.subr.bf16.mxu1 %v6105_v19  ;;  %v6678_v18 = vsel %vm647_vm1, %v663_v9, %v664_v12 }
  0x66   : > { %v481_v26 = vor.u32 %v479_v16, %v477_v8 }
  0x68   : > { %4897 = vmatpush3.bf16.msra.mxu0 %v6106_v20  ;;  %5713 = vmatpush3.bf16.msra.mxu1 %v6105_v19  ;;  %v483_v19 = vshll.u32 %v6120_v55, 16  ;;  %v6138_v20 = vld [vmem:[#allocation5 + $0x8] sm:$0xff]   ;;  %v6154_v55 = vld [vmem:[#allocation5 + $0x1f8] sm:$0xff]  }
  0x69   : > { %4898 = vmatprep.subr.bf16.mxu0 %v6107_v21  ;;  %5714 = vmatprep.subr.bf16.mxu1 %v6108_v22  ;;  %v6140_v21 = vld [vmem:[#allocation5 + $0x40] sm:$0xff]  }
  0x6a   : > { %v485_v27 = vrot.slane %v483_v19, 1  ;;  %v505_v19 = vrot.slane %v503_v11, 1 }
  0x6c   : > { %4899 = vmatpush3.bf16.msra.mxu0 %v6109_v30  ;;  %5715 = vmatpush3.bf16.msra.mxu1 %v6108_v22  ;;  %v6145_v22 = vld [vmem:[#allocation5 + $0x98] sm:$0xff]   ;;  %v6700_v35 = vsel %vm426_vm0, %v481_v26, %v485_v27  ;;  %v6149_v27 = vld [vmem:[#allocation5 + $0x228] sm:$0xff]  }
  0x6d   : > { %5020 = vmatprep.subr.bf16.mxu1 %v6113_v33  ;;  %5748 = vmatprep.subr.bf16.mxu0 %v6115_v38  ;;  %v6688_v30 = vld [vmem:[#allocation5 + $0x238] sm:$0xff]   ;;  %v6694_v33 = vsel %vm647_vm1, %v664_v12, %v666_v25 }
  0x6f   : > { %993 = vmatmul.mubr.bf16.vlgmr.msra.gmra.mxu0 %v6606_v23  ;;  %5717 = vmatmul.mubr.bf16.vlgmr.msra.gmra.mxu1 %v6623_v42 }
  0x70   : > { %5021 = vmatpush3.bf16.msra.mxu1 %v6114_v37  ;;  %5749 = vmatpush3.bf16.msra.mxu0 %v6115_v38  ;;  %v668_v37 = vrot.slane %v6686_v28, 1  ;;  %v6704_v38 = vld [vmem:[%s6595_s28 + $0x8] sm:$0xff]  }
  0x71   : > { %1000 = vmatprep.mubr.bf16.mxu0 %v6630_v47  ;;  %5720 = vmatprep.mubr.bf16.mxu1 %v6618_v36  ;;  %v435_v5 = vshll.u32 %v6704_v38, 16  ;;  %v439_v12 = vshrl.u32 %v6704_v38, 16 }
  0x72   : > { %5022 = vmatprep.subr.bf16.mxu1 %v6116_v45  ;;  %5750 = vmatprep.subr.bf16.mxu0 %v6123_v54  ;;  %v649_v45 = vrot.slane %v6704_v38, 1 }
  0x74   : > { %5023 = vmatpush3.bf16.msra.mxu1 %v6117_v50  ;;  %5751 = vmatpush3.bf16.msra.mxu0 %v6123_v54  ;;  %v651_v50 = vrot.slane %v6146_v40, 1  ;;  %v6716_v51 = vsel %vm647_vm1, %v648_v44, %v649_v45  ;;  %v6725_v54 = vsel %vm647_vm1, %v668_v37, %v669_v41  ;;  %v515_v37 = vshll.u32 %v6691_v31, 16 }
  0x75   : > { %5024 = vmatprep.subr.bf16.mxu1 %v6121_v52  ;;  %5752 = vmatprep.subr.bf16.mxu0 %v6131_v1  ;;  %8245 = vst [vmem:[#allocation15_spill] sm:$0xff] %v6725_v54 }
  0x76   : > { %v6719_v52 = vsel %vm647_vm1, %v649_v45, %v651_v50  ;;  %v523_v45 = vshll.u32 %v6722_v53, 16  ;;  %v6168_v50 = vld [vmem:[#allocation5 + $0x200] sm:$0xff]  }
  0x77   : > { %1001 = vmatmul.mubr.bf16.gmra.mxu0 %v6609_v24  ;;  %5721 = vmatmul.mubr.bf16.gmra.mxu1 %v6623_v42 }
  0x78   : > { %1008 = vmatprep.mubr.bf16.mxu0 %v6626_v46  ;;  %5724 = vmatprep.mubr.bf16.mxu1 %v6646_v57 }
  0x79   : > { %5025 = vmatpush3.bf16.msra.mxu1 %v6122_v56  ;;  %5753 = vmatpush3.bf16.msra.mxu0 %v6131_v1  ;;  %v490_v56 = vshll.u32 %v6655_v63, 16  ;;  %v428_v1 = vshrl.u32 %v6697_v34, 16 }
  0x7a   : > { %5026 = vmatprep.subr.bf16.mxu1 %v6124_v58  ;;  %5754 = vmatprep.subr.bf16.mxu0 %v6139_v14  ;;  %v671_v58 = vrot.slane %v6722_v53, 1 }
  0x7b   : > { %v492_v61 = vrot.slane %v490_v56, 1  ;;  %v433_v9 = vor.u32 %v432_v3, %v428_v1  ;;  %v525_v56 = vrot.slane %v523_v45, 1  ;;  %v6161_v1 = vld [vmem:[#allocation5 + $0x1e0] sm:$0xff]   ;;  %v6166_v3 = vld [vmem:[#allocation5 + $0x1d0] sm:$0xff]  }
  0x7c   : > { %v6736_v62 = vsel %vm647_vm1, %v669_v41, %v671_v58  ;;  %v519_v41 = vshrl.u32 %v6691_v31, 16  ;;  %v6173_v58 = vld [vmem:[#allocation5 + $0x138] sm:$0xff]  }
  0x7d   : > { %5027 = vmatpush3.bf16.msra.mxu1 %v6125_v60  ;;  %5755 = vmatpush3.bf16.msra.mxu0 %v6139_v14  ;;  %v488_v60 = vshrl.u32 %v6655_v63, 16  ;;  %8246 = vst [vmem:[#allocation16_spill] sm:$0xff] %v6736_v62 }
  0x7e   : > { %5028 = vmatprep.subr.bf16.mxu1 %v6129_v0  ;;  %5756 = vmatprep.subr.bf16.mxu0 %v6145_v22  ;;  %v495_v0 = vshll.u32 %v6662_v4, 16 }
  0x7f   : > { %1009 = vmatmul.mubr.bf16.gmra.mxu0 %v6606_v23  ;;  %5725 = vmatmul.mubr.bf16.gmra.mxu1 %v6658_v2  ;;  %v493_v8 = vor.u32 %v492_v61, %v488_v60  ;;  %v6157_v60 = vld [vmem:[#allocation5 + $0x1b0] sm:$0xff]   ;;  %v6159_v61 = vld [vmem:[#allocation5 + $0x1e8] sm:$0xff]  }
  0x80   : > { %1016 = vmatprep.mubr.bf16.mxu0 %v6630_v47  ;;  %5728 = vmatprep.mubr.bf16.mxu1 %v6646_v57 }
  0x81   : > { %5029 = vmatpush3.bf16.msra.mxu1 %v6130_v6  ;;  %5757 = vmatpush3.bf16.msra.mxu0 %v6145_v22  ;;  %v497_v6 = vrot.slane %v495_v0, 1  ;;  %v6160_v0 = vld [vmem:[#allocation5 + $0x1a8] sm:$0xff]  }
  0x82   : > { %5030 = vmatprep.subr.bf16.mxu1 %v6132_v7  ;;  %5758 = vmatprep.subr.bf16.mxu0 %v6148_v32  ;;  %v499_v7 = vshrl.u32 %v6662_v4, 16 }
  0x83   : > { %v6749_v14 = vsel %vm426_vm0, %v493_v8, %v497_v6  ;;  %v6172_v8 = vld [vmem:[#allocation5 + $0x180] sm:$0xff]  }
  0x85   : > { %5031 = vmatpush3.bf16.msra.mxu1 %v6133_v10  ;;  %5759 = vmatpush3.bf16.msra.mxu0 %v6148_v32  ;;  %v437_v10 = vrot.slane %v435_v5, 1  ;;  %v6151_v32 = vld [vmem:[#allocation5 + $0x220] sm:$0xff]   ;;  %v6169_v5 = vld [vmem:[#allocation5 + $0x1c8] sm:$0xff]  }
  0x86   : > { %5032 = vmatprep.subr.bf16.mxu1 %v6137_v13  ;;  %5760 = vmatprep.subr.bf16.mxu0 %v6150_v39  ;;  %v443_v13 = vshll.u32 %v6146_v40, 16  ;;  %v6158_v40 = vld [vmem:[#allocation5 + $0x210] sm:$0xff]  }
  0x87   : > { %1017 = vmatmul.mubr.bf16.gmra.mxu0 %v6609_v24  ;;  %5729 = vmatmul.mubr.bf16.gmra.mxu1 %v6658_v2  ;;  %v438_v16 = vsel %vm426_vm0, %v433_v9, %v437_v10  ;;  %v441_v22 = vor.u32 %v439_v12, %v437_v10  ;;  %v6175_v9 = vld [vmem:[#allocation5 + $0x178] sm:$0xff]   ;;  %v6180_v10 = vld [vmem:[#allocation5 + $0x170] sm:$0xff]  }
  0x88   : > { %1024 = vmatprep.mubr.bf16.mxu0 %v6675_v17  ;;  %5732 = vmatprep.mubr.bf16.mxu1 %v6678_v18 }
  0x89   : > { %5033 = vmatpush3.bf16.msra.mxu1 %v6138_v20  ;;  %5761 = vmatpush3.bf16.msra.mxu0 %v6150_v39  ;;  %v445_v20 = vrot.slane %v443_v13, 1  ;;  %v6153_v39 = vld [vmem:[#allocation5 + $0x218] sm:$0xff]   ;;  %v6177_v13 = vld [vmem:[#allocation5 + $0xf0] sm:$0xff]  }
  0x8a   : > { %5034 = vmatprep.subr.bf16.mxu1 %v6140_v21  ;;  %5762 = vmatprep.subr.bf16.mxu0 %v6152_v43  ;;  %v501_v21 = vor.u32 %v499_v7, %v497_v6  ;;  %v6170_v6 = vld [vmem:[#allocation5 + $0x188] sm:$0xff]   ;;  %v6171_v7 = vld [vmem:[#allocation5 + $0x1c0] sm:$0xff]  }
  0x8b   : > { %v446_v26 = vsel %vm426_vm0, %v441_v22, %v445_v20 }
  0x8c   : > { %v6756_v25 = vsel %vm426_vm0, %v501_v21, %v505_v19 }
  0x8d   : > { %5035 = vmatpush3.bf16.msra.mxu1 %v6141_v29  ;;  %5763 = vmatpush3.bf16.msra.mxu0 %v6152_v43  ;;  %v510_v29 = vshll.u32 %v6686_v28, 16  ;;  %v6163_v43 = vld [vmem:[#allocation5 + $0x208] sm:$0xff]  }
  0x8e   : > { %5796 = vmatprep.subr.bf16.mxu1 %v6688_v30  ;;  %5156 = vmatprep.subr.bf16.mxu0 %v6154_v55 }
  0x8f   : > { %1025 = vmatmul.mubr.bf16.gmra.mxu0 %v6633_v48  ;;  %5733 = vmatmul.mubr.bf16.gmra.mxu1 %v6694_v33 }
  0x90   : > { %1032 = vmatprep.mubr.bf16.mxu0 %v6700_v35  ;;  %5736 = vmatprep.mubr.bf16.mxu1 %v6678_v18 }
  0x97   : > { %1033 = vmatmul.mubr.bf16.gmra.mxu0 %v6636_v49  ;;  %5737 = vmatmul.mubr.bf16.gmra.mxu1 %v6694_v33 }
  0x98   : > { %1040 = vmatprep.mubr.bf16.mxu0 %v6675_v17  ;;  %5740 = vmatprep.mubr.bf16.mxu1 %v6725_v54 }
  0x9f   : > { %1041 = vmatmul.mubr.bf16.gmra.mxu0 %v6633_v48  ;;  %5741 = vmatmul.mubr.bf16.gmra.mxu1 %v6736_v62 }
  0xa0   : > { %1048 = vmatprep.mubr.bf16.mxu0 %v6700_v35  ;;  %5744 = vmatprep.mubr.bf16.mxu1 %v6725_v54 }
  0xa7   : > { %1049 = vmatmul.mubr.bf16.gmra.mxu0 %v6636_v49  ;;  %5745 = vmatmul.mubr.bf16.gmra.mxu1 %v6736_v62 }
  0xa8   : > { %1056 = vmatprep.mubr.bf16.mxu0 %v6749_v14  ;;  %1458 = vmatprep.mubr.bf16.mxu1 %v438_v16 }
  0xaf   : > { %1057 = vmatmul.mubr.bf16.gmra.mxu0 %v6655_v63  ;;  %1459 = vmatmul.mubr.bf16.vlgmr.msra.gmra.mxu1 %v6697_v34  ;;  %v508_v34 = vshrl.u32 %v6686_v28, 16 }
  0xb0   : > { %5797 = vmatpush3.bf16.msra.mxu1 %v6688_v30  ;;  %1064 = vmatprep.mubr.bf16.mxu0 %v6756_v25  ;;  %v512_v30 = vrot.slane %v510_v29, 1  ;;  %v6190_v29 = vld [vmem:[#allocation5 + $0x160] sm:$0xff]  }
  0xb1   : > { %1466 = vmatprep.mubr.bf16.mxu1 %v446_v26  ;;  %5798 = vmatprep.subr.bf16.mxu1 %v6147_v15  ;;  %v6179_v26 = vld [vmem:[#allocation5 + $0xe8] sm:$0xff]  }
  0xb2   : > { %v513_v44 = vor.u32 %v512_v30, %v508_v34  ;;  %v6261_v30 = vld [vmem:[%s6595_s28 + $0x1c] sm:$0xff]  }
  0xb4   : > { %5799 = vmatpush3.bf16.msra.mxu1 %v6147_v15 }
  0xb5   : > { %5800 = vmatprep.subr.bf16.mxu1 %v6149_v27 }
  0xb7   : > { %1065 = vmatmul.mubr.bf16.gmra.mxu0 %v6662_v4  ;;  %1467 = vmatmul.mubr.bf16.gmra.mxu1 %v6704_v38  ;;  %v517_v38 = vrot.slane %v515_v37, 1 }
  0xb8   : > { %1072 = vmatprep.mubr.bf16.mxu0 %v6749_v14  ;;  %1474 = vmatprep.mubr.bf16.mxu1 %v6626_v46 }
  0xb9   : > { %5801 = vmatpush3.bf16.msra.mxu1 %v6149_v27  ;;  %v6777_v55 = vsel %vm426_vm0, %v513_v44, %v517_v38  ;;  %v521_v59 = vor.u32 %v519_v41, %v517_v38  ;;  %v6181_v27 = vld [vmem:[#allocation5 + $0x120] sm:$0xff]   ;;  %v6197_v44 = vld [vmem:[#allocation5 + $0x158] sm:$0xff]  }
  0xba   : > { %5802 = vmatprep.subr.bf16.mxu1 %v6151_v32  ;;  %8247 = vst [vmem:[#allocation17_spill] sm:$0xff] %v6777_v55  ;;  %v6182_v38 = vld [vmem:[#allocation5 + $0xe0] sm:$0xff]  }
  0xbb   : > { %v6784_v53 = vsel %vm426_vm0, %v521_v59, %v525_v56 }
  0xbd   : > { %5803 = vmatpush3.bf16.msra.mxu1 %v6151_v32 }
  0xbe   : > { %5804 = vmatprep.subr.bf16.mxu1 %v6153_v39 }
  0xbf   : > { %1073 = vmatmul.mubr.bf16.gmra.mxu0 %v6655_v63  ;;  %1475 = vmatmul.mubr.bf16.gmra.mxu1 %v6606_v23 }
  0xc0   : > { %1080 = vmatprep.mubr.bf16.mxu0 %v6756_v25  ;;  %1482 = vmatprep.mubr.bf16.mxu1 %v6630_v47 }
  0xc1   : > { %5805 = vmatpush3.bf16.msra.mxu1 %v6153_v39 }
  0xc2   : > { %5806 = vmatprep.subr.bf16.mxu1 %v6158_v40 }
  0xc5   : > { %5807 = vmatpush3.bf16.msra.mxu1 %v6158_v40 }
  0xc6   : > { %5808 = vmatprep.subr.bf16.mxu1 %v6163_v43 }
  0xc7   : > { %1081 = vmatmul.mubr.bf16.gmra.mxu0 %v6662_v4  ;;  %1483 = vmatmul.mubr.bf16.gmra.mxu1 %v6609_v24 }
  0xc8   : > { %1088 = vmatprep.mubr.bf16.mxu0 %v6777_v55  ;;  %1490 = vmatprep.mubr.bf16.mxu1 %v6626_v46 }
  0xc9   : > { %5809 = vmatpush3.bf16.msra.mxu1 %v6163_v43  ;;  %v6183_v43 = vld [vmem:[#allocation5 + $0x118] sm:$0xff]  }
  0xca   : > { %5810 = vmatprep.subr.bf16.mxu1 %v6168_v50 }
  0xcd   : > { %5811 = vmatpush3.bf16.msra.mxu1 %v6168_v50 }
  0xce   : > { %5292 = vmatprep.subr.bf16.mxu1 %v6173_v58 }
  0xcf   : > { %1089 = vmatmul.mubr.bf16.gmra.mxu0 %v6686_v28  ;;  %1491 = vmatmul.mubr.bf16.gmra.mxu1 %v6606_v23  ;;  %v6155_v23 = vld [vmem:[#allocation5 + $0x1b8] sm:$0xff]  }
  0xd0   : > { %1096 = vmatprep.mubr.bf16.mxu0 %v6784_v53  ;;  %1498 = vmatprep.mubr.bf16.mxu1 %v6630_v47 }
  0xd7   : > { %1097 = vmatmul.mubr.bf16.gmra.mxu0 %v6691_v31  ;;  %1499 = vmatmul.mubr.bf16.gmra.mxu1 %v6609_v24  ;;  %v6156_v24 = vld [vmem:[#allocation5 + $0x1f0] sm:$0xff]  }
  0xd8   : > { %1104 = vmatprep.mubr.bf16.mxu0 %v6777_v55  ;;  %1506 = vmatprep.mubr.bf16.mxu1 %v6675_v17 }
  0xdf   : > { %1105 = vmatmul.mubr.bf16.gmra.mxu0 %v6686_v28  ;;  %1507 = vmatmul.mubr.bf16.gmra.mxu1 %v6633_v48 }
  0xe0   : > { %1112 = vmatprep.mubr.bf16.mxu0 %v6784_v53  ;;  %1514 = vmatprep.mubr.bf16.mxu1 %v6700_v35 }
  0xe7   : > { %1113 = vmatmul.mubr.bf16.gmra.mxu0 %v6691_v31  ;;  %1515 = vmatmul.mubr.bf16.gmra.mxu1 %v6636_v49 }
  0xe8   : > { %1522 = vmatprep.mubr.bf16.mxu1 %v6675_v17  ;;  %5764 = vmatprep.mubr.bf16.mxu0 %v6716_v51  ;;  %v6164_v51 = vld [vmem:[#allocation5 + $0x1d8] sm:$0xff]  }
  0xef   : > { %1523 = vmatmul.mubr.bf16.gmra.mxu1 %v6633_v48  ;;  %5765 = vmatmul.mubr.bf16.vlgmr.msra.gmra.mxu0 %v6719_v52  ;;  %v6162_v48 = vld [vmem:[#allocation5 + $0x1a0] sm:$0xff]   ;;  %v6165_v52 = vld [vmem:[#allocation5 + $0x198] sm:$0xff]  }
  0xf0   : > { %5157 = vmatpush3.bf16.msra.mxu0 %v6155_v23  ;;  %1530 = vmatprep.mubr.bf16.mxu1 %v6700_v35 }
  0xf1   : > { %5768 = vmatprep.mubr.bf16.mxu0 %v6618_v36  ;;  %5158 = vmatprep.subr.bf16.mxu0 %v6156_v24  ;;  %v6186_v24 = vld [vmem:[#allocation5 + $0x110] sm:$0xff]  }
  0xf4   : > { %5159 = vmatpush3.bf16.msra.mxu0 %v6157_v60  ;;  %v6199_v60 = vld [vmem:[#allocation5 + $0x150] sm:$0xff]  }
  0xf5   : > { %5160 = vmatprep.subr.bf16.mxu0 %v6159_v61 }
  0xf7   : > { %1531 = vmatmul.mubr.bf16.gmra.mxu1 %v6636_v49  ;;  %5769 = vmatmul.mubr.bf16.gmra.mxu0 %v6623_v42  ;;  %v6167_v49 = vld [vmem:[#allocation5 + $0x190] sm:$0xff]  }
  0xf8   : > { %1538 = vmatprep.mubr.bf16.mxu1 %v6749_v14  ;;  %5772 = vmatprep.mubr.bf16.mxu0 %v6618_v36 }
  0xf9   : > { %5161 = vmatpush3.bf16.msra.mxu0 %v6160_v0 }
  0xfa   : > { %5162 = vmatprep.subr.bf16.mxu0 %v6161_v1  ;;  %v6262_v1 = vld [vmem:[%s6595_s28 + $0x28] sm:$0xff]  }
  0xfd   : > { %5163 = vmatpush3.bf16.msra.mxu0 %v6162_v48 }
  0xfe   : > { %5164 = vmatprep.subr.bf16.mxu0 %v6164_v51 }
  0xff   : > { %1539 = vmatmul.mubr.bf16.gmra.mxu1 %v6655_v63  ;;  %5773 = vmatmul.mubr.bf16.gmra.mxu0 %v6623_v42 }
 0x100   : > { %1546 = vmatprep.mubr.bf16.mxu1 %v6756_v25  ;;  %5776 = vmatprep.mubr.bf16.mxu0 %v6646_v57 }
 0x101   : > { %5165 = vmatpush3.bf16.msra.mxu0 %v6165_v52 }
 0x102   : > { %5166 = vmatprep.subr.bf16.mxu0 %v6166_v3  ;;  %v6187_v3 = vld [vmem:[#allocation5 + $0xd0] sm:$0xff]  }
 0x105   : > { %5167 = vmatpush3.bf16.msra.mxu0 %v6167_v49 }
 0x106   : > { %5168 = vmatprep.subr.bf16.mxu0 %v6169_v5  ;;  %v6188_v5 = vld [vmem:[#allocation5 + $0x108] sm:$0xff]  }
 0x107   : > { %1547 = vmatmul.mubr.bf16.gmra.mxu1 %v6662_v4  ;;  %5777 = vmatmul.mubr.bf16.gmra.mxu0 %v6658_v2 }
 0x108   : > { %1554 = vmatprep.mubr.bf16.mxu1 %v6749_v14  ;;  %5780 = vmatprep.mubr.bf16.mxu0 %v6646_v57 }
 0x109   : > { %5169 = vmatpush3.bf16.msra.mxu0 %v6170_v6  ;;  %v6203_v6 = vld [vmem:[#allocation5 + $0x148] sm:$0xff]  }
 0x10a   : > { %5170 = vmatprep.subr.bf16.mxu0 %v6171_v7 }
 0x10d   : > { %5171 = vmatpush3.bf16.msra.mxu0 %v6172_v8 }
 0x10e   : > { %5844 = vmatprep.subr.bf16.mxu0 %v6175_v9 }
 0x10f   : > { %1555 = vmatmul.mubr.bf16.gmra.mxu1 %v6655_v63  ;;  %5781 = vmatmul.mubr.bf16.gmra.mxu0 %v6658_v2  ;;  %v6174_v63 = vld [vmem:[#allocation5 + $0xf8] sm:$0xff]  }
 0x110   : > { %1562 = vmatprep.mubr.bf16.mxu1 %v6756_v25  ;;  %5784 = vmatprep.mubr.bf16.mxu0 %v6678_v18 }
 0x117   : > { %1563 = vmatmul.mubr.bf16.gmra.mxu1 %v6662_v4  ;;  %5785 = vmatmul.mubr.bf16.gmra.mxu0 %v6694_v33  ;;  %v6176_v4 = vld [vmem:[#allocation5 + $0x130] sm:$0xff]  }
 0x118   : > { %1570 = vmatprep.mubr.bf16.mxu1 %v6777_v55  ;;  %5788 = vmatprep.mubr.bf16.mxu0 %v6678_v18 }
 0x11f   : > { %1571 = vmatmul.mubr.bf16.gmra.mxu1 %v6686_v28  ;;  %5789 = vmatmul.mubr.bf16.gmra.mxu0 %v6694_v33  ;;  %v6260_v28 = vld [vmem:[%s6595_s28 + $0x14] sm:$0xff]  }
 0x120   : > { %1578 = vmatprep.mubr.bf16.mxu1 %v6784_v53  ;;  %5792 = vmatprep.mubr.bf16.mxu0 %v6725_v54 }
 0x127   : > { %1579 = vmatmul.mubr.bf16.gmra.mxu1 %v6691_v31  ;;  %5793 = vmatmul.mubr.bf16.gmra.mxu0 %v6736_v62 }
 0x128   : > { %1973 = vmatprep.mubr.bf16.mxu0 %v6626_v46  ;;  %5812 = vmatprep.mubr.bf16.mxu1 %v6618_v36  ;;  %v6178_v46 = vld [vmem:[#allocation5 + $0x128] sm:$0xff]  }
 0x129   : > { %v6185_v36 = vld [vmem:[#allocation5 + $0x168] sm:$0xff]  }
 0x12f   : > { %v4900_v11 = vpop.f32.mrf.mxu0  ;;  %v5718_v12 = vpop.f32.mrf.mxu1  ;;  %1974 = vmatmul.mubr.bf16.vlgmr.msra.gmra.mxu0 %v6260_v28  ;;  %5813 = vmatmul.mubr.bf16.vlgmr.msra.gmra.mxu1 %v6623_v42 }
 0x130   : > { %5293 = vmatpush3.bf16.msra.mxu1 %v6174_v63  ;;  %5845 = vmatpush3.bf16.msra.mxu0 %v6175_v9 }
 0x131   : > { %v4901_v16 = vpop.f32.mrf.mxu0  ;;  %v1155_v31 = vpop.f32.mrf.mxu1  ;;  %1981 = vmatprep.mubr.bf16.mxu0 %v6630_v47  ;;  %5816 = vmatprep.mubr.bf16.mxu1 %v6646_v57 }
 0x132   : > { %v4902_v19 = vadd.f32 %v4901_v16, %v4900_v11  ;;  %5294 = vmatprep.subr.bf16.mxu1 %v6176_v4  ;;  %5846 = vmatprep.subr.bf16.mxu0 %v6180_v10  ;;  %v6189_v4 = vld [vmem:[#allocation5 + $0xc8] sm:$0xff]   ;;  %v6194_v11 = vld [vmem:[#allocation5 + $0x100] sm:$0xff]  }
 0x133   : > { %v4903_v20 = vpop.f32.mrf.mxu0  ;;  %v5719_v21 = vpop.f32.mrf.mxu1  ;;  %v6263_v16 = vld [vmem:[%s6595_s28 + $0x30] sm:$0xff]  }
 0x134   : > { %v6838_v22 = vadd.f32 %v4902_v19, %v1155_v31  ;;  %5295 = vmatpush3.bf16.msra.mxu1 %v6177_v13  ;;  %5847 = vmatpush3.bf16.msra.mxu0 %v6180_v10  ;;  %v6195_v19 = vld [vmem:[#allocation5 + $0xc0] sm:$0xff]  }
 0x135   : > { %v4904_v42 = vpop.f32.mrf.mxu0  ;;  %v1158_v15 = vpop.f32.mrf.mxu1  ;;  %5296 = vmatprep.subr.bf16.mxu1 %v6178_v46  ;;  %5848 = vmatprep.subr.bf16.mxu0 %v6185_v36 }
 0x136   : > { %v4905_v47 = vadd.f32 %v4904_v42, %v4903_v20  ;;  %v6210_v42 = vld [vmem:[#allocation5 + $0x78] sm:$0xff]  }
 0x137   : > { %v4906_v32 = vpop.f32.mrf.mxu0  ;;  %v6840_v34 = vpop.f32.mrf.mxu1  ;;  %1982 = vmatmul.mubr.bf16.gmra.mxu0 %v6261_v30  ;;  %5817 = vmatmul.mubr.bf16.gmra.mxu1 %v6658_v2 }
 0x138   : > { %v6844_v37 = vadd.f32 %v4905_v47, %v1158_v15  ;;  %1989 = vmatprep.mubr.bf16.mxu0 %v6675_v17  ;;  %5820 = vmatprep.mubr.bf16.mxu1 %v6646_v57  ;;  %v6184_v57 = vld [vmem:[#allocation5 + $0xd8] sm:$0xff]  }
 0x139   : > { %v4907_v39 = vpop.f32.mrf.mxu0  ;;  %v1171_v40 = vpop.f32.mrf.mxu1  ;;  %5297 = vmatpush3.bf16.msra.mxu1 %v6179_v26  ;;  %5849 = vmatpush3.bf16.msra.mxu0 %v6185_v36 }
 0x13a   : > { %v4908_v41 = vadd.f32 %v4907_v39, %v4906_v32  ;;  %5298 = vmatprep.subr.bf16.mxu1 %v6181_v27  ;;  %5850 = vmatprep.subr.bf16.mxu0 %v6190_v29 }
 0x13b   : > { %v4909_v45 = vpop.f32.mrf.mxu0  ;;  %v6848_v50 = vpop.f32.mrf.mxu1 }
 0x13c   : > { %v6850_v56 = vadd.f32 %v5718_v12, %v4908_v41  ;;  %v6206_v12 = vld [vmem:[#allocation5 + $0x140] sm:$0xff]  }
 0x13d   : > { %v4910_v58 = vpop.f32.mrf.mxu0  ;;  %v1174_v59 = vpop.f32.mrf.mxu1  ;;  %5299 = vmatpush3.bf16.msra.mxu1 %v6182_v38  ;;  %5851 = vmatpush3.bf16.msra.mxu0 %v6190_v29 }
 0x13e   : > { %v4911_v23 = vadd.f32 %v4910_v58, %v4909_v45  ;;  %5300 = vmatprep.subr.bf16.mxu1 %v6183_v43  ;;  %5852 = vmatprep.subr.bf16.mxu0 %v6197_v44 }
 0x13f   : > { %v4912_v61 = vpop.f32.mrf.mxu0  ;;  %v6852_v0 = vpop.f32.mrf.mxu1  ;;  %1990 = vmatmul.mubr.bf16.gmra.mxu0 %v6262_v1  ;;  %5821 = vmatmul.mubr.bf16.gmra.mxu1 %v6658_v2 }
 0x140   : > { %v6856_v48 = vadd.f32 %v5719_v21, %v4911_v23  ;;  %1997 = vmatprep.mubr.bf16.mxu0 %v6700_v35  ;;  %5824 = vmatprep.mubr.bf16.mxu1 %v6678_v18  ;;  %v6874_v21 = vld [vmem:[#allocation5 + $0xb8] sm:$0xff]  }
 0x141   : > { %v4913_v51 = vpop.f32.mrf.mxu0  ;;  %v1187_v52 = vpop.f32.mrf.mxu1  ;;  %5301 = vmatpush3.bf16.msra.mxu1 %v6184_v57  ;;  %5853 = vmatpush3.bf16.msra.mxu0 %v6197_v44 }
 0x142   : > { %v4914_v49 = vadd.f32 %v4913_v51, %v4912_v61  ;;  %5302 = vmatprep.subr.bf16.mxu1 %v6186_v24  ;;  %5854 = vmatprep.subr.bf16.mxu0 %v6199_v60 }
 0x143   : > { %v4915_v7 = vpop.f32.mrf.mxu0  ;;  %v6860_v8 = vpop.f32.mrf.mxu1 }
 0x144   : > { %v6862_v2 = vadd.f32 %v4914_v49, %v1171_v40 }
 0x145   : > { %v4916_v9 = vpop.f32.mrf.mxu0  ;;  %v1190_v63 = vpop.f32.mrf.mxu1  ;;  %5303 = vmatpush3.bf16.msra.mxu1 %v6187_v3  ;;  %5855 = vmatpush3.bf16.msra.mxu0 %v6199_v60 }
 0x146   : > { %v4917_v10 = vadd.f32 %v4916_v9, %v4915_v7  ;;  %5304 = vmatprep.subr.bf16.mxu1 %v6188_v5  ;;  %5856 = vmatprep.subr.bf16.mxu0 %v6203_v6  ;;  %v6193_v5 = vld [vmem:[%s6595_s28 + $0x74] ss:$0 sps:$4 sm:$0xff]  }
 0x147   : > { %v4918_v28 = vpop.f32.mrf.mxu0  ;;  %v6864_v13 = vpop.f32.mrf.mxu1  ;;  %1998 = vmatmul.mubr.bf16.gmra.mxu0 %v6263_v16  ;;  %5825 = vmatmul.mubr.bf16.gmra.mxu1 %v6694_v33 }
 0x148   : > { %v6868_v31 = vadd.f32 %v4917_v10, %v1174_v59  ;;  %2005 = vmatprep.mubr.bf16.mxu0 %v6675_v17  ;;  %5828 = vmatprep.mubr.bf16.mxu1 %v6678_v18 }
 0x149   : > { %v4919_v46 = vpop.f32.mrf.mxu0  ;;  %v6872_v36 = vpop.f32.mrf.mxu1  ;;  %5305 = vmatpush3.bf16.msra.mxu1 %v6189_v4  ;;  %5857 = vmatpush3.bf16.msra.mxu0 %v6203_v6 }
 0x14a   : > { %v4920_v20 = vadd.f32 %v4919_v46, %v4918_v28  ;;  %5306 = vmatprep.subr.bf16.mxu1 %v6194_v11  ;;  %5858 = vmatprep.subr.bf16.mxu0 %v6206_v12  ;;  %v676_v46 = vrot.slane %v6193_v5, 1 }
 0x14b   : > { %v4921_v15 = vpop.f32.mrf.mxu0  ;;  %v6876_v26 = vpop.f32.mrf.mxu1 }
 0x14c   : > { %v6879_v47 = vadd.f32 %v6840_v34, %v4920_v20 }
 0x14d   : > { %v4922_v17 = vpop.f32.mrf.mxu0  ;;  %v6881_v18 = vpop.f32.mrf.mxu1  ;;  %5307 = vmatpush3.bf16.msra.mxu1 %v6195_v19  ;;  %5859 = vmatpush3.bf16.msra.mxu0 %v6206_v12 }
 0x14e   : > { %v4923_v27 = vadd.f32 %v4922_v17, %v4921_v15  ;;  %5892 = vmatprep.subr.bf16.mxu1 %v6874_v21  ;;  %5428 = vmatprep.subr.bf16.mxu0 %v6210_v42 }
 0x14f   : > { %v4924_v29 = vpop.f32.mrf.mxu0  ;;  %v6884_v32 = vpop.f32.mrf.mxu1  ;;  %2006 = vmatmul.mubr.bf16.gmra.mxu0 %v6262_v1  ;;  %5829 = vmatmul.mubr.bf16.gmra.mxu1 %v6694_v33  ;;  %v6901_v33 = vld [vmem:[%s6595_s28 + $0x64] sm:$0xff]  }
 0x150   : > { %v6888_v34 = vadd.f32 %v6848_v50, %v4923_v27  ;;  %2013 = vmatprep.mubr.bf16.mxu0 %v6700_v35  ;;  %5832 = vmatprep.mubr.bf16.mxu1 %v6725_v54  ;;  %v6904_v50 = vld [vmem:[%s6595_s28 + $0x6c] sm:$0xff]   ;;  %v673_v60 = vrot.slane %v6901_v33, 1  ;;  %v530_v1 = vshll.u32 %v6901_v33, 16 }
 0x151   : > { %v4925_v30 = vpop.f32.mrf.mxu0  ;;  %v6892_v39 = vpop.f32.mrf.mxu1  ;;  %v674_v61 = vrot.slane %v6904_v50, 1  ;;  %v535_v10 = vshll.u32 %v6904_v50, 16 }
 0x152   : > { %v4926_v40 = vadd.f32 %v4925_v30, %v4924_v29  ;;  %v532_v4 = vrot.slane %v530_v1, 1 }
 0x153   : > { %v4927_v38 = vpop.f32.mrf.mxu0  ;;  %v6894_v41 = vpop.f32.mrf.mxu1  ;;  %v6927_v9 = vsel %vm647_vm1, %v673_v60, %v674_v61  ;;  %v537_v15 = vrot.slane %v535_v10, 1 }
 0x154   : > { %v6896_v43 = vadd.f32 %v4926_v40, %v1187_v52 }
 0x155   : > { %v4928_v44 = vpop.f32.mrf.mxu0  ;;  %v6898_v45 = vpop.f32.mrf.mxu1 }
 0x156   : > { %v4929_v58 = vadd.f32 %v4928_v44, %v4927_v38 }
 0x157   : > { %v4930_v35 = vpop.f32.mrf.mxu0  ;;  %v6906_v59 = vpop.f32.mrf.mxu1  ;;  %2014 = vmatmul.mubr.bf16.gmra.mxu0 %v6263_v16  ;;  %5833 = vmatmul.mubr.bf16.gmra.mxu1 %v6736_v62  ;;  %v6264_v16 = vld [vmem:[%s6595_s28 + $0x3c] sm:$0xff]  }
 0x158   : > { %v6909_v57 = vadd.f32 %v4929_v58, %v1190_v63  ;;  %2021 = vmatprep.mubr.bf16.mxu0 %v6749_v14  ;;  %5836 = vmatprep.mubr.bf16.mxu1 %v6725_v54  ;;  %v528_v63 = vshrl.u32 %v6901_v33, 16 }
 0x159   : > { %v4931_v23 = vpop.f32.mrf.mxu0  ;;  %v6913_v24 = vpop.f32.mrf.mxu1 }
 0x15a   : > { %v4932_v51 = vadd.f32 %v4931_v23, %v4930_v35  ;;  %v533_v42 = vor.u32 %v532_v4, %v528_v63  ;;  %v539_v35 = vshrl.u32 %v6904_v50, 16  ;;  %v543_v23 = vshll.u32 %v6193_v5, 16 }
 0x15b   : > { %v4933_v52 = vpop.f32.mrf.mxu0  ;;  %v6918_v3 = vpop.f32.mrf.mxu1 }
 0x15c   : > { %v6921_v49 = vadd.f32 %v6852_v0, %v4932_v51  ;;  %v6953_v44 = vsel %vm426_vm0, %v533_v42, %v537_v15  ;;  %v6265_v51 = vld [vmem:[%s6595_s28 + $0x44] sm:$0xff]   ;;  %v541_v63 = vor.u32 %v539_v35, %v537_v15  ;;  %v545_v5 = vrot.slane %v543_v23, 1 }
 0x15d   : > { %v4934_v6 = vpop.f32.mrf.mxu0  ;;  %v6924_v7 = vpop.f32.mrf.mxu1 }
 0x15e   : > { %v4935_v11 = vadd.f32 %v4934_v6, %v4933_v52 }
 0x15f   : > { %v4936_v12 = vpop.f32.mrf.mxu0  ;;  %v6931_v28 = vpop.f32.mrf.mxu1  ;;  %2022 = vmatmul.mubr.bf16.gmra.mxu0 %v6264_v16  ;;  %5837 = vmatmul.mubr.bf16.gmra.mxu1 %v6736_v62 }
 0x160   : > { %v6936_v0 = vadd.f32 %v6860_v8, %v4935_v11  ;;  %2029 = vmatprep.mubr.bf16.mxu0 %v6756_v25  ;;  %5840 = vmatprep.mubr.bf16.mxu1 %v6927_v9  ;;  %v6948_v8 = vsel %vm647_vm1, %v674_v61, %v676_v46 }
 0x161   : > { %v4937_v19 = vpop.f32.mrf.mxu0  ;;  %v6940_v20 = vpop.f32.mrf.mxu1 }
 0x162   : > { %v4938_v17 = vadd.f32 %v4937_v19, %v4936_v12 }
 0x163   : > { %v4939_v27 = vpop.f32.mrf.mxu0  ;;  %v6942_v29 = vpop.f32.mrf.mxu1 }
 0x164   : > { %v6945_v30 = vadd.f32 %v4938_v17, %v6872_v36 }
 0x165   : > { %v4940_v40 = vpop.f32.mrf.mxu0  ;;  %v6950_v38 = vpop.f32.mrf.mxu1 }
 0x166   : > { %v4941_v58 = vadd.f32 %v4940_v40, %v4939_v27  ;;  %v6202_v40 = vld [vmem:[#allocation5 + $0xa8] sm:$0xff]  }
 0x167   : > { %v4942_v60 = vpop.f32.mrf.mxu0  ;;  %v6956_v1 = vpop.f32.mrf.mxu1  ;;  %2030 = vmatmul.mubr.bf16.gmra.mxu0 %v6265_v51  ;;  %5841 = vmatmul.mubr.bf16.gmra.mxu1 %v6948_v8 }
 0x168   : > { %8248 = vst [vmem:[#allocation18_spill] sm:$0xff] %v6956_v1  ;;  %v6961_v36 = vadd.f32 %v4941_v58, %v6881_v18  ;;  %2037 = vmatprep.mubr.bf16.mxu0 %v6749_v14  ;;  %2765 = vmatprep.mubr.bf16.mxu1 %v6953_v44  ;;  %v6198_v18 = vld [vmem:[#allocation5 + $0xb0] sm:$0xff]   ;;  %v6975_v14 = vsel %vm426_vm0, %v541_v63, %v545_v5  ;;  %v6205_v5 = vld [vmem:[#allocation5 + $0xa0] sm:$0xff]  }
 0x169   : > { %v4943_v61 = vpop.f32.mrf.mxu0  ;;  %v6965_v52 = vpop.f32.mrf.mxu1  ;;  %8250 = vst [vmem:[#allocation20_spill] sm:$0xff] %v6975_v14 }
 0x16a   : > { %v4944_v6 = vadd.f32 %v4943_v61, %v4942_v60 }
 0x16b   : > { %v4945_v4 = vpop.f32.mrf.mxu0  ;;  %v6967_v10 = vpop.f32.mrf.mxu1 }
 0x16c   : > { %8249 = vst [vmem:[#allocation19_spill] sm:$0xff] %v6967_v10  ;;  %v6970_v11 = vadd.f32 %v6864_v13, %v4944_v6 }
 0x16d   : > { %v4946_v12 = vpop.f32.mrf.mxu0  ;;  %v6972_v46 = vpop.f32.mrf.mxu1 }
 0x16e   : > { %v4947_v19 = vadd.f32 %v4946_v12, %v4945_v4 }
 0x16f   : > { %v4948_v42 = vpop.f32.mrf.mxu0  ;;  %v5036_v17 = vpop.f32.mrf.mxu1  ;;  %2038 = vmatmul.mubr.bf16.gmra.mxu0 %v6264_v16  ;;  %2766 = vmatmul.mubr.bf16.vlgmr.msra.gmra.mxu1 %v6901_v33 }
 0x170   : > { %v6979_v15 = vadd.f32 %v6876_v26, %v4947_v19  ;;  %5893 = vmatpush3.bf16.msra.mxu1 %v6874_v21  ;;  %2045 = vmatprep.mubr.bf16.mxu0 %v6756_v25  ;;  %v6991_v25 = vld [vmem:[%s6595_s28 + $0x78] sm:$0xff]  }
 0x171   : > { %v4949_v13 = vpop.f32.mrf.mxu0  ;;  %v5037_v27 = vpop.f32.mrf.mxu1  ;;  %2773 = vmatprep.mubr.bf16.mxu1 %v6975_v14  ;;  %5894 = vmatprep.subr.bf16.mxu1 %v6198_v18 }
 0x172   : > { %v4950_v58 = vadd.f32 %v4949_v13, %v4948_v42  ;;  %v5038_v35 = vadd.f32 %v5037_v27, %v5036_v17  ;;  %v7003_v42 = vld [vmem:[%s6595_s28 + $0x80] sm:$0xff]   ;;  %v550_v17 = vshll.u32 %v6991_v25, 16 }
 0x173   : > { %v4951_v23 = vpop.f32.mrf.mxu0  ;;  %v5039_v16 = vpop.f32.mrf.mxu1  ;;  %v6209_v27 = vld [vmem:[#allocation5 + $0x98] sm:$0xff]  }
 0x174   : > { %v6985_v60 = vadd.f32 %v4950_v58, %v6892_v39  ;;  %5895 = vmatpush3.bf16.msra.mxu1 %v6198_v18  ;;  %v6988_v26 = vadd.f32 %v5038_v35, %v6838_v22 }
 0x175   : > { %v4952_v21 = vpop.f32.mrf.mxu0  ;;  %v5040_v61 = vpop.f32.mrf.mxu1  ;;  %5896 = vmatprep.subr.bf16.mxu1 %v6202_v40 }
 0x176   : > { %v4953_v6 = vadd.f32 %v4952_v21, %v4951_v23  ;;  %v5041_v63 = vadd.f32 %v5040_v61, %v5039_v16  ;;  %v548_v21 = vshrl.u32 %v6991_v25, 16  ;;  %v552_v61 = vrot.slane %v550_v17, 1 }
 0x177   : > { %v4954_v4 = vpop.f32.mrf.mxu0  ;;  %v5042_v12 = vpop.f32.mrf.mxu1  ;;  %2046 = vmatmul.mubr.bf16.gmra.mxu0 %v6265_v51  ;;  %2774 = vmatmul.mubr.bf16.gmra.mxu1 %v6904_v50 }
 0x178   : > { %v6995_v39 = vadd.f32 %v4953_v6, %v6898_v45  ;;  %2053 = vmatprep.mubr.bf16.mxu0 %v6777_v55  ;;  %2781 = vmatprep.mubr.bf16.mxu1 %v6953_v44  ;;  %v7000_v22 = vadd.f32 %v5041_v63, %v6844_v37 }
 0x179   : > { %v4955_v18 = vpop.f32.mrf.mxu0  ;;  %v5043_v19 = vpop.f32.mrf.mxu1  ;;  %5897 = vmatpush3.bf16.msra.mxu1 %v6202_v40  ;;  %v555_v40 = vshll.u32 %v7003_v42, 16 }
 0x17a   : > { %v4956_v51 = vadd.f32 %v4955_v18, %v4954_v4  ;;  %v5044_v13 = vadd.f32 %v5043_v19, %v5042_v12  ;;  %5898 = vmatprep.subr.bf16.mxu1 %v6205_v5  ;;  %v6215_v4 = vld [vmem:[#allocation5 + $0x90] sm:$0xff]  }
 0x17b   : > { %v4957_v45 = vpop.f32.mrf.mxu0  ;;  %v5045_v58 = vpop.f32.mrf.mxu1 }
 0x17c   : > { %v7007_v35 = vadd.f32 %v6884_v32, %v4956_v51  ;;  %v7010_v37 = vadd.f32 %v5044_v13, %v6850_v56  ;;  %v7015_v32 = vld [vmem:[%s6595_s28 + $0x50] sm:$0xff]   ;;  %v553_v51 = vor.u32 %v552_v61, %v548_v21  ;;  %v557_v13 = vrot.slane %v555_v40, 1 }
 0x17d   : > { %v4958_v23 = vpop.f32.mrf.mxu0  ;;  %v5046_v16 = vpop.f32.mrf.mxu1  ;;  %5899 = vmatpush3.bf16.msra.mxu1 %v6205_v5 }
 0x17e   : > { %v4959_v6 = vadd.f32 %v4958_v23, %v4957_v45  ;;  %v5047_v63 = vadd.f32 %v5046_v16, %v5045_v58  ;;  %5900 = vmatprep.subr.bf16.mxu1 %v6209_v27  ;;  %v7028_v45 = vld [vmem:[%s6595_s28 + $0x88] ss:$0 sps:$4 sm:$0xff]   ;;  %v6222_v16 = vld [vmem:[#allocation5 + $0x88] sm:$0xff]   ;;  %v7037_v21 = vsel %vm426_vm0, %v553_v51, %v557_v13 }
 0x17f   : > { %v4960_v12 = vpop.f32.mrf.mxu0  ;;  %v5048_v18 = vpop.f32.mrf.mxu1  ;;  %2054 = vmatmul.mubr.bf16.gmra.mxu0 %v7015_v32  ;;  %2782 = vmatmul.mubr.bf16.gmra.mxu1 %v6901_v33  ;;  %8251 = vst [vmem:[#allocation21_spill] sm:$0xff] %v7037_v21  ;;  %v563_v61 = vshll.u32 %v7028_v45, 16 }
 0x180   : > { %v7020_v56 = vadd.f32 %v6894_v41, %v4959_v6  ;;  %2061 = vmatprep.mubr.bf16.mxu0 %v6784_v53  ;;  %2789 = vmatprep.mubr.bf16.mxu1 %v6975_v14  ;;  %v7025_v5 = vadd.f32 %v5047_v63, %v6856_v48 }
 0x181   : > { %v4961_v19 = vpop.f32.mrf.mxu0  ;;  %v5049_v17 = vpop.f32.mrf.mxu1  ;;  %5901 = vmatpush3.bf16.msra.mxu1 %v6209_v27  ;;  %v559_v27 = vshrl.u32 %v7003_v42, 16 }
 0x182   : > { %v4962_v58 = vadd.f32 %v4961_v19, %v4960_v12  ;;  %v5050_v23 = vadd.f32 %v5049_v17, %v5048_v18  ;;  %5902 = vmatprep.subr.bf16.mxu1 %v6215_v4  ;;  %v6228_v18 = vld [vmem:[#allocation5 + $0x80] sm:$0xff]   ;;  %v7042_v17 = vld [vmem:[%s6595_s28 + $0x58] sm:$0xff]  }
 0x183   : > { %v4963_v41 = vpop.f32.mrf.mxu0  ;;  %v5051_v6 = vpop.f32.mrf.mxu1 }
 0x184   : > { %v7031_v62 = vadd.f32 %v4962_v58, %v6913_v24  ;;  %v7034_v48 = vadd.f32 %v5050_v23, %v6862_v2  ;;  %v561_v58 = vor.u32 %v559_v27, %v557_v13  ;;  %v565_v23 = vrot.slane %v563_v61, 1 }
 0x185   : > { %v4964_v63 = vpop.f32.mrf.mxu0  ;;  %v5052_v10 = vpop.f32.mrf.mxu1  ;;  %5903 = vmatpush3.bf16.msra.mxu1 %v6215_v4 }
 0x186   : > { %v4965_v40 = vadd.f32 %v4964_v63, %v4963_v41  ;;  %v5053_v12 = vadd.f32 %v5052_v10, %v5051_v6  ;;  %5904 = vmatprep.subr.bf16.mxu1 %v6222_v16  ;;  %v6233_v63 = vld [vmem:[#allocation5 + $0x1f8] sm:$0xff]  }
 0x187   : > { %v4966_v19 = vpop.f32.mrf.mxu0  ;;  %v5054_v24 = vpop.f32.mrf.mxu1  ;;  %2062 = vmatmul.mubr.bf16.gmra.mxu0 %v7042_v17  ;;  %2790 = vmatmul.mubr.bf16.gmra.mxu1 %v6904_v50 }
 0x188   : > { %v7047_v2 = vadd.f32 %v4965_v40, %v6924_v7  ;;  %2069 = vmatprep.mubr.bf16.mxu0 %v6777_v55  ;;  %2797 = vmatprep.mubr.bf16.mxu1 %v7037_v21  ;;  %v7052_v4 = vadd.f32 %v5053_v12, %v6868_v31  ;;  %v7061_v12 = vsel %vm426_vm0, %v561_v58, %v565_v23  ;;  %v7080_v23 = vld [vmem:[%s6595_s28 + $0x8c] sm:$0xff]  }
 0x189   : > { %v4967_v10 = vpop.f32.mrf.mxu0  ;;  %v5055_v51 = vpop.f32.mrf.mxu1  ;;  %5905 = vmatpush3.bf16.msra.mxu1 %v6222_v16  ;;  %8252 = vst [vmem:[#allocation22_spill] sm:$0xff] %v7061_v12 }
 0x18a   : > { %v4968_v41 = vadd.f32 %v4967_v10, %v4966_v19  ;;  %v5056_v6 = vadd.f32 %v5055_v51, %v5054_v24  ;;  %5906 = vmatprep.subr.bf16.mxu1 %v6228_v18 }
 0x18b   : > { %v4969_v1 = vpop.f32.mrf.mxu0  ;;  %v5057_v54 = vpop.f32.mrf.mxu1 }
 0x18c   : > { %v7055_v7 = vadd.f32 %v6906_v59, %v4968_v41  ;;  %v7058_v40 = vadd.f32 %v5056_v6, %v6879_v47 }
 0x18d   : > { %v4970_v55 = vpop.f32.mrf.mxu0  ;;  %v5058_v31 = vpop.f32.mrf.mxu1  ;;  %5907 = vmatpush3.bf16.msra.mxu1 %v6228_v18 }
 0x18e   : > { %v4971_v13 = vadd.f32 %v4970_v55, %v4969_v1  ;;  %v5059_v16 = vadd.f32 %v5058_v31, %v5057_v54  ;;  %5564 = vmatprep.subr.bf16.mxu1 %v6233_v63 }
 0x18f   : > { %v4972_v27 = vpop.f32.mrf.mxu0  ;;  %v5060_v61 = vpop.f32.mrf.mxu1  ;;  %2070 = vmatmul.mubr.bf16.gmra.mxu0 %v7015_v32  ;;  %2798 = vmatmul.mubr.bf16.gmra.mxu1 %v6991_v25 }
 0x190   : > { %v7066_v59 = vadd.f32 %v6918_v3, %v4971_v13  ;;  %2077 = vmatprep.mubr.bf16.mxu0 %v6784_v53  ;;  %2805 = vmatprep.mubr.bf16.mxu1 %v7061_v12  ;;  %v7071_v47 = vadd.f32 %v5059_v16, %v6888_v34  ;;  %v7093_v16 = vld [vmem:[%s6595_s28 + $0x94] sm:$0xff]  }
 0x191   : > { %v4973_v55 = vpop.f32.mrf.mxu0  ;;  %v5061_v54 = vpop.f32.mrf.mxu1 }
 0x192   : > { %v4974_v1 = vadd.f32 %v4973_v55, %v4972_v27  ;;  %v5062_v18 = vadd.f32 %v5061_v54, %v5060_v61  ;;  %v570_v27 = vshll.u32 %v7080_v23, 16 }
 0x193   : > { %v4975_v19 = vpop.f32.mrf.mxu0  ;;  %v5063_v24 = vpop.f32.mrf.mxu1 }
 0x194   : > { %v7074_v10 = vadd.f32 %v4974_v1, %v6940_v20  ;;  %v7077_v51 = vadd.f32 %v5062_v18, %v6896_v43 }
 0x195   : > { %v4976_v3 = vpop.f32.mrf.mxu0  ;;  %v5064_v58 = vpop.f32.mrf.mxu1 }
 0x196   : > { %v4977_v41 = vadd.f32 %v4976_v3, %v4975_v19  ;;  %v5065_v34 = vadd.f32 %v5064_v58, %v5063_v24  ;;  %v572_v3 = vrot.slane %v570_v27, 1  ;;  %v575_v58 = vshll.u32 %v7093_v16, 16 }
 0x197   : > { %v4978_v6 = vpop.f32.mrf.mxu0  ;;  %v5066_v63 = vpop.f32.mrf.mxu1  ;;  %2078 = vmatmul.mubr.bf16.gmra.mxu0 %v7042_v17  ;;  %2806 = vmatmul.mubr.bf16.gmra.mxu1 %v7003_v42 }
 0x198   : > { %v7085_v31 = vadd.f32 %v4977_v41, %v6950_v38  ;;  %2085 = vmatprep.mubr.bf16.mxu0 %v6953_v44  ;;  %2813 = vmatprep.mubr.bf16.mxu1 %v7037_v21  ;;  %v7090_v43 = vadd.f32 %v5065_v34, %v6909_v57  ;;  %v568_v57 = vshrl.u32 %v7080_v23, 16 }
 0x199   : > { %v4979_v20 = vpop.f32.mrf.mxu0  ;;  %v5067_v13 = vpop.f32.mrf.mxu1 }
 0x19a   : > { %v4980_v61 = vadd.f32 %v4979_v20, %v4978_v6  ;;  %v5068_v55 = vadd.f32 %v5067_v13, %v5066_v63  ;;  %v573_v27 = vor.u32 %v572_v3, %v568_v57  ;;  %v579_v57 = vshrl.u32 %v7093_v16, 16 }
 0x19b   : > { %v4981_v54 = vpop.f32.mrf.mxu0  ;;  %v5069_v1 = vpop.f32.mrf.mxu1 }
 0x19c   : > { %v7097_v38 = vadd.f32 %v6931_v28, %v4980_v61  ;;  %v7100_v18 = vadd.f32 %v5068_v55, %v6921_v49  ;;  %v577_v61 = vrot.slane %v575_v58, 1  ;;  %v7115_v55 = vld [vmem:[%s6595_s28 + $0x9c] ss:$0 sps:$4 sm:$0xff]  }
 0x19d   : > { %v4982_v19 = vpop.f32.mrf.mxu0  ;;  %v5070_v24 = vpop.f32.mrf.mxu1  ;;  %v583_v3 = vshll.u32 %v7115_v55, 16 }
 0x19e   : > { %v4983_v41 = vadd.f32 %v4982_v19, %v4981_v54  ;;  %v5071_v34 = vadd.f32 %v5070_v24, %v5069_v1 }
 0x19f   : > { %v4984_v6 = vpop.f32.mrf.mxu0  ;;  %v5072_v63 = vpop.f32.mrf.mxu1  ;;  %2086 = vmatmul.mubr.bf16.gmra.mxu0 %v6901_v33  ;;  %2814 = vmatmul.mubr.bf16.gmra.mxu1 %v6991_v25 }
 0x1a0   : > { %v7107_v28 = vadd.f32 %v6942_v29, %v4983_v41  ;;  %2093 = vmatprep.mubr.bf16.mxu0 %v6975_v14  ;;  %2821 = vmatprep.mubr.bf16.mxu1 %v7061_v12  ;;  %v7112_v49 = vadd.f32 %v5071_v34, %v6936_v0  ;;  %v7124_v0 = vsel %vm426_vm0, %v573_v27, %v577_v61 }
 0x1a1   : > { %v4985_v20 = vpop.f32.mrf.mxu0  ;;  %v5073_v13 = vpop.f32.mrf.mxu1  ;;  %8253 = vst [vmem:[#allocation23_spill] sm:$0xff] %v7124_v0  ;;  %v581_v27 = vor.u32 %v579_v57, %v577_v61 }
 0x1a2   : > { %v4986_v54 = vadd.f32 %v4985_v20, %v4984_v6  ;;  %v5074_v33 = vadd.f32 %v5073_v13, %v5072_v63 }
 0x1a3   : > { %v4987_v1 = vpop.f32.mrf.mxu0  ;;  %v5075_v19 = vpop.f32.mrf.mxu1 }
 0x1a4   : > { %v7118_v29 = vadd.f32 %v4986_v54, %v6965_v52  ;;  %v7121_v24 = vadd.f32 %v5074_v33, %v6945_v30 }
 0x1a5   : > { %v4988_v41 = vpop.f32.mrf.mxu0  ;;  %v5076_v12 = vpop.f32.mrf.mxu1 }
 0x1a6   : > { %v4989_v58 = vadd.f32 %v4988_v41, %v4987_v1  ;;  %v5077_v34 = vadd.f32 %v5076_v12, %v5075_v19  ;;  %v585_v12 = vrot.slane %v583_v3, 1  ;;  %v6211_v19 = vld [vmem:[#allocation5 + $0x38] sm:$0xff]  }
 0x1a7   : > { %v4990_v6 = vpop.f32.mrf.mxu0  ;;  %v5078_v63 = vpop.f32.mrf.mxu1  ;;  %2094 = vmatmul.mubr.bf16.gmra.mxu0 %v6904_v50  ;;  %2822 = vmatmul.mubr.bf16.gmra.mxu1 %v7003_v42 }
 0x1a8   : > { %v7131_v30 = vadd.f32 %v4989_v58, %v6972_v46  ;;  %2829 = vmatprep.mubr.bf16.mxu1 %v7124_v0  ;;  %5860 = vmatprep.mubr.bf16.mxu0 %v6927_v9  ;;  %v7136_v52 = vadd.f32 %v5077_v34, %v6961_v36  ;;  %v7144_v21 = vsel %vm426_vm0, %v581_v27, %v585_v12  ;;  %v6213_v36 = vld [vmem:[#allocation5 + $0x70] sm:$0xff]   ;;  %v679_v27 = vrot.slane %v7003_v42, 1  ;;  %v6216_v12 = vld [vmem:[#allocation5 + $0x68] sm:$0xff]  }
 0x1a9   : > { %v4991_v20 = vpop.f32.mrf.mxu0  ;;  %v5079_v13 = vpop.f32.mrf.mxu1  ;;  %8254 = vst [vmem:[#allocation24_spill] sm:$0xff] %v7144_v21  ;;  %v6217_v42 = vld [vmem:[#allocation5 + $0x28] sm:$0xff]  }
 0x1aa   : > { %v7138_v54 = vadd.f32 %v4991_v20, %v4990_v6  ;;  %v5080_v33 = vadd.f32 %v5079_v13, %v5078_v63  ;;  %v678_v13 = vrot.slane %v6991_v25, 1 }
 0x1ab   : > { %v4993_v50 = vpop.f32.mrf.mxu0  ;;  %v5081_v1 = vpop.f32.mrf.mxu1 }
 0x1ac   : > { %v7141_v46 = vadd.f32 %v5080_v33, %v6970_v11  ;;  %v6214_v11 = vld [vmem:[#allocation5 + $0x30] sm:$0xff]   ;;  %v7170_v25 = vsel %vm647_vm1, %v678_v13, %v679_v27  ;;  %v6219_v13 = vld [vmem:[#allocation5 + $0x20] sm:$0xff]  }
 0x1ad   : > { %v4994_v41 = vpop.f32.mrf.mxu0  ;;  %v5082_v58 = vpop.f32.mrf.mxu1 }
 0x1ae   : > { %v7146_v34 = vadd.f32 %v4994_v41, %v4993_v50  ;;  %v5083_v14 = vadd.f32 %v5082_v58, %v5081_v1  ;;  %v7173_v58 = vld [vmem:[%s6595_s28 + $0xa0] sm:$0xff]  }
 0x1af   : > { %v5084_v61 = vpop.f32.mrf.mxu1  ;;  %v5766_v57 = vpop.f32.mrf.mxu0  ;;  %2830 = vmatmul.mubr.bf16.gmra.mxu1 %v7080_v23  ;;  %5861 = vmatmul.mubr.bf16.vlgmr.msra.gmra.mxu0 %v6948_v8 }
 0x1b0   : > { %v7151_v3 = vadd.f32 %v5766_v57, %v7010_v37  ;;  %5429 = vmatpush3.bf16.msra.mxu0 %v6211_v19  ;;  %2837 = vmatprep.mubr.bf16.mxu1 %v7144_v21  ;;  %v7155_v6 = vadd.f32 %v5083_v14, %v6979_v15 }
 0x1b1   : > { %v5085_v63 = vpop.f32.mrf.mxu1  ;;  %v1621_v20 = vpop.f32.mrf.mxu0  ;;  %5864 = vmatprep.mubr.bf16.mxu0 %v6927_v9  ;;  %5430 = vmatprep.subr.bf16.mxu0 %v6213_v36 }
 0x1b2   : > { %v5086_v37 = vadd.f32 %v5085_v63, %v5084_v61  ;;  %v7161_v33 = vadd.f32 %v1621_v20, %v6988_v26 }
 0x1b3   : > { %v5087_v50 = vpop.f32.mrf.mxu1  ;;  %v5767_v1 = vpop.f32.mrf.mxu0 }
 0x1b4   : > { %v7164_v14 = vadd.f32 %v5767_v1, %v7025_v5  ;;  %5431 = vmatpush3.bf16.msra.mxu0 %v6214_v11  ;;  %v7167_v15 = vadd.f32 %v5086_v37, %v6985_v60  ;;  %v6218_v5 = vld [vmem:[#allocation5 + $0x60] sm:$0xff]   ;;  %v681_v11 = vrot.slane %v7028_v45, 1  ;;  %v590_v37 = vshll.u32 %v7173_v58, 16  ;;  %v6223_v1 = vld [vmem:[#allocation5 + $0x58] sm:$0xff]  }
 0x1b5   : > { %v5088_v19 = vpop.f32.mrf.mxu1  ;;  %v1624_v41 = vpop.f32.mrf.mxu0  ;;  %5432 = vmatprep.subr.bf16.mxu0 %v6216_v12  ;;  %v7190_v12 = vld [vmem:[%s6595_s28 + $0xa8] sm:$0xff]  }
 0x1b6   : > { %v5089_v26 = vadd.f32 %v5088_v19, %v5087_v50  ;;  %v7176_v36 = vadd.f32 %v1624_v41, %v7000_v22 }
 0x1b7   : > { %v5090_v61 = vpop.f32.mrf.mxu1  ;;  %v5770_v57 = vpop.f32.mrf.mxu0  ;;  %2838 = vmatmul.mubr.bf16.gmra.mxu1 %v7093_v16  ;;  %5865 = vmatmul.mubr.bf16.gmra.mxu0 %v6948_v8 }
 0x1b8   : > { %v7181_v60 = vadd.f32 %v5770_v57, %v7058_v40  ;;  %2845 = vmatprep.mubr.bf16.mxu1 %v7124_v0  ;;  %5868 = vmatprep.mubr.bf16.mxu0 %v7170_v25  ;;  %v7187_v63 = vadd.f32 %v5089_v26, %v6995_v39  ;;  %v7200_v39 = vsel %vm647_vm1, %v679_v27, %v681_v11 }
 0x1b9   : > { %v5091_v22 = vpop.f32.mrf.mxu1  ;;  %v1637_v20 = vpop.f32.mrf.mxu0  ;;  %5433 = vmatpush3.bf16.msra.mxu0 %v6217_v42 }
 0x1ba   : > { %v5092_v50 = vadd.f32 %v5091_v22, %v5090_v61  ;;  %v7194_v40 = vadd.f32 %v1637_v20, %v7034_v48  ;;  %5434 = vmatprep.subr.bf16.mxu0 %v6218_v5  ;;  %v588_v61 = vshrl.u32 %v7173_v58, 16  ;;  %v592_v48 = vrot.slane %v590_v37, 1  ;;  %v6224_v22 = vld [vmem:[#allocation5 + $0x18] sm:$0xff]  }
 0x1bb   : > { %v5093_v19 = vpop.f32.mrf.mxu1  ;;  %v5771_v41 = vpop.f32.mrf.mxu0  ;;  %v595_v5 = vshll.u32 %v7190_v12, 16 }
 0x1bc   : > { %v7197_v45 = vadd.f32 %v5771_v41, %v7071_v47  ;;  %v7203_v42 = vadd.f32 %v5092_v50, %v7007_v35  ;;  %v6226_v47 = vld [vmem:[#allocation5 + $0x50] sm:$0xff]   ;;  %v593_v50 = vor.u32 %v592_v48, %v588_v61  ;;  %v684_v41 = vrot.slane %v7093_v16, 1 }
 0x1bd   : > { %v5094_v26 = vpop.f32.mrf.mxu1  ;;  %v1640_v57 = vpop.f32.mrf.mxu0  ;;  %5435 = vmatpush3.bf16.msra.mxu0 %v6219_v13 }
 0x1be   : > { %v5095_v20 = vadd.f32 %v5094_v26, %v5093_v19  ;;  %v7208_v0 = vadd.f32 %v1640_v57, %v7052_v4  ;;  %5436 = vmatprep.subr.bf16.mxu0 %v6223_v1  ;;  %v597_v1 = vrot.slane %v595_v5, 1  ;;  %v683_v19 = vrot.slane %v7080_v23, 1  ;;  %v7223_v26 = vld [vmem:[%s6595_s28 + $0xb0] ss:$0 sps:$4 sm:$0xff]  }
 0x1bf   : > { %v5096_v27 = vpop.f32.mrf.mxu1  ;;  %v5774_v11 = vpop.f32.mrf.mxu0  ;;  %2846 = vmatmul.mubr.bf16.gmra.mxu1 %v7080_v23  ;;  %5869 = vmatmul.mubr.bf16.gmra.mxu0 %v7200_v39 }
 0x1c0   : > { %v7213_v35 = vadd.f32 %v5774_v11, %v7100_v18  ;;  %2853 = vmatprep.mubr.bf16.mxu1 %v7144_v21  ;;  %5872 = vmatprep.mubr.bf16.mxu0 %v7170_v25  ;;  %v7218_v13 = vadd.f32 %v5095_v20, %v7020_v56  ;;  %v6227_v18 = vld [vmem:[#allocation5 + $0x10] sm:$0xff]   ;;  %v6229_v21 = vld [vmem:[#allocation5 + $0x48] sm:$0xff]   ;;  %v7235_v5 = vsel %vm426_vm0, %v593_v50, %v597_v1 }
 0x1c1   : > { %v5097_v4 = vpop.f32.mrf.mxu1  ;;  %v1653_v37 = vpop.f32.mrf.mxu0  ;;  %5437 = vmatpush3.bf16.msra.mxu0 %v6224_v22  ;;  %v7238_v22 = vsel %vm647_vm1, %v683_v19, %v684_v41  ;;  %v686_v19 = vrot.slane %v7115_v55, 1 }
 0x1c2   : > { %8255 = vst [vmem:[#allocation25_spill] sm:$0xff] %v7213_v35  ;;  %v5098_v57 = vadd.f32 %v5097_v4, %v5096_v27  ;;  %v7226_v11 = vadd.f32 %v1653_v37, %v7077_v51  ;;  %5438 = vmatprep.subr.bf16.mxu0 %v6226_v47  ;;  %v599_v51 = vshrl.u32 %v7190_v12, 16  ;;  %v603_v47 = vshll.u32 %v7223_v26, 16  ;;  %v6230_v27 = vld [vmem:[#allocation5 + $0x8] sm:$0xff]  }
 0x1c3   : > { %v5099_v56 = vpop.f32.mrf.mxu1  ;;  %v5775_v20 = vpop.f32.mrf.mxu0 }
 0x1c4   : > { %v7229_v35 = vadd.f32 %v5775_v20, %v7112_v49  ;;  %v7232_v61 = vadd.f32 %v5098_v57, %v7031_v62  ;;  %v6231_v62 = vld [vmem:[#allocation5 + $0x40] sm:$0xff]   ;;  %v605_v20 = vrot.slane %v603_v47, 1 }
 0x1c5   : > { %v5100_v23 = vpop.f32.mrf.mxu1  ;;  %v1656_v48 = vpop.f32.mrf.mxu0  ;;  %5439 = vmatpush3.bf16.msra.mxu0 %v6227_v18 }
 0x1c6   : > { %v5101_v4 = vadd.f32 %v5100_v23, %v5099_v56  ;;  %v7243_v49 = vadd.f32 %v1656_v48, %v7090_v43  ;;  %5440 = vmatprep.subr.bf16.mxu0 %v6229_v21  ;;  %v601_v56 = vor.u32 %v599_v51, %v597_v1 }
 0x1c7   : > { %v5102_v37 = vpop.f32.mrf.mxu1  ;;  %v5778_v57 = vpop.f32.mrf.mxu0  ;;  %2854 = vmatmul.mubr.bf16.gmra.mxu1 %v7093_v16  ;;  %5873 = vmatmul.mubr.bf16.gmra.mxu0 %v7200_v39  ;;  %v6232_v16 = vld [vmem:[#allocation5] sm:$0xff]  }
 0x1c8   : > { %v7248_v50 = vadd.f32 %v5778_v57, %v7141_v46  ;;  %2861 = vmatprep.mubr.bf16.mxu1 %v7235_v5  ;;  %5876 = vmatprep.mubr.bf16.mxu0 %v7238_v22  ;;  %v7254_v43 = vadd.f32 %v5101_v4, %v7047_v2  ;;  %v7259_v46 = vld [vmem:[#allocation5 + $0x238] sm:$0xff]   ;;  %v7265_v2 = vsel %vm647_vm1, %v684_v41, %v686_v19  ;;  %v689_v19 = vrot.slane %v7190_v12, 1 }
 0x1c9   : > { %v5103_v21 = vpop.f32.mrf.mxu1  ;;  %v1669_v18 = vpop.f32.mrf.mxu0  ;;  %5441 = vmatpush3.bf16.msra.mxu0 %v6230_v27  ;;  %8257 = vst [vmem:[#allocation27_spill] sm:$0xff] %v7265_v2  ;;  %v7269_v27 = vsel %vm426_vm0, %v601_v56, %v605_v20 }
 0x1ca   : > { %8256 = vst [vmem:[#allocation26_spill] sm:$0xff] %v7248_v50  ;;  %v5104_v23 = vadd.f32 %v5103_v21, %v5102_v37  ;;  %v7257_v48 = vadd.f32 %v1669_v18, %v7121_v24  ;;  %5442 = vmatprep.subr.bf16.mxu0 %v6231_v62  ;;  %8258 = vst [vmem:[#allocation28_spill] sm:$0xff] %v7269_v27 }
 0x1cb   : > { %v5105_v57 = vpop.f32.mrf.mxu1  ;;  %v5779_v50 = vpop.f32.mrf.mxu0 }
 0x1cc   : > { %v7262_v55 = vadd.f32 %v5779_v50, %v7155_v6  ;;  %v1549_v1 = vadd.f32 %v5104_v23, %v7055_v7  ;;  %v688_v50 = vrot.slane %v7173_v58, 1 }
 0x1cd   : > { %v5106_v51 = vpop.f32.mrf.mxu1  ;;  %v1672_v47 = vpop.f32.mrf.mxu0  ;;  %5443 = vmatpush3.bf16.msra.mxu0 %v6232_v16 }
 0x1ce   : > { %v5107_v24 = vadd.f32 %v5106_v51, %v5105_v57  ;;  %v7272_v4 = vadd.f32 %v1672_v47, %v7136_v52  ;;  %5940 = vmatprep.subr.bf16.mxu0 %v7259_v46 }
 0x1cf   : > { %v5108_v62 = vpop.f32.mrf.mxu1  ;;  %v5782_v6 = vpop.f32.mrf.mxu0  ;;  %2862 = vmatmul.mubr.bf16.gmra.mxu1 %v7173_v58  ;;  %5877 = vmatmul.mubr.bf16.gmra.mxu0 %v7265_v2 }
 0x1d0   : > { %v7278_v7 = vadd.f32 %v5782_v6, %v7203_v42  ;;  %2869 = vmatprep.mubr.bf16.mxu1 %v7269_v27  ;;  %5880 = vmatprep.mubr.bf16.mxu0 %v7238_v22  ;;  %v1552_v41 = vadd.f32 %v5107_v24, %v7066_v59  ;;  %v7293_v59 = vsel %vm647_vm1, %v688_v50, %v689_v19 }
 0x1d1   : > { %v5109_v37 = vpop.f32.mrf.mxu1  ;;  %v1685_v52 = vpop.f32.mrf.mxu0  ;;  %8259 = vst [vmem:[#allocation29_spill] sm:$0xff] %v7293_v59 }
 0x1d2   : > { %v5110_v21 = vadd.f32 %v5109_v37, %v5108_v62  ;;  %v7286_v18 = vadd.f32 %v1685_v52, %v7167_v15 }
 0x1d3   : > { %v5111_v56 = vpop.f32.mrf.mxu1  ;;  %v5783_v20 = vpop.f32.mrf.mxu0 }
 0x1d4   : > { %v7289_v42 = vadd.f32 %v5783_v20, %v7218_v13  ;;  %v1557_v16 = vadd.f32 %v5110_v21, %v7074_v10  ;;  %v691_v10 = vrot.slane %v7223_v26, 1 }
 0x1d5   : > { %v5112_v23 = vpop.f32.mrf.mxu1  ;;  %v1688_v57 = vpop.f32.mrf.mxu0 }
 0x1d6   : > { %v5113_v51 = vadd.f32 %v5112_v23, %v5111_v56  ;;  %v7296_v47 = vadd.f32 %v1688_v57, %v7187_v63  ;;  %v7313_v20 = vsel %vm647_vm1, %v689_v19, %v691_v10 }
 0x1d7   : > { %v5114_v24 = vpop.f32.mrf.mxu1  ;;  %v5786_v62 = vpop.f32.mrf.mxu0  ;;  %2870 = vmatmul.mubr.bf16.gmra.mxu1 %v7190_v12  ;;  %5881 = vmatmul.mubr.bf16.gmra.mxu0 %v7265_v2 }
 0x1d8   : > { %v7300_v15 = vadd.f32 %v5786_v62, %v1549_v1  ;;  %2877 = vmatprep.mubr.bf16.mxu1 %v7235_v5  ;;  %5884 = vmatprep.mubr.bf16.mxu0 %v7293_v59  ;;  %v1560_v13 = vadd.f32 %v5113_v51, %v7085_v31 }
 0x1d9   : > { %v5115_v6 = vpop.f32.mrf.mxu1  ;;  %v1701_v37 = vpop.f32.mrf.mxu0 }
 0x1da   : > { %v5116_v63 = vadd.f32 %v5115_v6, %v5114_v24  ;;  %v7307_v52 = vadd.f32 %v1701_v37, %v7232_v61 }
 0x1db   : > { %v5117_v50 = vpop.f32.mrf.mxu1  ;;  %v5787_v21 = vpop.f32.mrf.mxu0 }
 0x1dc   : > { %v7309_v56 = vadd.f32 %v5787_v21, %v1552_v41  ;;  %v1565_v1 = vadd.f32 %v5116_v63, %v7097_v38 }
 0x1dd   : > { %v5118_v23 = vpop.f32.mrf.mxu1  ;;  %v1704_v57 = vpop.f32.mrf.mxu0 }
 0x1de   : > { %v5119_v26 = vadd.f32 %v5118_v23, %v5117_v50  ;;  %v7316_v31 = vadd.f32 %v1704_v57, %v7254_v43  ;;  %v8261_v57 = vld [vmem:[#allocation17_spill] sm:$0xff] }
 0x1df   : > { %v5120_v51 = vpop.f32.mrf.mxu1  ;;  %v5790_v24 = vpop.f32.mrf.mxu0  ;;  %2878 = vmatmul.mubr.bf16.gmra.mxu1 %v7173_v58  ;;  %5885 = vmatmul.mubr.bf16.gmra.mxu0 %v7313_v20 }
 0x1e0   : > { %v7320_v61 = vadd.f32 %v5790_v24, %v1565_v1  ;;  %v1568_v41 = vadd.f32 %v5119_v26, %v7107_v28  ;;  %2885 = vmatprep.mubr.bf16.mxu1 %v7269_v27  ;;  %5888 = vmatprep.mubr.bf16.mxu0 %v7293_v59  ;;  %v8262_v26 = vld [vmem:[#allocation15_spill] sm:$0xff]  ;;  %v6240_v27 = vld [vmem:[#allocation5 + $0x230] sm:$0xff]  }
 0x1e1   : > { %v5121_v38 = vpop.f32.mrf.mxu1  ;;  %v1717_v19 = vpop.f32.mrf.mxu0 }
 0x1e2   : > { %v5122_v62 = vadd.f32 %v5121_v38, %v5120_v51  ;;  %v7325_v10 = vadd.f32 %v1717_v19, %v1557_v16 }
 0x1e3   : > { %v5123_v43 = vpop.f32.mrf.mxu1  ;;  %v5791_v6 = vpop.f32.mrf.mxu0 }
 0x1e4   : > { %v7327_v37 = vadd.f32 %v5791_v6, %v1568_v41  ;;  %v1573_v58 = vadd.f32 %v5122_v62, %v7118_v29  ;;  %v8263_v29 = vld [vmem:[#allocation18_spill] sm:$0xff] }
 0x1e5   : > { %v5124_v63 = vpop.f32.mrf.mxu1  ;;  %v1720_v50 = vpop.f32.mrf.mxu0  ;;  %v1276_v41 = vadd.f32 %v8263_v29, %v7138_v54 }
 0x1e6   : > { %8260 = vst [vmem:[#allocation30_spill] sm:$0xff] %v7327_v37  ;;  %v5125_v21 = vadd.f32 %v5124_v63, %v5123_v43  ;;  %v7330_v1 = vadd.f32 %v1720_v50, %v1560_v13  ;;  %v6236_v37 = vld [vmem:[#allocation5 + $0x1f0] sm:$0xff]  }
 0x1e7   : > { %v5126_v28 = vpop.f32.mrf.mxu1  ;;  %v5794_v23 = vpop.f32.mrf.mxu0  ;;  %2886 = vmatmul.mubr.bf16.gmra.mxu1 %v7190_v12  ;;  %5889 = vmatmul.mubr.bf16.gmra.mxu0 %v7313_v20  ;;  %v6234_v12 = vld [vmem:[#allocation5 + $0x1b8] sm:$0xff]  }
 0x1e8   : > { %v1576_v16 = vadd.f32 %v5125_v21, %v7131_v30  ;;  %3231 = vmatprep.mubr.bf16.mxu0 %v8261_v57  ;;  %5908 = vmatprep.mubr.bf16.mxu1 %v8262_v26  ;;  %v8264_v30 = vld [vmem:[#allocation19_spill] sm:$0xff] }
 0x1e9   : > { %v5127_v51 = vpop.f32.mrf.mxu1  ;;  %v1733_v24 = vpop.f32.mrf.mxu0  ;;  %v1279_v50 = vadd.f32 %v8264_v30, %v7146_v34  ;;  %v6250_v30 = vld [vmem:[#allocation5 + $0x220] sm:$0xff]  }
 0x1ea   : > { %v5128_v38 = vadd.f32 %v5127_v51, %v5126_v28  ;;  %v7339_v13 = vadd.f32 %v1733_v24, %v1573_v58  ;;  %v8265_v58 = vld [vmem:[#allocation16_spill] sm:$0xff]  ;;  %v6237_v24 = vld [vmem:[#allocation5 + $0x1b0] sm:$0xff]  }
 0x1eb   : > { %v5129_v19 = vpop.f32.mrf.mxu1  ;;  %v5795_v62 = vpop.f32.mrf.mxu0 }
 0x1ec   : > { %v1581_v43 = vadd.f32 %v5128_v38, %v1276_v41 }
 0x1ed   : > { %v5130_v6 = vpop.f32.mrf.mxu1  ;;  %v1736_v63 = vpop.f32.mrf.mxu0 }
 0x1ee   : > { %v7343_v21 = vadd.f32 %v5794_v23, %v1581_v43  ;;  %v5131_v57 = vadd.f32 %v5130_v6, %v5129_v19  ;;  %v7345_v26 = vadd.f32 %v1736_v63, %v1576_v16  ;;  %v6238_v23 = vld [vmem:[#allocation5 + $0x1e8] sm:$0xff]   ;;  %v6241_v63 = vld [vmem:[#allocation5 + $0x1e0] sm:$0xff]  }
 0x1ef   : > { %v5172_v54 = vpop.f32.mrf.mxu0  ;;  %v5814_v28 = vpop.f32.mrf.mxu1  ;;  %3232 = vmatmul.mubr.bf16.vlgmr.msra.gmra.mxu0 %v7015_v32  ;;  %5909 = vmatmul.mubr.bf16.vlgmr.msra.gmra.mxu1 %v8265_v58  ;;  %v6245_v16 = vld [vmem:[#allocation5 + $0x228] sm:$0xff]  }
 0x1f0   : > { %v1584_v51 = vadd.f32 %v5131_v57, %v1279_v50  ;;  %5565 = vmatpush3.bf16.msra.mxu1 %v6234_v12  ;;  %5941 = vmatpush3.bf16.msra.mxu0 %v7259_v46  ;;  %v6239_v6 = vld [vmem:[#allocation5 + $0x1a8] sm:$0xff]  }
 0x1f1   : > { %v5173_v29 = vpop.f32.mrf.mxu0  ;;  %v2136_v34 = vpop.f32.mrf.mxu1  ;;  %3239 = vmatprep.mubr.bf16.mxu0 %v6784_v53  ;;  %5912 = vmatprep.mubr.bf16.mxu1 %v6927_v9 }
 0x1f2   : > { %v7352_v41 = vadd.f32 %v5795_v62, %v1584_v51  ;;  %v5174_v38 = vadd.f32 %v5173_v29, %v5172_v54  ;;  %5566 = vmatprep.subr.bf16.mxu1 %v6236_v37  ;;  %5942 = vmatprep.subr.bf16.mxu0 %v6240_v27  ;;  %v6242_v51 = vld [vmem:[#allocation5 + $0x1a0] sm:$0xff]   ;;  %v6253_v29 = vld [vmem:[#allocation5 + $0x218] sm:$0xff]  }
 0x1f3   : > { %v5175_v32 = vpop.f32.mrf.mxu0  ;;  %v5815_v19 = vpop.f32.mrf.mxu1 }
 0x1f4   : > { %8266 = vst [vmem:[#allocation17_spill] sm:$0xff] %v7352_v41  ;;  %v2137_v43 = vadd.f32 %v5174_v38, %v2136_v34  ;;  %5567 = vmatpush3.bf16.msra.mxu1 %v6237_v24  ;;  %5943 = vmatpush3.bf16.msra.mxu0 %v6240_v27  ;;  %v7364_v27 = vld [vmem:[%s8198_s2] ss:$0 sm:$0xff] }
 0x1f5   : > { %v5176_v46 = vpop.f32.mrf.mxu0  ;;  %v2139_v12 = vpop.f32.mrf.mxu1  ;;  %5568 = vmatprep.subr.bf16.mxu1 %v6238_v23  ;;  %5944 = vmatprep.subr.bf16.mxu0 %v6245_v16 }
 0x1f6   : > { %v5177_v53 = vadd.f32 %v5176_v46, %v5175_v32  ;;  %v2263_v37 = vadd.f32 %v2137_v43, %v7161_v33  ;;  %v6243_v33 = vld [vmem:[#allocation5 + $0x1d8] sm:$0xff]  }
 0x1f7   : > { %v5178_v50 = vpop.f32.mrf.mxu0  ;;  %v7354_v62 = vpop.f32.mrf.mxu1  ;;  %3240 = vmatmul.mubr.bf16.gmra.mxu0 %v7042_v17  ;;  %5913 = vmatmul.mubr.bf16.gmra.mxu1 %v6948_v8 }
 0x1f8   : > { %v2140_v57 = vadd.f32 %v5177_v53, %v2139_v12  ;;  %3247 = vmatprep.mubr.bf16.mxu0 %v6953_v44  ;;  %5916 = vmatprep.mubr.bf16.mxu1 %v6927_v9  ;;  %v2301_v38 = vadd.f32 %v7364_v27, %v2263_v37  ;;  %v6246_v53 = vld [vmem:[#allocation5 + $0x1d0] sm:$0xff]   ;;  %v8267_v37 = vld [vmem:[#allocation20_spill] sm:$0xff] }
 0x1f9   : > { %v5179_v54 = vpop.f32.mrf.mxu0  ;;  %v2152_v58 = vpop.f32.mrf.mxu1  ;;  %5569 = vmatpush3.bf16.msra.mxu1 %v6239_v6  ;;  %5945 = vmatpush3.bf16.msra.mxu0 %v6245_v16  ;;  %v6244_v16 = vld [vmem:[#allocation5 + $0x198] sm:$0xff]  }
 0x1fa   : > { %v2264_v17 = vadd.f32 %v2140_v57, %v7176_v36  ;;  %v5180_v24 = vadd.f32 %v5179_v54, %v5178_v50  ;;  %5570 = vmatprep.subr.bf16.mxu1 %v6241_v63  ;;  %5946 = vmatprep.subr.bf16.mxu0 %v6250_v30  ;;  %v6254_v63 = vld [vmem:[#allocation5 + $0x210] sm:$0xff]  }
 0x1fb   : > { %v5181_v34 = vpop.f32.mrf.mxu0  ;;  %v7368_v23 = vpop.f32.mrf.mxu1  ;;  %v7375_v54 = vld [vmem:[%s6595_s28 + $0x64] sm:$0xff]  }
 0x1fc   : > { %v2302_v32 = vadd.f32 %v7364_v27, %v2264_v17  ;;  %v2145_v43 = vadd.f32 %v5814_v28, %v5180_v24  ;;  %v6247_v24 = vld [vmem:[#allocation5 + $0x190] sm:$0xff]  }
 0x1fd   : > { %v5182_v46 = vpop.f32.mrf.mxu0  ;;  %v2155_v12 = vpop.f32.mrf.mxu1  ;;  %5571 = vmatpush3.bf16.msra.mxu1 %v6242_v51  ;;  %5947 = vmatpush3.bf16.msra.mxu0 %v6250_v30 }
 0x1fe   : > { %v4696_v36 = vpack.c.bf16 %v2302_v32, %v2301_v38  ;;  %v5183_v6 = vadd.f32 %v5182_v46, %v5181_v34  ;;  %5572 = vmatprep.subr.bf16.mxu1 %v6243_v33  ;;  %5948 = vmatprep.subr.bf16.mxu0 %v6253_v29  ;;  %v2265_v28 = vadd.f32 %v2145_v43, %v7151_v3  ;;  %v6248_v38 = vld [vmem:[#allocation5 + $0x1c8] sm:$0xff]  }
 0x1ff   : > { %v5184_v50 = vpop.f32.mrf.mxu0  ;;  %v7372_v57 = vpop.f32.mrf.mxu1  ;;  %3248 = vmatmul.mubr.bf16.gmra.mxu0 %v7375_v54  ;;  %5917 = vmatmul.mubr.bf16.gmra.mxu1 %v6948_v8  ;;  %v6255_v32 = vld [vmem:[#allocation5 + $0x208] sm:$0xff]  }
 0x200   : > { %4697 = vst [vmem:[%s7379_s24] sm:$0xff] %v4696_v36   ;;  %v2148_v30 = vadd.f32 %v5815_v19, %v5183_v6  ;;  %3255 = vmatprep.mubr.bf16.mxu0 %v8267_v37  ;;  %5920 = vmatprep.mubr.bf16.mxu1 %v7170_v25  ;;  %v2303_v19 = vadd.f32 %v7364_v27, %v2265_v28  ;;  %v7397_v28 = vld [vmem:[%s6595_s28 + $0x6c] sm:$0xff]  }
 0x201   : > { %v5185_v51 = vpop.f32.mrf.mxu0  ;;  %v7385_v17 = vpop.f32.mrf.mxu1  ;;  %5573 = vmatpush3.bf16.msra.mxu1 %v6244_v16  ;;  %5949 = vmatpush3.bf16.msra.mxu0 %v6253_v29 }
 0x202   : > { %v2266_v33 = vadd.f32 %v2148_v30, %v7164_v14  ;;  %v5186_v34 = vadd.f32 %v5185_v51, %v5184_v50  ;;  %5574 = vmatprep.subr.bf16.mxu1 %v6246_v53  ;;  %5950 = vmatprep.subr.bf16.mxu0 %v6254_v63  ;;  %v6249_v14 = vld [vmem:[#allocation5 + $0x188] sm:$0xff]   ;;  %v6251_v50 = vld [vmem:[#allocation5 + $0x1c0] sm:$0xff]  }
 0x203   : > { %v5187_v46 = vpop.f32.mrf.mxu0  ;;  %v7388_v3 = vpop.f32.mrf.mxu1  ;;  %v6256_v30 = vld [vmem:[#allocation5 + $0x200] sm:$0xff]  }
 0x204   : > { %v2304_v43 = vadd.f32 %v7364_v27, %v2266_v33  ;;  %v2153_v36 = vadd.f32 %v5186_v34, %v2152_v58  ;;  %v6252_v34 = vld [vmem:[#allocation5 + $0x180] sm:$0xff]  }
 0x205   : > { %v5188_v6 = vpop.f32.mrf.mxu0  ;;  %v7392_v16 = vpop.f32.mrf.mxu1  ;;  %5575 = vmatpush3.bf16.msra.mxu1 %v6247_v24  ;;  %5951 = vmatpush3.bf16.msra.mxu0 %v6254_v63 }
 0x206   : > { %v4701_v29 = vpack.c.bf16 %v2304_v43, %v2303_v19  ;;  %v5189_v53 = vadd.f32 %v5188_v6, %v5187_v46  ;;  %5576 = vmatprep.subr.bf16.mxu1 %v6248_v38  ;;  %5952 = vmatprep.subr.bf16.mxu0 %v6255_v32  ;;  %v2267_v58 = vadd.f32 %v2153_v36, %v7194_v40 }
 0x207   : > { %v5190_v51 = vpop.f32.mrf.mxu0  ;;  %v7394_v41 = vpop.f32.mrf.mxu1  ;;  %3256 = vmatmul.mubr.bf16.gmra.mxu0 %v7397_v28  ;;  %5921 = vmatmul.mubr.bf16.gmra.mxu1 %v7200_v39 }
 0x208   : > { %4853 = vst [vmem:[%s7379_s24 + $0x8] sm:$0xff] %v4701_v29   ;;  %v2156_v24 = vadd.f32 %v5189_v53, %v2155_v12  ;;  %3263 = vmatprep.mubr.bf16.mxu0 %v6953_v44  ;;  %5924 = vmatprep.mubr.bf16.mxu1 %v7170_v25  ;;  %v2305_v40 = vadd.f32 %v7364_v27, %v2267_v58 }
 0x209   : > { %v5191_v63 = vpop.f32.mrf.mxu0  ;;  %v7405_v33 = vpop.f32.mrf.mxu1  ;;  %5577 = vmatpush3.bf16.msra.mxu1 %v6249_v14  ;;  %5953 = vmatpush3.bf16.msra.mxu0 %v6255_v32 }
 0x20a   : > { %v2268_v38 = vadd.f32 %v2156_v24, %v7208_v0  ;;  %v5192_v46 = vadd.f32 %v5191_v63, %v5190_v51  ;;  %5578 = vmatprep.subr.bf16.mxu1 %v6251_v50  ;;  %5954 = vmatprep.subr.bf16.mxu0 %v6256_v30 }
 0x20b   : > { %v5193_v19 = vpop.f32.mrf.mxu0  ;;  %v7408_v43 = vpop.f32.mrf.mxu1 }
 0x20c   : > { %v2306_v12 = vadd.f32 %v7364_v27, %v2268_v38  ;;  %v2161_v36 = vadd.f32 %v7354_v62, %v5192_v46 }
 0x20d   : > { %v5194_v6 = vpop.f32.mrf.mxu0  ;;  %v7413_v29 = vpop.f32.mrf.mxu1  ;;  %5579 = vmatpush3.bf16.msra.mxu1 %v6252_v34  ;;  %5955 = vmatpush3.bf16.msra.mxu0 %v6256_v30 }
 0x20e   : > { %v4706_v32 = vpack.c.bf16 %v2306_v12, %v2305_v40  ;;  %v5195_v0 = vadd.f32 %v5194_v6, %v5193_v19  ;;  %v2269_v50 = vadd.f32 %v2161_v36, %v7181_v60 }
 0x20f   : > { %v5196_v14 = vpop.f32.mrf.mxu0  ;;  %v7415_v53 = vpop.f32.mrf.mxu1  ;;  %3264 = vmatmul.mubr.bf16.gmra.mxu0 %v7375_v54  ;;  %5925 = vmatmul.mubr.bf16.gmra.mxu1 %v7200_v39 }
 0x210   : > { %4854 = vst [vmem:[%s7379_s24 + $0x10] sm:$0xff] %v4706_v32   ;;  %v2164_v51 = vadd.f32 %v7368_v23, %v5195_v0  ;;  %3271 = vmatprep.mubr.bf16.mxu0 %v8267_v37  ;;  %5928 = vmatprep.mubr.bf16.mxu1 %v7238_v22  ;;  %v2307_v38 = vadd.f32 %v7364_v27, %v2269_v50  ;;  %v8268_v0 = vld [vmem:[#allocation21_spill] sm:$0xff] }
 0x211   : > { %v5197_v62 = vpop.f32.mrf.mxu0  ;;  %v7424_v30 = vpop.f32.mrf.mxu1 }
 0x212   : > { %v2270_v58 = vadd.f32 %v2164_v51, %v7197_v45  ;;  %v5198_v24 = vadd.f32 %v5197_v62, %v5196_v14 }
 0x213   : > { %v5199_v63 = vpop.f32.mrf.mxu0  ;;  %v7427_v34 = vpop.f32.mrf.mxu1 }
 0x214   : > { %v2308_v60 = vadd.f32 %v7364_v27, %v2270_v58  ;;  %v2169_v23 = vadd.f32 %v5198_v24, %v7385_v17 }
 0x215   : > { %v5200_v46 = vpop.f32.mrf.mxu0  ;;  %v7432_v19 = vpop.f32.mrf.mxu1 }
 0x216   : > { %v4711_v40 = vpack.c.bf16 %v2308_v60, %v2307_v38  ;;  %v5201_v12 = vadd.f32 %v5200_v46, %v5199_v63  ;;  %v2271_v45 = vadd.f32 %v2169_v23, %v7226_v11 }
 0x217   : > { %v5202_v36 = vpop.f32.mrf.mxu0  ;;  %v7434_v6 = vpop.f32.mrf.mxu1  ;;  %3272 = vmatmul.mubr.bf16.gmra.mxu0 %v7397_v28  ;;  %5929 = vmatmul.mubr.bf16.gmra.mxu1 %v7265_v2 }
 0x218   : > { %4855 = vst [vmem:[%s7379_s24 + $0x18] sm:$0xff] %v4711_v40   ;;  %v2172_v32 = vadd.f32 %v5201_v12, %v7392_v16  ;;  %3279 = vmatprep.mubr.bf16.mxu0 %v8268_v0  ;;  %5932 = vmatprep.mubr.bf16.mxu1 %v7238_v22  ;;  %v2309_v24 = vadd.f32 %v7364_v27, %v2271_v45  ;;  %v8269_v12 = vld [vmem:[#allocation25_spill] sm:$0xff] }
 0x219   : > { %v5203_v17 = vpop.f32.mrf.mxu0  ;;  %v7443_v14 = vpop.f32.mrf.mxu1 }
 0x21a   : > { %v2272_v50 = vadd.f32 %v2172_v32, %v7243_v49  ;;  %v5204_v51 = vadd.f32 %v5203_v17, %v5202_v36  ;;  %v7456_v49 = vld [vmem:[%s6595_s28 + $0x78] sm:$0xff]  }
 0x21b   : > { %v5205_v62 = vpop.f32.mrf.mxu0  ;;  %v7446_v58 = vpop.f32.mrf.mxu1 }
 0x21c   : > { %v2310_v11 = vadd.f32 %v7364_v27, %v2272_v50  ;;  %v2177_v16 = vadd.f32 %v7372_v57, %v5204_v51  ;;  %v8270_v57 = vld [vmem:[#allocation22_spill] sm:$0xff] }
 0x21d   : > { %v5206_v63 = vpop.f32.mrf.mxu0  ;;  %v7451_v38 = vpop.f32.mrf.mxu1 }
 0x21e   : > { %v4716_v60 = vpack.c.bf16 %v2310_v11, %v2309_v24  ;;  %v5207_v23 = vadd.f32 %v5206_v63, %v5205_v62  ;;  %v2273_v36 = vadd.f32 %v2177_v16, %v8269_v12 }
 0x21f   : > { %v5208_v46 = vpop.f32.mrf.mxu0  ;;  %v7453_v40 = vpop.f32.mrf.mxu1  ;;  %3280 = vmatmul.mubr.bf16.gmra.mxu0 %v7456_v49  ;;  %5933 = vmatmul.mubr.bf16.gmra.mxu1 %v7265_v2 }
 0x220   : > { %4856 = vst [vmem:[%s7379_s24 + $0x20] sm:$0xff] %v4716_v60   ;;  %v2180_v45 = vadd.f32 %v7388_v3, %v5207_v23  ;;  %3287 = vmatprep.mubr.bf16.mxu0 %v8270_v57  ;;  %5936 = vmatprep.mubr.bf16.mxu1 %v7293_v59  ;;  %v2311_v11 = vadd.f32 %v7364_v27, %v2273_v36 }
 0x221   : > { %v5209_v32 = vpop.f32.mrf.mxu0  ;;  %v7465_v17 = vpop.f32.mrf.mxu1 }
 0x222   : > { %v2274_v50 = vadd.f32 %v2180_v45, %v7229_v35  ;;  %v5210_v51 = vadd.f32 %v5209_v32, %v5208_v46  ;;  %v7478_v35 = vld [vmem:[%s6595_s28 + $0x80] sm:$0xff]  }
 0x223   : > { %v5211_v62 = vpop.f32.mrf.mxu0  ;;  %v7468_v24 = vpop.f32.mrf.mxu1 }
 0x224   : > { %v2312_v16 = vadd.f32 %v7364_v27, %v2274_v50  ;;  %v2185_v3 = vadd.f32 %v5210_v51, %v7405_v33 }
 0x225   : > { %v5212_v63 = vpop.f32.mrf.mxu0  ;;  %v7473_v60 = vpop.f32.mrf.mxu1 }
 0x226   : > { %v4721_v23 = vpack.c.bf16 %v2312_v16, %v2311_v11  ;;  %v5213_v12 = vadd.f32 %v5212_v63, %v5211_v62  ;;  %v2275_v46 = vadd.f32 %v2185_v3, %v7257_v48 }
 0x227   : > { %v5214_v59 = vpop.f32.mrf.mxu0  ;;  %v7475_v2 = vpop.f32.mrf.mxu1  ;;  %3288 = vmatmul.mubr.bf16.gmra.mxu0 %v7478_v35  ;;  %5937 = vmatmul.mubr.bf16.gmra.mxu1 %v7313_v20 }
 0x228   : > { %4857 = vst [vmem:[%s7379_s24 + $0x28] sm:$0xff] %v4721_v23   ;;  %v2188_v36 = vadd.f32 %v5213_v12, %v7413_v29  ;;  %3295 = vmatprep.mubr.bf16.mxu0 %v8268_v0  ;;  %3745 = vmatprep.mubr.bf16.mxu1 %v6953_v44  ;;  %v2313_v11 = vadd.f32 %v7364_v27, %v2275_v46 }
 0x229   : > { %v5215_v33 = vpop.f32.mrf.mxu0  ;;  %v7487_v45 = vpop.f32.mrf.mxu1 }
 0x22a   : > { %v2276_v32 = vadd.f32 %v2188_v36, %v7272_v4  ;;  %v5216_v50 = vadd.f32 %v5215_v33, %v5214_v59  ;;  %v8271_v4 = vld [vmem:[#allocation26_spill] sm:$0xff] }
 0x22b   : > { %v5217_v51 = vpop.f32.mrf.mxu0  ;;  %v7490_v62 = vpop.f32.mrf.mxu1 }
 0x22c   : > { %v2314_v48 = vadd.f32 %v7364_v27, %v2276_v32  ;;  %v2193_v29 = vadd.f32 %v7394_v41, %v5216_v50 }
 0x22d   : > { %v5218_v16 = vpop.f32.mrf.mxu0  ;;  %v7495_v3 = vpop.f32.mrf.mxu1 }
 0x22e   : > { %v4726_v44 = vpack.c.bf16 %v2314_v48, %v2313_v11  ;;  %v5219_v63 = vadd.f32 %v5218_v16, %v5217_v51  ;;  %v2277_v59 = vadd.f32 %v2193_v29, %v8271_v4 }
 0x22f   : > { %v5220_v23 = vpop.f32.mrf.mxu0  ;;  %v5308_v12 = vpop.f32.mrf.mxu1  ;;  %3296 = vmatmul.mubr.bf16.gmra.mxu0 %v7456_v49  ;;  %3746 = vmatmul.mubr.bf16.vlgmr.msra.gmra.mxu1 %v7375_v54 }
 0x230   : > { %4858 = vst [vmem:[%s7379_s24 + $0x30] sm:$0xff] %v4726_v44   ;;  %v2196_v46 = vadd.f32 %v7408_v43, %v5219_v63  ;;  %3303 = vmatprep.mubr.bf16.mxu0 %v8270_v57  ;;  %3753 = vmatprep.mubr.bf16.mxu1 %v8267_v37  ;;  %v2315_v54 = vadd.f32 %v7364_v27, %v2277_v59  ;;  %v8272_v59 = vld [vmem:[#allocation23_spill] sm:$0xff] }
 0x231   : > { %v5221_v41 = vpop.f32.mrf.mxu0  ;;  %v5309_v36 = vpop.f32.mrf.mxu1 }
 0x232   : > { %v2278_v33 = vadd.f32 %v2196_v46, %v7262_v55  ;;  %v5222_v32 = vadd.f32 %v5221_v41, %v5220_v23  ;;  %v7505_v50 = vadd.f32 %v5309_v36, %v5308_v12 }
 0x233   : > { %v5223_v51 = vpop.f32.mrf.mxu0  ;;  %v5311_v11 = vpop.f32.mrf.mxu1 }
 0x234   : > { %v2316_v48 = vadd.f32 %v7364_v27, %v2278_v33  ;;  %v2201_v43 = vadd.f32 %v5222_v32, %v7424_v30 }
 0x235   : > { %v5224_v29 = vpop.f32.mrf.mxu0  ;;  %v5312_v16 = vpop.f32.mrf.mxu1 }
 0x236   : > { %v4731_v44 = vpack.c.bf16 %v2316_v48, %v2315_v54  ;;  %v5225_v37 = vadd.f32 %v5224_v29, %v5223_v51  ;;  %v7510_v63 = vadd.f32 %v5312_v16, %v5311_v11  ;;  %v2279_v23 = vadd.f32 %v2201_v43, %v7286_v18 }
 0x237   : > { %v5226_v4 = vpop.f32.mrf.mxu0  ;;  %v5314_v55 = vpop.f32.mrf.mxu1  ;;  %3304 = vmatmul.mubr.bf16.gmra.mxu0 %v7478_v35  ;;  %3754 = vmatmul.mubr.bf16.gmra.mxu1 %v7397_v28 }
 0x238   : > { %4859 = vst [vmem:[%s7379_s24 + $0x38] sm:$0xff] %v4731_v44   ;;  %v2204_v12 = vadd.f32 %v5225_v37, %v7432_v19  ;;  %3311 = vmatprep.mubr.bf16.mxu0 %v8272_v59  ;;  %3761 = vmatprep.mubr.bf16.mxu1 %v8268_v0  ;;  %v2317_v51 = vadd.f32 %v7364_v27, %v2279_v23  ;;  %v7528_v44 = vld [vmem:[%s6595_s28 + $0x8c] sm:$0xff]  }
 0x239   : > { %v5227_v30 = vpop.f32.mrf.mxu0  ;;  %v5315_v46 = vpop.f32.mrf.mxu1 }
 0x23a   : > { %v2280_v41 = vadd.f32 %v2204_v12, %v7296_v47  ;;  %v5228_v36 = vadd.f32 %v5227_v30, %v5226_v4  ;;  %v7520_v33 = vadd.f32 %v5315_v46, %v5314_v55 }
 0x23b   : > { %v5229_v32 = vpop.f32.mrf.mxu0  ;;  %v5317_v28 = vpop.f32.mrf.mxu1 }
 0x23c   : > { %v2318_v18 = vadd.f32 %v7364_v27, %v2280_v41  ;;  %v2209_v19 = vadd.f32 %v7415_v53, %v5228_v36  ;;  %v8273_v53 = vld [vmem:[#allocation24_spill] sm:$0xff] }
 0x23d   : > { %v5230_v11 = vpop.f32.mrf.mxu0  ;;  %v5318_v54 = vpop.f32.mrf.mxu1 }
 0x23e   : > { %v4736_v48 = vpack.c.bf16 %v2318_v18, %v2317_v51  ;;  %v5231_v43 = vadd.f32 %v5230_v11, %v5229_v32  ;;  %v7525_v29 = vadd.f32 %v5318_v54, %v5317_v28  ;;  %v2281_v37 = vadd.f32 %v2209_v19, %v7278_v7 }
 0x23f   : > { %v5232_v16 = vpop.f32.mrf.mxu0  ;;  %v5320_v47 = vpop.f32.mrf.mxu1  ;;  %3312 = vmatmul.mubr.bf16.gmra.mxu0 %v7528_v44  ;;  %3762 = vmatmul.mubr.bf16.gmra.mxu1 %v7456_v49 }
 0x240   : > { %4860 = vst [vmem:[%s7379_s24 + $0x40] sm:$0xff] %v4736_v48   ;;  %v2212_v4 = vadd.f32 %v7427_v34, %v5231_v43  ;;  %3319 = vmatprep.mubr.bf16.mxu0 %v8273_v53  ;;  %3769 = vmatprep.mubr.bf16.mxu1 %v8270_v57  ;;  %v2319_v32 = vadd.f32 %v7364_v27, %v2281_v37  ;;  %v7546_v48 = vld [vmem:[%s6595_s28 + $0x94] sm:$0xff]  }
 0x241   : > { %v5233_v55 = vpop.f32.mrf.mxu0  ;;  %v5321_v23 = vpop.f32.mrf.mxu1 }
 0x242   : > { %v2282_v12 = vadd.f32 %v2212_v4, %v7289_v42  ;;  %v5234_v30 = vadd.f32 %v5233_v55, %v5232_v16  ;;  %v7538_v46 = vadd.f32 %v5321_v23, %v5320_v47 }
 0x243   : > { %v5235_v41 = vpop.f32.mrf.mxu0  ;;  %v5323_v36 = vpop.f32.mrf.mxu1 }
 0x244   : > { %v2320_v7 = vadd.f32 %v7364_v27, %v2282_v12  ;;  %v2217_v34 = vadd.f32 %v5234_v30, %v7443_v14 }
 0x245   : > { %v5236_v28 = vpop.f32.mrf.mxu0  ;;  %v5324_v51 = vpop.f32.mrf.mxu1 }
 0x246   : > { %v4741_v18 = vpack.c.bf16 %v2320_v7, %v2319_v32  ;;  %v5237_v19 = vadd.f32 %v5236_v28, %v5235_v41  ;;  %v7543_v11 = vadd.f32 %v5324_v51, %v5323_v36  ;;  %v2283_v43 = vadd.f32 %v2217_v34, %v7307_v52 }
 0x247   : > { %v5238_v54 = vpop.f32.mrf.mxu0  ;;  %v5326_v42 = vpop.f32.mrf.mxu1  ;;  %3320 = vmatmul.mubr.bf16.gmra.mxu0 %v7546_v48  ;;  %3770 = vmatmul.mubr.bf16.gmra.mxu1 %v7478_v35 }
 0x248   : > { %4861 = vst [vmem:[%s7379_s24 + $0x48] sm:$0xff] %v4741_v18   ;;  %v2220_v16 = vadd.f32 %v5237_v19, %v7451_v38  ;;  %3327 = vmatprep.mubr.bf16.mxu0 %v8272_v59  ;;  %3777 = vmatprep.mubr.bf16.mxu1 %v8268_v0  ;;  %v2321_v30 = vadd.f32 %v7364_v27, %v2283_v43 }
 0x249   : > { %v5239_v14 = vpop.f32.mrf.mxu0  ;;  %v5327_v47 = vpop.f32.mrf.mxu1 }
 0x24a   : > { %v2284_v37 = vadd.f32 %v2220_v16, %v7316_v31  ;;  %v5240_v4 = vadd.f32 %v5239_v14, %v5238_v54  ;;  %v7556_v55 = vadd.f32 %v5327_v47, %v5326_v42 }
 0x24b   : > { %v5241_v23 = vpop.f32.mrf.mxu0  ;;  %v5329_v12 = vpop.f32.mrf.mxu1 }
 0x24c   : > { %v2322_v52 = vadd.f32 %v7364_v27, %v2284_v37  ;;  %v2225_v38 = vadd.f32 %v7434_v6, %v5240_v4 }
 0x24d   : > { %v5242_v41 = vpop.f32.mrf.mxu0  ;;  %v5330_v36 = vpop.f32.mrf.mxu1 }
 0x24e   : > { %v4746_v32 = vpack.c.bf16 %v2322_v52, %v2321_v30  ;;  %v5243_v0 = vadd.f32 %v5242_v41, %v5241_v23  ;;  %v7561_v7 = vadd.f32 %v5330_v36, %v5329_v12  ;;  %v2285_v28 = vadd.f32 %v2225_v38, %v7300_v15 }
 0x24f   : > { %v5244_v34 = vpop.f32.mrf.mxu0  ;;  %v5332_v31 = vpop.f32.mrf.mxu1  ;;  %3328 = vmatmul.mubr.bf16.gmra.mxu0 %v7528_v44  ;;  %3778 = vmatmul.mubr.bf16.gmra.mxu1 %v7456_v49 }
 0x250   : > { %4862 = vst [vmem:[%s7379_s24 + $0x50] sm:$0xff] %v4746_v32   ;;  %v2228_v51 = vadd.f32 %v7446_v58, %v5243_v0  ;;  %3335 = vmatprep.mubr.bf16.mxu0 %v8273_v53  ;;  %3785 = vmatprep.mubr.bf16.mxu1 %v8270_v57  ;;  %v2323_v49 = vadd.f32 %v7364_v27, %v2285_v28 }
 0x251   : > { %v5245_v6 = vpop.f32.mrf.mxu0  ;;  %v5333_v18 = vpop.f32.mrf.mxu1 }
 0x252   : > { %v2286_v19 = vadd.f32 %v2228_v51, %v7309_v56  ;;  %v5246_v54 = vadd.f32 %v5245_v6, %v5244_v34  ;;  %v7571_v42 = vadd.f32 %v5333_v18, %v5332_v31 }
 0x253   : > { %v5247_v43 = vpop.f32.mrf.mxu0  ;;  %v5335_v16 = vpop.f32.mrf.mxu1 }
 0x254   : > { %v2324_v15 = vadd.f32 %v7364_v27, %v2286_v19  ;;  %v2233_v58 = vadd.f32 %v5246_v54, %v7465_v17  ;;  %v7595_v54 = vld [vmem:[%s6595_s28 + $0xa0] sm:$0xff]  }
 0x255   : > { %v5248_v14 = vpop.f32.mrf.mxu0  ;;  %v5336_v47 = vpop.f32.mrf.mxu1 }
 0x256   : > { %v4751_v37 = vpack.c.bf16 %v2324_v15, %v2323_v49  ;;  %v5249_v57 = vadd.f32 %v5248_v14, %v5247_v43  ;;  %v7576_v4 = vadd.f32 %v5336_v47, %v5335_v16  ;;  %v2287_v12 = vadd.f32 %v2233_v58, %v7325_v10  ;;  %v8275_v49 = vld [vmem:[#allocation30_spill] sm:$0xff] }
 0x257   : > { %v5250_v23 = vpop.f32.mrf.mxu0  ;;  %v5338_v56 = vpop.f32.mrf.mxu1  ;;  %3336 = vmatmul.mubr.bf16.gmra.mxu0 %v7546_v48  ;;  %3786 = vmatmul.mubr.bf16.gmra.mxu1 %v7478_v35 }
 0x258   : > { %4863 = vst [vmem:[%s7379_s24 + $0x58] sm:$0xff] %v4751_v37   ;;  %v2236_v30 = vadd.f32 %v5249_v57, %v7473_v60  ;;  %3343 = vmatprep.mubr.bf16.mxu0 %v7235_v5  ;;  %3793 = vmatprep.mubr.bf16.mxu1 %v8272_v59  ;;  %v2325_v0 = vadd.f32 %v7364_v27, %v2287_v12 }
 0x259   : > { %v5251_v17 = vpop.f32.mrf.mxu0  ;;  %v5339_v52 = vpop.f32.mrf.mxu1 }
 0x25a   : > { %v2288_v38 = vadd.f32 %v2236_v30, %v7330_v1  ;;  %v5252_v41 = vadd.f32 %v5251_v17, %v5250_v23  ;;  %v7586_v36 = vadd.f32 %v5339_v52, %v5338_v56 }
 0x25b   : > { %v5253_v32 = vpop.f32.mrf.mxu0  ;;  %v5341_v35 = vpop.f32.mrf.mxu1 }
 0x25c   : > { %v2326_v10 = vadd.f32 %v7364_v27, %v2288_v38  ;;  %v2241_v60 = vadd.f32 %v7453_v40, %v5252_v41  ;;  %v8274_v40 = vld [vmem:[#allocation28_spill] sm:$0xff] }
 0x25d   : > { %v5254_v34 = vpop.f32.mrf.mxu0  ;;  %v5342_v31 = vpop.f32.mrf.mxu1 }
 0x25e   : > { %v4756_v28 = vpack.c.bf16 %v2326_v10, %v2325_v0  ;;  %v2289_v51 = vadd.f32 %v2241_v60, %v7320_v61  ;;  %v5255_v6 = vadd.f32 %v5254_v34, %v5253_v32  ;;  %v7592_v1 = vadd.f32 %v5342_v31, %v5341_v35  ;;  %v7612_v32 = vld [vmem:[%s6595_s28 + $0xa8] sm:$0xff]  }
 0x25f   : > { %v5256_v18 = vpop.f32.mrf.mxu0  ;;  %v5344_v19 = vpop.f32.mrf.mxu1  ;;  %3344 = vmatmul.mubr.bf16.gmra.mxu0 %v7595_v54  ;;  %3794 = vmatmul.mubr.bf16.gmra.mxu1 %v7528_v44 }
 0x260   : > { %4864 = vst [vmem:[%s7379_s24 + $0x60] sm:$0xff] %v4756_v28   ;;  %v2244_v43 = vadd.f32 %v7468_v24, %v5255_v6  ;;  %3351 = vmatprep.mubr.bf16.mxu0 %v8274_v40  ;;  %3801 = vmatprep.mubr.bf16.mxu1 %v8273_v53  ;;  %v2327_v57 = vadd.f32 %v7364_v27, %v2289_v51 }
 0x261   : > { %v5257_v16 = vpop.f32.mrf.mxu0  ;;  %v5345_v61 = vpop.f32.mrf.mxu1 }
 0x262   : > { %v2290_v15 = vadd.f32 %v2244_v43, %v8275_v49  ;;  %v5258_v58 = vadd.f32 %v5257_v16, %v5256_v18  ;;  %v7604_v14 = vadd.f32 %v5345_v61, %v5344_v19 }
 0x263   : > { %v5259_v47 = vpop.f32.mrf.mxu0  ;;  %v5347_v37 = vpop.f32.mrf.mxu1 }
 0x264   : > { %v2328_v23 = vadd.f32 %v7364_v27, %v2290_v15  ;;  %v2249_v24 = vadd.f32 %v5258_v58, %v7487_v45 }
 0x265   : > { %v5260_v56 = vpop.f32.mrf.mxu0  ;;  %v5348_v12 = vpop.f32.mrf.mxu1 }
 0x266   : > { %v4761_v30 = vpack.c.bf16 %v2328_v23, %v2327_v57  ;;  %v5261_v17 = vadd.f32 %v5260_v56, %v5259_v47  ;;  %v7609_v52 = vadd.f32 %v5348_v12, %v5347_v37  ;;  %v2291_v35 = vadd.f32 %v2249_v24, %v7339_v13  ;;  %v8276_v47 = vld [vmem:[#allocation17_spill] sm:$0xff] }
 0x267   : > { %v5262_v38 = vpop.f32.mrf.mxu0  ;;  %v5350_v41 = vpop.f32.mrf.mxu1  ;;  %3352 = vmatmul.mubr.bf16.gmra.mxu0 %v7612_v32  ;;  %3802 = vmatmul.mubr.bf16.gmra.mxu1 %v7546_v48 }
 0x268   : > { %4865 = vst [vmem:[%s7379_s24 + $0x68] sm:$0xff] %v4761_v30   ;;  %v2252_v0 = vadd.f32 %v5261_v17, %v7495_v3  ;;  %3809 = vmatprep.mubr.bf16.mxu1 %v8272_v59  ;;  %5956 = vmatprep.mubr.bf16.mxu0 %v6927_v9  ;;  %v2329_v6 = vadd.f32 %v7364_v27, %v2291_v35 }
 0x269   : > { %v5263_v45 = vpop.f32.mrf.mxu0  ;;  %v5351_v10 = vpop.f32.mrf.mxu1 }
 0x26a   : > { %v2292_v60 = vadd.f32 %v2252_v0, %v7345_v26  ;;  %v5264_v34 = vadd.f32 %v5263_v45, %v5262_v38  ;;  %v7622_v31 = vadd.f32 %v5351_v10, %v5350_v41 }
 0x26b   : > { %v5265_v28 = vpop.f32.mrf.mxu0  ;;  %v5353_v51 = vpop.f32.mrf.mxu1 }
 0x26c   : > { %v2330_v13 = vadd.f32 %v7364_v27, %v2292_v60  ;;  %v2257_v3 = vadd.f32 %v7475_v2, %v5264_v34 }
 0x26d   : > { %v5266_v18 = vpop.f32.mrf.mxu0  ;;  %v5354_v59 = vpop.f32.mrf.mxu1 }
 0x26e   : > { %v4766_v19 = vpack.c.bf16 %v2330_v13, %v2329_v6  ;;  %v5267_v9 = vadd.f32 %v5266_v18, %v5265_v28  ;;  %v7627_v43 = vadd.f32 %v5354_v59, %v5353_v51  ;;  %v2293_v61 = vadd.f32 %v2257_v3, %v7343_v21  ;;  %v7688_v18 = vld [vmem:[%s6595_s28 + $0xb4] sm:$0xff]  }
 0x26f   : > { %v5356_v16 = vpop.f32.mrf.mxu1  ;;  %v5862_v26 = vpop.f32.mrf.mxu0  ;;  %3810 = vmatmul.mubr.bf16.gmra.mxu1 %v7528_v44  ;;  %5957 = vmatmul.mubr.bf16.vlgmr.msra.gmra.mxu0 %v6948_v8 }
 0x270   : > { %4866 = vst [vmem:[%s7379_s24 + $0x70] sm:$0xff] %v4766_v19   ;;  %v2260_v49 = vadd.f32 %v7490_v62, %v5267_v9  ;;  %v7635_v15 = vadd.f32 %v5862_v26, %v7520_v33  ;;  %3817 = vmatprep.mubr.bf16.mxu1 %v8273_v53  ;;  %5960 = vmatprep.mubr.bf16.mxu0 %v7170_v25 }
 0x271   : > { %v5357_v2 = vpop.f32.mrf.mxu1  ;;  %v2928_v58 = vpop.f32.mrf.mxu0  ;;  %v2331_v62 = vadd.f32 %v7364_v27, %v2293_v61 }
 0x272   : > { %v2294_v37 = vadd.f32 %v2260_v49, %v8276_v47  ;;  %v7640_v57 = vadd.f32 %v5357_v2, %v5356_v16  ;;  %v7643_v8 = vadd.f32 %v7505_v50, %v2928_v58  ;;  %v7703_v49 = vld [vmem:[%s6595_s28 + $0xbc] sm:$0xff]  }
 0x273   : > { %v5359_v21 = vpop.f32.mrf.mxu1  ;;  %v5863_v44 = vpop.f32.mrf.mxu0 }
 0x274   : > { %v2332_v33 = vadd.f32 %v7364_v27, %v2294_v37  ;;  %v7648_v53 = vadd.f32 %v5863_v44, %v7525_v29 }
 0x275   : > { %v5360_v23 = vpop.f32.mrf.mxu1  ;;  %v2931_v24 = vpop.f32.mrf.mxu0 }
 0x276   : > { %v4771_v56 = vpack.c.bf16 %v2332_v33, %v2331_v62  ;;  %v7650_v12 = vadd.f32 %v5360_v23, %v5359_v21  ;;  %v7653_v30 = vadd.f32 %v7510_v63, %v2931_v24  ;;  %v615_v62 = vshll.u32 %v7703_v49, 16 }
 0x277   : > { %v5362_v17 = vpop.f32.mrf.mxu1  ;;  %v5866_v50 = vpop.f32.mrf.mxu0  ;;  %3818 = vmatmul.mubr.bf16.gmra.mxu1 %v7546_v48  ;;  %5961 = vmatmul.mubr.bf16.gmra.mxu0 %v7200_v39 }
 0x278   : > { %4867 = vst [vmem:[%s7379_s24 + $0x78] sm:$0xff] %v4771_v56   ;;  %v7659_v27 = vadd.f32 %v5866_v50, %v7556_v55  ;;  %3825 = vmatprep.mubr.bf16.mxu1 %v7235_v5  ;;  %5964 = vmatprep.mubr.bf16.mxu0 %v7170_v25  ;;  %v8278_v56 = vld [vmem:[#allocation29_spill] sm:$0xff] }
 0x279   : > { %v5363_v29 = vpop.f32.mrf.mxu1  ;;  %v2944_v38 = vpop.f32.mrf.mxu0 }
 0x27a   : > { %v5364_v41 = vadd.f32 %v5363_v29, %v5362_v17  ;;  %v7664_v63 = vadd.f32 %v7538_v46, %v2944_v38  ;;  %v617_v38 = vrot.slane %v615_v62, 1 }
 0x27b   : > { %v5365_v35 = vpop.f32.mrf.mxu1  ;;  %v5867_v0 = vpop.f32.mrf.mxu0 }
 0x27c   : > { %v7667_v48 = vadd.f32 %v5867_v0, %v7561_v7 }
 0x27d   : > { %v5366_v45 = vpop.f32.mrf.mxu1  ;;  %v2947_v10 = vpop.f32.mrf.mxu0 }
 0x27e   : > { %v5367_v60 = vadd.f32 %v5366_v45, %v5365_v35  ;;  %v7670_v55 = vadd.f32 %v7543_v11, %v2947_v10  ;;  %v6259_v35 = vld [vmem:[%s6595_s28 + $0xc4] ss:$0 sps:$4 sm:$0xff]  }
 0x27f   : > { %v5368_v34 = vpop.f32.mrf.mxu1  ;;  %v5870_v25 = vpop.f32.mrf.mxu0  ;;  %3826 = vmatmul.mubr.bf16.gmra.mxu1 %v7595_v54  ;;  %5965 = vmatmul.mubr.bf16.gmra.mxu0 %v7200_v39 }
 0x280   : > { %v7675_v46 = vadd.f32 %v5870_v25, %v7586_v36  ;;  %3833 = vmatprep.mubr.bf16.mxu1 %v8274_v40  ;;  %5968 = vmatprep.mubr.bf16.mxu0 %v7238_v22 }
 0x281   : > { %v5369_v7 = vpop.f32.mrf.mxu1  ;;  %v2960_v28 = vpop.f32.mrf.mxu0 }
 0x282   : > { %v7679_v51 = vadd.f32 %v5369_v7, %v5368_v34  ;;  %v7682_v11 = vadd.f32 %v7571_v42, %v2960_v28  ;;  %v8277_v42 = vld [vmem:[#allocation27_spill] sm:$0xff]  ;;  %v623_v7 = vshll.u32 %v6259_v35, 16 }
 0x283   : > { %v5371_v6 = vpop.f32.mrf.mxu1  ;;  %v5871_v13 = vpop.f32.mrf.mxu0 }
 0x284   : > { %v7685_v3 = vadd.f32 %v5871_v13, %v7592_v1 }
 0x285   : > { %v5372_v39 = vpop.f32.mrf.mxu1  ;;  %v2963_v36 = vpop.f32.mrf.mxu0 }
 0x286   : > { %v7690_v59 = vadd.f32 %v5372_v39, %v5371_v6  ;;  %v7693_v19 = vadd.f32 %v7576_v4, %v2963_v36  ;;  %v610_v4 = vshll.u32 %v7688_v18, 16 }
 0x287   : > { %v5374_v9 = vpop.f32.mrf.mxu1  ;;  %v5874_v16 = vpop.f32.mrf.mxu0  ;;  %3834 = vmatmul.mubr.bf16.gmra.mxu1 %v7612_v32  ;;  %5969 = vmatmul.mubr.bf16.gmra.mxu0 %v8277_v42 }
 0x288   : > { %v7698_v26 = vadd.f32 %v5874_v16, %v7622_v31  ;;  %3841 = vmatprep.mubr.bf16.mxu1 %v7235_v5  ;;  %5972 = vmatprep.mubr.bf16.mxu0 %v7238_v22  ;;  %v608_v5 = vshrl.u32 %v7688_v18, 16  ;;  %v612_v22 = vrot.slane %v610_v4, 1  ;;  %v625_v16 = vrot.slane %v623_v7, 1 }
 0x289   : > { %v5375_v1 = vpop.f32.mrf.mxu1  ;;  %v2976_v61 = vpop.f32.mrf.mxu0 }
 0x28a   : > { %v5376_v2 = vadd.f32 %v5375_v1, %v5374_v9  ;;  %v7707_v58 = vadd.f32 %v7604_v14, %v2976_v61  ;;  %v613_v29 = vor.u32 %v612_v22, %v608_v5 }
 0x28b   : > { %v5377_v47 = vpop.f32.mrf.mxu1  ;;  %v5875_v37 = vpop.f32.mrf.mxu0 }
 0x28c   : > { %v7710_v21 = vadd.f32 %v5875_v37, %v7627_v43  ;;  %v618_v25 = vsel %vm426_vm0, %v613_v29, %v617_v38 }
 0x28d   : > { %v5378_v31 = vpop.f32.mrf.mxu1  ;;  %v2979_v44 = vpop.f32.mrf.mxu0 }
 0x28e   : > { %v5379_v33 = vadd.f32 %v5378_v31, %v5377_v47  ;;  %v7715_v23 = vadd.f32 %v7609_v52, %v2979_v44 }
 0x28f   : > { %v5380_v24 = vpop.f32.mrf.mxu1  ;;  %v5878_v14 = vpop.f32.mrf.mxu0  ;;  %3842 = vmatmul.mubr.bf16.gmra.mxu1 %v7595_v54  ;;  %5973 = vmatmul.mubr.bf16.gmra.mxu0 %v8277_v42  ;;  %v693_v42 = vrot.slane %v7688_v18, 1 }
 0x290   : > { %v7719_v43 = vadd.f32 %v5878_v14, %v5364_v41  ;;  %3849 = vmatprep.mubr.bf16.mxu1 %v8274_v40  ;;  %5976 = vmatprep.mubr.bf16.mxu0 %v8278_v56  ;;  %v619_v40 = vshrl.u32 %v7703_v49, 16 }
 0x291   : > { %v5381_v17 = vpop.f32.mrf.mxu1  ;;  %v2992_v50 = vpop.f32.mrf.mxu0 }
 0x292   : > { %v5382_v0 = vadd.f32 %v5381_v17, %v5380_v24  ;;  %v7725_v52 = vadd.f32 %v7640_v57, %v2992_v50  ;;  %v621_v9 = vor.u32 %v619_v40, %v617_v38 }
 0x293   : > { %v5383_v45 = vpop.f32.mrf.mxu1  ;;  %v5879_v10 = vpop.f32.mrf.mxu0 }
 0x294   : > { %v7727_v54 = vadd.f32 %v5879_v10, %v5367_v60  ;;  %v626_v31 = vsel %vm426_vm0, %v621_v9, %v625_v16 }
 0x295   : > { %v5384_v34 = vpop.f32.mrf.mxu1  ;;  %v2995_v41 = vpop.f32.mrf.mxu0 }
 0x296   : > { %v5385_v28 = vadd.f32 %v5384_v34, %v5383_v45  ;;  %v7732_v6 = vadd.f32 %v7650_v12, %v2995_v41  ;;  %v694_v12 = vrot.slane %v7703_v49, 1 }
 0x297   : > { %v5386_v13 = vpop.f32.mrf.mxu1  ;;  %v5882_v39 = vpop.f32.mrf.mxu0  ;;  %3850 = vmatmul.mubr.bf16.gmra.mxu1 %v7612_v32  ;;  %5977 = vmatmul.mubr.bf16.gmra.mxu0 %v7313_v20 }
 0x298   : > { %v7736_v57 = vadd.f32 %v5882_v39, %v5376_v2  ;;  %3857 = vmatprep.mubr.bf16.mxu1 %v618_v25  ;;  %5980 = vmatprep.mubr.bf16.mxu0 %v8278_v56  ;;  %v695_v44 = vsel %vm647_vm1, %v693_v42, %v694_v12 }
 0x299   : > { %v5387_v60 = vpop.f32.mrf.mxu1  ;;  %v3008_v36 = vpop.f32.mrf.mxu0 }
 0x29a   : > { %v5388_v1 = vadd.f32 %v5387_v60, %v5386_v13  ;;  %v7742_v61 = vadd.f32 %v7679_v51, %v3008_v36 }
 0x29b   : > { %v5389_v32 = vpop.f32.mrf.mxu1  ;;  %v5883_v4 = vpop.f32.mrf.mxu0 }
 0x29c   : > { %v7744_v47 = vadd.f32 %v5883_v4, %v5379_v33  ;;  %v696_v33 = vrot.slane %v6259_v35, 1 }
 0x29d   : > { %v5390_v2 = vpop.f32.mrf.mxu1  ;;  %v3011_v37 = vpop.f32.mrf.mxu0 }
 0x29e   : > { %v5391_v5 = vadd.f32 %v5390_v2, %v5389_v32  ;;  %v7749_v22 = vadd.f32 %v7690_v59, %v3011_v37  ;;  %v697_v45 = vsel %vm647_vm1, %v694_v12, %v696_v33 }
 0x29f   : > { %v5392_v62 = vpop.f32.mrf.mxu1  ;;  %v5886_v24 = vpop.f32.mrf.mxu0  ;;  %3858 = vmatmul.mubr.bf16.gmra.mxu1 %v7688_v18  ;;  %5981 = vmatmul.mubr.bf16.gmra.mxu0 %v7313_v20 }
 0x2a0   : > { %v7753_v51 = vadd.f32 %v5886_v24, %v5388_v1  ;;  %3865 = vmatprep.mubr.bf16.mxu1 %v626_v31  ;;  %5984 = vmatprep.mubr.bf16.mxu0 %v695_v44 }
 0x2a1   : > { %v5393_v14 = vpop.f32.mrf.mxu1  ;;  %v3024_v56 = vpop.f32.mrf.mxu0 }
 0x2a2   : > { %v5394_v17 = vadd.f32 %v5393_v14, %v5392_v62  ;;  %v7755_v50 = vadd.f32 %v5382_v0, %v3024_v56 }
 0x2a3   : > { %v5395_v29 = vpop.f32.mrf.mxu1  ;;  %v5887_v38 = vpop.f32.mrf.mxu0 }
 0x2a4   : > { %v7757_v59 = vadd.f32 %v5887_v38, %v5391_v5 }
 0x2a5   : > { %v5396_v10 = vpop.f32.mrf.mxu1  ;;  %v3027_v18 = vpop.f32.mrf.mxu0 }
 0x2a6   : > { %v5397_v34 = vadd.f32 %v5396_v10, %v5395_v29  ;;  %v7760_v20 = vadd.f32 %v5385_v28, %v3027_v18 }
 0x2a7   : > { %v5398_v41 = vpop.f32.mrf.mxu1  ;;  %v5890_v25 = vpop.f32.mrf.mxu0  ;;  %3866 = vmatmul.mubr.bf16.gmra.mxu1 %v7703_v49  ;;  %5985 = vmatmul.mubr.bf16.gmra.mxu0 %v697_v45 }
 0x2a9   : > { %v5399_v35 = vpop.f32.mrf.mxu1  ;;  %v3040_v40 = vpop.f32.mrf.mxu0 }
 0x2aa   : > { %v5400_v0 = vadd.f32 %v5399_v35, %v5398_v41  ;;  %v7763_v7 = vadd.f32 %v5394_v17, %v3040_v40 }
 0x2ab   : > { %v5401_v13 = vpop.f32.mrf.mxu1  ;;  %v5891_v39 = vpop.f32.mrf.mxu0 }
 0x2ac   : > { %v7765_v60 = vadd.f32 %v5890_v25, %v5400_v0 }
 0x2ad   : > { %v5402_v36 = vpop.f32.mrf.mxu1  ;;  %v3043_v9 = vpop.f32.mrf.mxu0 }
 0x2ae   : > { %v5403_v16 = vadd.f32 %v5402_v36, %v5401_v13  ;;  %v7767_v42 = vadd.f32 %v5397_v34, %v3043_v9 }
 0x2af   : > { %v5444_v28 = vpop.f32.mrf.mxu0  ;;  %v5910_v12 = vpop.f32.mrf.mxu1 }
 0x2b0   : > { %v7769_v1 = vadd.f32 %v5891_v39, %v5403_v16 }
 0x2b1   : > { %v5445_v49 = vpop.f32.mrf.mxu0  ;;  %v3394_v32 = vpop.f32.mrf.mxu1 }
 0x2b2   : > { %v5446_v4 = vadd.f32 %v5445_v49, %v5444_v28 }
 0x2b3   : > { %v5447_v2 = vpop.f32.mrf.mxu0  ;;  %v5911_v37 = vpop.f32.mrf.mxu1 }
 0x2b4   : > { %v3234_v31 = vadd.f32 %v5446_v4, %v7643_v8 }
 0x2b5   : > { %v5448_v44 = vpop.f32.mrf.mxu0  ;;  %v3397_v5 = vpop.f32.mrf.mxu1 }
 0x2b6   : > { %v7772_v62 = vadd.f32 %v3394_v32, %v3234_v31  ;;  %v5449_v24 = vadd.f32 %v5448_v44, %v5447_v2 }
 0x2b7   : > { %v5450_v33 = vpop.f32.mrf.mxu0  ;;  %v5914_v14 = vpop.f32.mrf.mxu1 }
 0x2b8   : > { %v3237_v56 = vadd.f32 %v5449_v24, %v7653_v30 }
 0x2b9   : > { %v5451_v17 = vpop.f32.mrf.mxu0  ;;  %v3410_v29 = vpop.f32.mrf.mxu1 }
 0x2ba   : > { %v7775_v38 = vadd.f32 %v3397_v5, %v3237_v56  ;;  %v5452_v45 = vadd.f32 %v5451_v17, %v5450_v33 }
 0x2bb   : > { %v5453_v10 = vpop.f32.mrf.mxu0  ;;  %v5915_v18 = vpop.f32.mrf.mxu1 }
 0x2bc   : > { %v3242_v34 = vadd.f32 %v5452_v45, %v7635_v15 }
 0x2bd   : > { %v5454_v41 = vpop.f32.mrf.mxu0  ;;  %v3413_v8 = vpop.f32.mrf.mxu1 }
 0x2be   : > { %v5455_v25 = vadd.f32 %v5454_v41, %v5453_v10  ;;  %v7778_v35 = vadd.f32 %v5910_v12, %v3242_v34 }
 0x2bf   : > { %v5456_v40 = vpop.f32.mrf.mxu0  ;;  %v5918_v0 = vpop.f32.mrf.mxu1 }
 0x2c0   : > { %v3245_v13 = vadd.f32 %v5455_v25, %v7648_v53 }
 0x2c1   : > { %v5457_v39 = vpop.f32.mrf.mxu0  ;;  %v3426_v30 = vpop.f32.mrf.mxu1 }
 0x2c2   : > { %v5458_v36 = vadd.f32 %v5457_v39, %v5456_v40  ;;  %v7781_v9 = vadd.f32 %v5911_v37, %v3245_v13 }
 0x2c3   : > { %v5459_v16 = vpop.f32.mrf.mxu0  ;;  %v5919_v28 = vpop.f32.mrf.mxu1 }
 0x2c4   : > { %v3250_v49 = vadd.f32 %v5458_v36, %v7664_v63 }
 0x2c5   : > { %v5460_v32 = vpop.f32.mrf.mxu0  ;;  %v3429_v15 = vpop.f32.mrf.mxu1 }
 0x2c6   : > { %v5461_v4 = vadd.f32 %v5460_v32, %v5459_v16  ;;  %v7784_v2 = vadd.f32 %v3410_v29, %v3250_v49 }
 0x2c7   : > { %v5462_v12 = vpop.f32.mrf.mxu0  ;;  %v7786_v31 = vpop.f32.mrf.mxu1 }
 0x2c8   : > { %v3253_v44 = vadd.f32 %v5461_v4, %v7670_v55 }
 0x2c9   : > { %v5463_v53 = vpop.f32.mrf.mxu0  ;;  %v3442_v5 = vpop.f32.mrf.mxu1 }
 0x2ca   : > { %v5464_v24 = vadd.f32 %v5463_v53, %v5462_v12  ;;  %v7789_v33 = vadd.f32 %v3413_v8, %v3253_v44 }
 0x2cb   : > { %v5465_v37 = vpop.f32.mrf.mxu0  ;;  %v7791_v56 = vpop.f32.mrf.mxu1 }
 0x2cc   : > { %v3258_v63 = vadd.f32 %v5464_v24, %v7659_v27 }
 0x2cd   : > { %v5466_v17 = vpop.f32.mrf.mxu0  ;;  %v3445_v45 = vpop.f32.mrf.mxu1 }
 0x2ce   : > { %v5467_v10 = vadd.f32 %v5466_v17, %v5465_v37  ;;  %v7794_v29 = vadd.f32 %v5914_v14, %v3258_v63 }
 0x2cf   : > { %v5468_v34 = vpop.f32.mrf.mxu0  ;;  %v7796_v41 = vpop.f32.mrf.mxu1 }
 0x2d0   : > { %v3261_v55 = vadd.f32 %v5467_v10, %v7667_v48 }
 0x2d1   : > { %v5469_v25 = vpop.f32.mrf.mxu0  ;;  %v7799_v40 = vpop.f32.mrf.mxu1 }
 0x2d2   : > { %v5470_v8 = vadd.f32 %v5469_v25, %v5468_v34  ;;  %v7801_v13 = vadd.f32 %v5915_v18, %v3261_v55 }
 0x2d3   : > { %v5471_v39 = vpop.f32.mrf.mxu0  ;;  %v7803_v36 = vpop.f32.mrf.mxu1 }
 0x2d4   : > { %v3266_v27 = vadd.f32 %v5470_v8, %v7682_v11 }
 0x2d5   : > { %v5472_v16 = vpop.f32.mrf.mxu0  ;;  %v7806_v49 = vpop.f32.mrf.mxu1 }
 0x2d6   : > { %v5473_v14 = vadd.f32 %v5472_v16, %v5471_v39  ;;  %v7808_v32 = vadd.f32 %v3426_v30, %v3266_v27 }
 0x2d7   : > { %v5474_v4 = vpop.f32.mrf.mxu0  ;;  %v7810_v12 = vpop.f32.mrf.mxu1 }
 0x2d8   : > { %v3269_v48 = vadd.f32 %v5473_v14, %v7693_v19 }
 0x2d9   : > { %v5475_v44 = vpop.f32.mrf.mxu0  ;;  %v7813_v53 = vpop.f32.mrf.mxu1 }
 0x2da   : > { %v5476_v18 = vadd.f32 %v5475_v44, %v5474_v4  ;;  %v7815_v24 = vadd.f32 %v3429_v15, %v3269_v48 }
 0x2db   : > { %v5477_v37 = vpop.f32.mrf.mxu0  ;;  %v7817_v63 = vpop.f32.mrf.mxu1 }
 0x2dc   : > { %v3274_v11 = vadd.f32 %v5476_v18, %v7675_v46 }
 0x2dd   : > { %v5478_v17 = vpop.f32.mrf.mxu0  ;;  %v7820_v10 = vpop.f32.mrf.mxu1 }
 0x2de   : > { %v5479_v30 = vadd.f32 %v5478_v17, %v5477_v37  ;;  %v7822_v34 = vadd.f32 %v5918_v0, %v3274_v11 }
 0x2df   : > { %v5480_v55 = vpop.f32.mrf.mxu0  ;;  %v7824_v25 = vpop.f32.mrf.mxu1 }
 0x2e0   : > { %v3277_v19 = vadd.f32 %v5479_v30, %v7685_v3 }
 0x2e1   : > { %v5481_v8 = vpop.f32.mrf.mxu0  ;;  %v7827_v39 = vpop.f32.mrf.mxu1 }
 0x2e2   : > { %v5482_v15 = vadd.f32 %v5481_v8, %v5480_v55  ;;  %v7829_v27 = vadd.f32 %v5919_v28, %v3277_v19 }
 0x2e3   : > { %v5483_v16 = vpop.f32.mrf.mxu0  ;;  %v7831_v14 = vpop.f32.mrf.mxu1 }
 0x2e4   : > { %v3282_v46 = vadd.f32 %v5482_v15, %v7707_v58 }
 0x2e5   : > { %v5484_v4 = vpop.f32.mrf.mxu0  ;;  %v7834_v48 = vpop.f32.mrf.mxu1 }
 0x2e6   : > { %v5485_v0 = vadd.f32 %v5484_v4, %v5483_v16  ;;  %v7836_v44 = vadd.f32 %v3442_v5, %v3282_v46 }
 0x2e7   : > { %v5486_v18 = vpop.f32.mrf.mxu0  ;;  %v7838_v37 = vpop.f32.mrf.mxu1 }
 0x2e8   : > { %8279 = vst [vmem:[#allocation15_spill] sm:$0xff] %v7838_v37  ;;  %v3285_v3 = vadd.f32 %v5485_v0, %v7715_v23 }
 0x2e9   : > { %v5487_v11 = vpop.f32.mrf.mxu0  ;;  %v7841_v17 = vpop.f32.mrf.mxu1 }
 0x2ea   : > { %v5488_v28 = vadd.f32 %v5487_v11, %v5486_v18  ;;  %v7843_v30 = vadd.f32 %v3445_v45, %v3285_v3 }
 0x2eb   : > { %v5489_v55 = vpop.f32.mrf.mxu0  ;;  %v7845_v19 = vpop.f32.mrf.mxu1 }
 0x2ec   : > { %8280 = vst [vmem:[#allocation18_spill] sm:$0xff] %v7845_v19  ;;  %v3290_v58 = vadd.f32 %v5488_v28, %v7698_v26 }
 0x2ed   : > { %v5490_v8 = vpop.f32.mrf.mxu0  ;;  %v7848_v15 = vpop.f32.mrf.mxu1 }
 0x2ee   : > { %v5491_v5 = vadd.f32 %v5490_v8, %v5489_v55  ;;  %v7851_v16 = vadd.f32 %v7786_v31, %v3290_v58 }
 0x2ef   : > { %v5492_v46 = vpop.f32.mrf.mxu0  ;;  %v5580_v23 = vpop.f32.mrf.mxu1 }
 0x2f0   : > { %v3293_v4 = vadd.f32 %v5491_v5, %v7710_v21 }
 0x2f1   : > { %v5493_v0 = vpop.f32.mrf.mxu0  ;;  %v5581_v18 = vpop.f32.mrf.mxu1 }
 0x2f2   : > { %v5494_v45 = vadd.f32 %v5493_v0, %v5492_v46  ;;  %v7854_v3 = vadd.f32 %v5581_v18, %v5580_v23  ;;  %v7857_v11 = vadd.f32 %v7791_v56, %v3293_v4 }
 0x2f3   : > { %v5495_v26 = vpop.f32.mrf.mxu0  ;;  %v7859_v28 = vpop.f32.mrf.mxu1 }
 0x2f4   : > { %v3298_v55 = vadd.f32 %v5494_v45, %v7725_v52 }
 0x2f5   : > { %v5496_v8 = vpop.f32.mrf.mxu0  ;;  %v7862_v31 = vpop.f32.mrf.mxu1 }
 0x2f6   : > { %v5497_v58 = vadd.f32 %v5496_v8, %v5495_v26  ;;  %v7865_v19 = vadd.f32 %v7799_v40, %v3298_v55 }
 0x2f7   : > { %v5498_v21 = vpop.f32.mrf.mxu0  ;;  %v7867_v5 = vpop.f32.mrf.mxu1 }
 0x2f8   : > { %v3301_v46 = vadd.f32 %v5497_v58, %v7732_v6 }
 0x2f9   : > { %v5499_v23 = vpop.f32.mrf.mxu0  ;;  %v7870_v56 = vpop.f32.mrf.mxu1 }
 0x2fa   : > { %v5500_v4 = vadd.f32 %v5499_v23, %v5498_v21  ;;  %v7873_v0 = vadd.f32 %v7806_v49, %v3301_v46 }
 0x2fb   : > { %v5501_v52 = vpop.f32.mrf.mxu0  ;;  %v7875_v18 = vpop.f32.mrf.mxu1 }
 0x2fc   : > { %8281 = vst [vmem:[#allocation19_spill] sm:$0xff] %v7873_v0  ;;  %v3306_v45 = vadd.f32 %v5500_v4, %v7719_v43 }
 0x2fd   : > { %v5502_v26 = vpop.f32.mrf.mxu0  ;;  %v7878_v40 = vpop.f32.mrf.mxu1 }
 0x2fe   : > { %v5503_v55 = vadd.f32 %v5502_v26, %v5501_v52  ;;  %v7881_v8 = vadd.f32 %v7796_v41, %v3306_v45 }
 0x2ff   : > { %v5504_v6 = vpop.f32.mrf.mxu0  ;;  %v7883_v58 = vpop.f32.mrf.mxu1 }
 0x300   : > { %v3309_v21 = vadd.f32 %v5503_v55, %v7727_v54 }
 0x301   : > { %v5505_v23 = vpop.f32.mrf.mxu0  ;;  %v7886_v49 = vpop.f32.mrf.mxu1 }
 0x302   : > { %v5506_v46 = vadd.f32 %v5505_v23, %v5504_v6  ;;  %v7889_v37 = vadd.f32 %v7803_v36, %v3309_v21 }
 0x303   : > { %v5507_v43 = vpop.f32.mrf.mxu0  ;;  %v7891_v4 = vpop.f32.mrf.mxu1 }
 0x304   : > { %8282 = vst [vmem:[#allocation16_spill] sm:$0xff] %v7889_v37  ;;  %v3314_v52 = vadd.f32 %v5506_v46, %v7742_v61 }
 0x305   : > { %v5508_v26 = vpop.f32.mrf.mxu0  ;;  %v7894_v41 = vpop.f32.mrf.mxu1 }
 0x306   : > { %v5509_v45 = vadd.f32 %v5508_v26, %v5507_v43  ;;  %v7897_v0 = vadd.f32 %v7813_v53, %v3314_v52 }
 0x307   : > { %v5510_v54 = vpop.f32.mrf.mxu0  ;;  %v7899_v55 = vpop.f32.mrf.mxu1 }
 0x308   : > { %8283 = vst [vmem:[#allocation20_spill] sm:$0xff] %v7897_v0  ;;  %v3317_v6 = vadd.f32 %v5509_v45, %v7749_v22 }
 0x309   : > { %v5511_v23 = vpop.f32.mrf.mxu0  ;;  %v7902_v36 = vpop.f32.mrf.mxu1 }
 0x30a   : > { %v5512_v21 = vadd.f32 %v5511_v23, %v5510_v54  ;;  %v7905_v37 = vadd.f32 %v7820_v10, %v3317_v6 }
 0x30b   : > { %v5513_v61 = vpop.f32.mrf.mxu0  ;;  %v7907_v46 = vpop.f32.mrf.mxu1 }
 0x30c   : > { %8284 = vst [vmem:[#allocation21_spill] sm:$0xff] %v7905_v37  ;;  %v3322_v43 = vadd.f32 %v5512_v21, %v7736_v57 }
 0x30d   : > { %v5514_v26 = vpop.f32.mrf.mxu0  ;;  %v7910_v53 = vpop.f32.mrf.mxu1 }
 0x30e   : > { %v5515_v52 = vadd.f32 %v5514_v26, %v5513_v61  ;;  %v7913_v0 = vadd.f32 %v7810_v12, %v3322_v43 }
 0x30f   : > { %v5516_v22 = vpop.f32.mrf.mxu0  ;;  %v7915_v45 = vpop.f32.mrf.mxu1 }
 0x310   : > { %8285 = vst [vmem:[#allocation25_spill] sm:$0xff] %v7913_v0  ;;  %v3325_v54 = vadd.f32 %v5515_v52, %v7744_v47 }
 0x311   : > { %v5517_v23 = vpop.f32.mrf.mxu0  ;;  %v7918_v10 = vpop.f32.mrf.mxu1 }
 0x312   : > { %v5518_v6 = vadd.f32 %v5517_v23, %v5516_v22  ;;  %v7921_v37 = vadd.f32 %v7817_v63, %v3325_v54 }
 0x313   : > { %v5519_v57 = vpop.f32.mrf.mxu0  ;;  %v7923_v21 = vpop.f32.mrf.mxu1 }
 0x314   : > { %8286 = vst [vmem:[#allocation22_spill] sm:$0xff] %v7921_v37  ;;  %v3330_v61 = vadd.f32 %v5518_v6, %v7755_v50 }
 0x315   : > { %v5520_v26 = vpop.f32.mrf.mxu0  ;;  %v7926_v12 = vpop.f32.mrf.mxu1 }
 0x316   : > { %v5521_v43 = vadd.f32 %v5520_v26, %v5519_v57  ;;  %v7929_v0 = vadd.f32 %v7827_v39, %v3330_v61 }
 0x317   : > { %v5522_v47 = vpop.f32.mrf.mxu0  ;;  %v7931_v52 = vpop.f32.mrf.mxu1 }
 0x318   : > { %8287 = vst [vmem:[#allocation26_spill] sm:$0xff] %v7929_v0  ;;  %v3333_v22 = vadd.f32 %v5521_v43, %v7760_v20 }
 0x319   : > { %v5523_v23 = vpop.f32.mrf.mxu0  ;;  %v7934_v63 = vpop.f32.mrf.mxu1 }
 0x31a   : > { %v5524_v54 = vadd.f32 %v5523_v23, %v5522_v47  ;;  %v7937_v37 = vadd.f32 %v7834_v48, %v3333_v22 }
 0x31b   : > { %v5525_v50 = vpop.f32.mrf.mxu0  ;;  %v7939_v6 = vpop.f32.mrf.mxu1 }
 0x31c   : > { %8288 = vst [vmem:[#allocation23_spill] sm:$0xff] %v7937_v37  ;;  %v3338_v57 = vadd.f32 %v5524_v54, %v7753_v51 }
 0x31d   : > { %v5526_v26 = vpop.f32.mrf.mxu0  ;;  %v7942_v39 = vpop.f32.mrf.mxu1 }
 0x31e   : > { %v5527_v61 = vadd.f32 %v5526_v26, %v5525_v50  ;;  %v7945_v0 = vadd.f32 %v7824_v25, %v3338_v57 }
 0x31f   : > { %v5528_v20 = vpop.f32.mrf.mxu0  ;;  %v7947_v43 = vpop.f32.mrf.mxu1 }
 0x320   : > { %8289 = vst [vmem:[#allocation24_spill] sm:$0xff] %v7945_v0  ;;  %v3341_v47 = vadd.f32 %v5527_v61, %v7757_v59 }
 0x321   : > { %v5529_v23 = vpop.f32.mrf.mxu0  ;;  %v7950_v48 = vpop.f32.mrf.mxu1 }
 0x322   : > { %v5530_v22 = vadd.f32 %v5529_v23, %v5528_v20  ;;  %v7953_v37 = vadd.f32 %v7831_v14, %v3341_v47 }
 0x323   : > { %v5531_v51 = vpop.f32.mrf.mxu0  ;;  %v7955_v54 = vpop.f32.mrf.mxu1 }
 0x324   : > { %8290 = vst [vmem:[#allocation28_spill] sm:$0xff] %v7953_v37  ;;  %v3346_v50 = vadd.f32 %v5530_v22, %v7763_v7 }
 0x325   : > { %v5532_v26 = vpop.f32.mrf.mxu0  ;;  %v7958_v25 = vpop.f32.mrf.mxu1 }
 0x326   : > { %v5533_v57 = vadd.f32 %v5532_v26, %v5531_v51  ;;  %v7961_v0 = vadd.f32 %v7841_v17, %v3346_v50  ;;  %v5588_v26 = vadd.f32 %v7870_v56, %v7867_v5  ;;  %v5585_v5 = vadd.f32 %v7862_v31, %v7859_v28  ;;  %v8006_v28 = vld [vmem:[%s8198_s2] ss:$0 sm:$0xff] }
 0x327   : > { %v5534_v59 = vpop.f32.mrf.mxu0  ;;  %v7963_v61 = vpop.f32.mrf.mxu1 }
 0x328   : > { %8291 = vst [vmem:[#allocation30_spill] sm:$0xff] %v7961_v0  ;;  %v3349_v20 = vadd.f32 %v5533_v57, %v7767_v42 }
 0x329   : > { %v5535_v23 = vpop.f32.mrf.mxu0  ;;  %v7966_v14 = vpop.f32.mrf.mxu1 }
 0x32a   : > { %v5536_v47 = vadd.f32 %v5535_v23, %v5534_v59  ;;  %v7969_v37 = vadd.f32 %v7848_v15, %v3349_v20 }
 0x32b   : > { %v5537_v7 = vpop.f32.mrf.mxu0  ;;  %v7971_v22 = vpop.f32.mrf.mxu1 }
 0x32c   : > { %8292 = vst [vmem:[#allocation17_spill] sm:$0xff] %v7969_v37  ;;  %v7974_v51 = vadd.f32 %v5536_v47, %v7765_v60  ;;  %v5591_v60 = vadd.f32 %v7878_v40, %v7875_v18 }
 0x32d   : > { %v5538_v17 = vpop.f32.mrf.mxu0  ;;  %v7976_v50 = vpop.f32.mrf.mxu1 }
 0x32e   : > { %8293 = vst [vmem:[#allocation27_spill] sm:$0xff] %v7974_v51  ;;  %v5539_v42 = vadd.f32 %v5538_v17, %v5537_v7 }
 0x32f   : > { %v7980_v57 = vpop.f32.mrf.mxu1  ;;  %v5958_v0 = vpop.f32.mrf.mxu0 }
 0x330   : > { %v7983_v59 = vadd.f32 %v5539_v42, %v7769_v1  ;;  %v3917_v15 = vadd.f32 %v5958_v0, %v5588_v26  ;;  %v5600_v26 = vadd.f32 %v7902_v36, %v7899_v55 }
 0x331   : > { %v7985_v20 = vpop.f32.mrf.mxu1  ;;  %v3908_v23 = vpop.f32.mrf.mxu0 }
 0x332   : > { %v3909_v47 = vadd.f32 %v7854_v3, %v3908_v23  ;;  %v4037_v56 = vadd.f32 %v3917_v15, %v7778_v35  ;;  %v5603_v15 = vadd.f32 %v7910_v53, %v7907_v46  ;;  %v5612_v53 = vadd.f32 %v7934_v63, %v7931_v52 }
 0x333   : > { %v7990_v37 = vpop.f32.mrf.mxu1  ;;  %v5959_v51 = vpop.f32.mrf.mxu0  ;;  %v5606_v52 = vadd.f32 %v7918_v10, %v7915_v45 }
 0x334   : > { %v4035_v1 = vadd.f32 %v3909_v47, %v7772_v62  ;;  %v3920_v7 = vadd.f32 %v5959_v51, %v5591_v60  ;;  %v4069_v62 = vadd.f32 %v8006_v28, %v4037_v56 }
 0x335   : > { %v7996_v0 = vpop.f32.mrf.mxu1  ;;  %v3911_v17 = vpop.f32.mrf.mxu0 }
 0x336   : > { %v4038_v18 = vadd.f32 %v3920_v7, %v7781_v9  ;;  %v3912_v3 = vadd.f32 %v5585_v5, %v3911_v17  ;;  %v5594_v9 = vadd.f32 %v7886_v49, %v7883_v58  ;;  %v4067_v23 = vadd.f32 %v8006_v28, %v4035_v1 }
 0x337   : > { %v8001_v40 = vpop.f32.mrf.mxu1  ;;  %v5962_v42 = vpop.f32.mrf.mxu0  ;;  %v5597_v7 = vadd.f32 %v7894_v41, %v7891_v4 }
 0x338   : > { %v4070_v35 = vadd.f32 %v8006_v28, %v4038_v18  ;;  %v4036_v31 = vadd.f32 %v3912_v3, %v7775_v38  ;;  %v3933_v51 = vadd.f32 %v5962_v42, %v5600_v26 }
 0x339   : > { %v8013_v55 = vpop.f32.mrf.mxu1  ;;  %v3924_v36 = vpop.f32.mrf.mxu0 }
 0x33a   : > { %v4781_v60 = vpack.c.bf16 %v4070_v35, %v4069_v62  ;;  %v4068_v47 = vadd.f32 %v8006_v28, %v4036_v31  ;;  %v3925_v5 = vadd.f32 %v5594_v9, %v3924_v36  ;;  %v4041_v49 = vadd.f32 %v3933_v51, %v7794_v29 }
 0x33b   : > { %v8019_v56 = vpop.f32.mrf.mxu1  ;;  %v5963_v38 = vpop.f32.mrf.mxu0 }
 0x33c   : > { %4869 = vst [vmem:[%s7379_s24 + $0x88] sm:$0xff] %v4781_v60   ;;  %v4776_v58 = vpack.c.bf16 %v4068_v47, %v4067_v23  ;;  %v3936_v17 = vadd.f32 %v5963_v38, %v5603_v15  ;;  %v4039_v1 = vadd.f32 %v3925_v5, %v7784_v2  ;;  %v4073_v41 = vadd.f32 %v8006_v28, %v4041_v49 }
 0x33d   : > { %v8025_v26 = vpop.f32.mrf.mxu1  ;;  %v3927_v46 = vpop.f32.mrf.mxu0  ;;  %v5609_v23 = vadd.f32 %v7926_v12, %v7923_v21 }
 0x33e   : > { %4868 = vst [vmem:[%s7379_s24 + $0x80] sm:$0xff] %v4776_v58   ;;  %v4042_v18 = vadd.f32 %v3936_v17, %v7801_v13  ;;  %v3928_v3 = vadd.f32 %v5597_v7, %v3927_v46  ;;  %v5615_v13 = vadd.f32 %v7942_v39, %v7939_v6  ;;  %v4071_v31 = vadd.f32 %v8006_v28, %v4039_v1 }
 0x33f   : > { %v8032_v42 = vpop.f32.mrf.mxu1  ;;  %v5966_v4 = vpop.f32.mrf.mxu0  ;;  %v5624_v39 = vadd.f32 %v7966_v14, %v7963_v61  ;;  %v5618_v46 = vadd.f32 %v7950_v48, %v7947_v43 }
 0x340   : > { %v4074_v29 = vadd.f32 %v8006_v28, %v4042_v18  ;;  %v4040_v62 = vadd.f32 %v3928_v3, %v7789_v33  ;;  %v3949_v35 = vadd.f32 %v5966_v4, %v5612_v53 }
 0x341   : > { %v8039_v63 = vpop.f32.mrf.mxu1  ;;  %v3940_v2 = vpop.f32.mrf.mxu0 }
 0x342   : > { %v4791_v51 = vpack.c.bf16 %v4074_v29, %v4073_v41  ;;  %v4072_v9 = vadd.f32 %v8006_v28, %v4040_v62  ;;  %v3941_v36 = vadd.f32 %v5606_v52, %v3940_v2  ;;  %v4045_v10 = vadd.f32 %v3949_v35, %v7822_v34 }
 0x343   : > { %v8045_v15 = vpop.f32.mrf.mxu1  ;;  %v5967_v33 = vpop.f32.mrf.mxu0 }
 0x344   : > { %4871 = vst [vmem:[%s7379_s24 + $0x98] sm:$0xff] %v4791_v51   ;;  %v4786_v45 = vpack.c.bf16 %v4072_v9, %v4071_v31  ;;  %v3952_v60 = vadd.f32 %v5967_v33, %v5615_v13  ;;  %v4043_v5 = vadd.f32 %v3941_v36, %v7808_v32  ;;  %v4077_v21 = vadd.f32 %v8006_v28, %v4045_v10 }
 0x345   : > { %v8051_v47 = vpop.f32.mrf.mxu1  ;;  %v3943_v6 = vpop.f32.mrf.mxu0  ;;  %v5627_v32 = vadd.f32 %v7976_v50, %v7971_v22  ;;  %v5636_v22 = vadd.f32 %v8013_v55, %v8001_v40  ;;  %v5630_v51 = vadd.f32 %v7985_v20, %v7980_v57 }
 0x346   : > { %4870 = vst [vmem:[%s7379_s24 + $0x90] sm:$0xff] %v4786_v45   ;;  %v4046_v38 = vadd.f32 %v3952_v60, %v7829_v27  ;;  %v3944_v7 = vadd.f32 %v5609_v23, %v3943_v6  ;;  %v4075_v27 = vadd.f32 %v8006_v28, %v4043_v5 }
 0x347   : > { %v5646_v58 = vpop.f32.mrf.mxu1  ;;  %v5970_v49 = vpop.f32.mrf.mxu0 }
 0x348   : > { %v4078_v34 = vadd.f32 %v8006_v28, %v4046_v38  ;;  %v4044_v12 = vadd.f32 %v3944_v7, %v7815_v24  ;;  %v3965_v17 = vadd.f32 %v5970_v49, %v5624_v39  ;;  %v5621_v24 = vadd.f32 %v7958_v25, %v7955_v54 }
 0x349   : > { %v5647_v61 = vpop.f32.mrf.mxu1  ;;  %v3956_v14 = vpop.f32.mrf.mxu0 }
 0x34a   : > { %v4801_v53 = vpack.c.bf16 %v4078_v34, %v4077_v21  ;;  %v4076_v1 = vadd.f32 %v8006_v28, %v4044_v12  ;;  %v3957_v18 = vadd.f32 %v5618_v46, %v3956_v14  ;;  %v4049_v43 = vadd.f32 %v3965_v17, %v7851_v16 }
 0x34b   : > { %v5649_v3 = vpop.f32.mrf.mxu1  ;;  %v5971_v4 = vpop.f32.mrf.mxu0  ;;  %v5648_v39 = vadd.f32 %v5647_v61, %v5646_v58  ;;  %v5642_v12 = vadd.f32 %v8039_v63, %v8032_v42 }
 0x34c   : > { %4873 = vst [vmem:[%s7379_s24 + $0xa8] sm:$0xff] %v4801_v53   ;;  %v4796_v41 = vpack.c.bf16 %v4076_v1, %v4075_v27  ;;  %v3968_v48 = vadd.f32 %v5971_v4, %v5627_v32  ;;  %v4047_v50 = vadd.f32 %v3957_v18, %v7836_v44  ;;  %v4081_v54 = vadd.f32 %v8006_v28, %v4049_v43  ;;  %v8296_v4 = vld [vmem:[#allocation25_spill] sm:$0xff]  ;;  %v8297_v43 = vld [vmem:[#allocation20_spill] sm:$0xff] }
 0x34d   : > { %v5650_v29 = vpop.f32.mrf.mxu1  ;;  %v3959_v62 = vpop.f32.mrf.mxu0  ;;  %v5639_v44 = vadd.f32 %v8025_v26, %v8019_v56  ;;  %v8294_v26 = vld [vmem:[#allocation16_spill] sm:$0xff]  ;;  %v5645_v1 = vadd.f32 %v8051_v47, %v8045_v15  ;;  %v8299_v47 = vld [vmem:[#allocation21_spill] sm:$0xff] }
 0x34e   : > { %4872 = vst [vmem:[%s7379_s24 + $0xa0] sm:$0xff] %v4796_v41   ;;  %v4050_v35 = vadd.f32 %v3968_v48, %v7857_v11  ;;  %v3960_v52 = vadd.f32 %v5621_v24, %v3959_v62  ;;  %v4079_v11 = vadd.f32 %v8006_v28, %v4047_v50 }
 0x34f   : > { %v5652_v2 = vpop.f32.mrf.mxu1  ;;  %v5974_v13 = vpop.f32.mrf.mxu0 }
 0x350   : > { %v4082_v25 = vadd.f32 %v8006_v28, %v4050_v35  ;;  %v4048_v16 = vadd.f32 %v3960_v52, %v7843_v30  ;;  %v3981_v31 = vadd.f32 %v5974_v13, %v5636_v22  ;;  %v5633_v30 = vadd.f32 %v7996_v0, %v7990_v37  ;;  %v8295_v0 = vld [vmem:[#allocation19_spill] sm:$0xff] }
 0x351   : > { %v5653_v40 = vpop.f32.mrf.mxu1  ;;  %v3972_v55 = vpop.f32.mrf.mxu0 }
 0x352   : > { %v4811_v9 = vpack.c.bf16 %v4082_v25, %v4081_v54  ;;  %v4080_v36 = vadd.f32 %v8006_v28, %v4048_v16  ;;  %v3973_v33 = vadd.f32 %v5630_v51, %v3972_v55  ;;  %v4053_v57 = vadd.f32 %v3981_v31, %v7881_v8 }
 0x353   : > { %v5655_v23 = vpop.f32.mrf.mxu1  ;;  %v5975_v45 = vpop.f32.mrf.mxu0  ;;  %v5654_v25 = vadd.f32 %v5653_v40, %v5652_v2 }
 0x354   : > { %4875 = vst [vmem:[%s7379_s24 + $0xb8] sm:$0xff] %v4811_v9   ;;  %v4806_v10 = vpack.c.bf16 %v4080_v36, %v4079_v11  ;;  %v3984_v20 = vadd.f32 %v5975_v45, %v5639_v44  ;;  %v4051_v56 = vadd.f32 %v3973_v33, %v7865_v19  ;;  %v4085_v21 = vadd.f32 %v8006_v28, %v4053_v57 }
 0x355   : > { %v5656_v60 = vpop.f32.mrf.mxu1  ;;  %v3975_v6 = vpop.f32.mrf.mxu0  ;;  %v5651_v19 = vadd.f32 %v5650_v29, %v5649_v3  ;;  %v8298_v29 = vld [vmem:[#allocation22_spill] sm:$0xff] }
 0x356   : > { %4874 = vst [vmem:[%s7379_s24 + $0xb0] sm:$0xff] %v4806_v10   ;;  %v4054_v5 = vadd.f32 %v3984_v20, %v8294_v26  ;;  %v3976_v38 = vadd.f32 %v5633_v30, %v3975_v6  ;;  %v4083_v46 = vadd.f32 %v8006_v28, %v4051_v56  ;;  %v5657_v45 = vadd.f32 %v5656_v60, %v5655_v23  ;;  %v8300_v10 = vld [vmem:[#allocation24_spill] sm:$0xff]  ;;  %v8301_v6 = vld [vmem:[#allocation26_spill] sm:$0xff]  ;;  %v8303_v60 = vld [vmem:[#allocation23_spill] sm:$0xff] }
 0x357   : > { %v5658_v7 = vpop.f32.mrf.mxu1  ;;  %v5978_v49 = vpop.f32.mrf.mxu0  ;;  %v8302_v56 = vld [vmem:[#allocation28_spill] sm:$0xff] }
 0x358   : > { %v4086_v37 = vadd.f32 %v8006_v28, %v4054_v5  ;;  %v4052_v34 = vadd.f32 %v3976_v38, %v8295_v0  ;;  %v3997_v8 = vadd.f32 %v5978_v49, %v5648_v39 }
 0x359   : > { %v5659_v58 = vpop.f32.mrf.mxu1  ;;  %v3988_v17 = vpop.f32.mrf.mxu0 }
 0x35a   : > { %v4821_v61 = vpack.c.bf16 %v4086_v37, %v4085_v21  ;;  %v4084_v14 = vadd.f32 %v8006_v28, %v4052_v34  ;;  %v3989_v32 = vadd.f32 %v5642_v12, %v3988_v17  ;;  %v4057_v24 = vadd.f32 %v3997_v8, %v8296_v4  ;;  %v8305_v4 = vld [vmem:[#allocation15_spill] sm:$0xff] }
 0x35b   : > { %v5661_v27 = vpop.f32.mrf.mxu1  ;;  %v5979_v53 = vpop.f32.mrf.mxu0  ;;  %v5660_v3 = vadd.f32 %v5659_v58, %v5658_v7 }
 0x35c   : > { %4877 = vst [vmem:[%s7379_s24 + $0xc8] sm:$0xff] %v4821_v61   ;;  %v4816_v18 = vpack.c.bf16 %v4084_v14, %v4083_v46  ;;  %v4000_v42 = vadd.f32 %v5979_v53, %v5651_v19  ;;  %v4055_v48 = vadd.f32 %v3989_v32, %v8297_v43  ;;  %v4089_v52 = vadd.f32 %v8006_v28, %v4057_v24  ;;  %v8307_v43 = vld [vmem:[#allocation18_spill] sm:$0xff] }
 0x35d   : > { %v5662_v63 = vpop.f32.mrf.mxu1  ;;  %v3991_v41 = vpop.f32.mrf.mxu0 }
 0x35e   : > { %4876 = vst [vmem:[%s7379_s24 + $0xc0] sm:$0xff] %v4816_v18   ;;  %v4058_v62 = vadd.f32 %v4000_v42, %v8298_v29  ;;  %v3992_v22 = vadd.f32 %v5645_v1, %v3991_v41  ;;  %v4087_v51 = vadd.f32 %v8006_v28, %v4055_v48  ;;  %v5663_v44 = vadd.f32 %v5662_v63, %v5661_v27  ;;  %v8304_v18 = vld [vmem:[#allocation27_spill] sm:$0xff]  ;;  %v8306_v42 = vld [vmem:[#allocation30_spill] sm:$0xff] }
 0x35f   : > { %v5664_v50 = vpop.f32.mrf.mxu1  ;;  %v5982_v35 = vpop.f32.mrf.mxu0  ;;  %v3515_v24 = vadd.f32 %v8305_v4, %v8304_v18  ;;  %v3518_v48 = vadd.f32 %v8307_v43, %v7983_v59 }
 0x360   : > { %v4090_v15 = vadd.f32 %v8006_v28, %v4058_v62  ;;  %v4056_v13 = vadd.f32 %v3992_v22, %v8299_v47  ;;  %v4013_v54 = vadd.f32 %v5982_v35, %v5660_v3  ;;  %v8308_v22 = vld [vmem:[#allocation17_spill] sm:$0xff] }
 0x361   : > { %v5665_v16 = vpop.f32.mrf.mxu1  ;;  %v4004_v31 = vpop.f32.mrf.mxu0 }
 0x362   : > { %v4831_v55 = vpack.c.bf16 %v4090_v15, %v4089_v52  ;;  %v4088_v11 = vadd.f32 %v8006_v28, %v4056_v13  ;;  %v4005_v9 = vadd.f32 %v5654_v25, %v4004_v31  ;;  %v4061_v57 = vadd.f32 %v4013_v54, %v8300_v10 }
 0x363   : > { %v5667_v36 = vpop.f32.mrf.mxu1  ;;  %v5983_v33 = vpop.f32.mrf.mxu0  ;;  %v5666_v21 = vadd.f32 %v5665_v16, %v5664_v50 }
 0x364   : > { %4879 = vst [vmem:[%s7379_s24 + $0xd8] sm:$0xff] %v4831_v55   ;;  %v4826_v30 = vpack.c.bf16 %v4088_v11, %v4087_v51  ;;  %v4016_v20 = vadd.f32 %v5983_v33, %v5663_v44  ;;  %v4059_v2 = vadd.f32 %v4005_v9, %v8301_v6  ;;  %v4093_v49 = vadd.f32 %v8006_v28, %v4061_v57 }
 0x365   : > { %v5668_v40 = vpop.f32.mrf.mxu1  ;;  %v4007_v39 = vpop.f32.mrf.mxu0 }
 0x366   : > { %4878 = vst [vmem:[%s7379_s24 + $0xd0] sm:$0xff] %v4826_v30   ;;  %v4062_v26 = vadd.f32 %v4016_v20, %v8302_v56  ;;  %v4008_v5 = vadd.f32 %v5657_v45, %v4007_v39  ;;  %v4091_v0 = vadd.f32 %v8006_v28, %v4059_v2  ;;  %v5669_v14 = vadd.f32 %v5668_v40, %v5667_v36 }
 0x367   : > { %v5670_v38 = vpop.f32.mrf.mxu1  ;;  %v5986_v7 = vpop.f32.mrf.mxu0 }
 0x368   : > { %v4094_v23 = vadd.f32 %v8006_v28, %v4062_v26  ;;  %v4060_v37 = vadd.f32 %v4008_v5, %v8303_v60 }
 0x369   : > { %v5671_v34 = vpop.f32.mrf.mxu1  ;;  %v4020_v8 = vpop.f32.mrf.mxu0 }
 0x36a   : > { %v4841_v12 = vpack.c.bf16 %v4094_v23, %v4093_v49  ;;  %v4092_v58 = vadd.f32 %v8006_v28, %v4060_v37  ;;  %v5672_v17 = vadd.f32 %v5671_v34, %v5670_v38  ;;  %v4021_v19 = vadd.f32 %v5666_v21, %v4020_v8 }
 0x36b   : > { %v5673_v46 = vpop.f32.mrf.mxu1  ;;  %v5987_v61 = vpop.f32.mrf.mxu0 }
 0x36c   : > { %4881 = vst [vmem:[%s7379_s24 + $0xe8] sm:$0xff] %v4841_v12   ;;  %v4836_v32 = vpack.c.bf16 %v4092_v58, %v4091_v0  ;;  %v4029_v27 = vadd.f32 %v5986_v7, %v5672_v17  ;;  %v4063_v63 = vadd.f32 %v4021_v19, %v8306_v42 }
 0x36d   : > { %v5674_v53 = vpop.f32.mrf.mxu1  ;;  %v4023_v1 = vpop.f32.mrf.mxu0 }
 0x36e   : > { %4880 = vst [vmem:[%s7379_s24 + $0xe0] sm:$0xff] %v4836_v32   ;;  %v5675_v41 = vadd.f32 %v5674_v53, %v5673_v46  ;;  %v4024_v3 = vadd.f32 %v5669_v14, %v4023_v1  ;;  %v4065_v29 = vadd.f32 %v4029_v27, %v3515_v24  ;;  %v4095_v35 = vadd.f32 %v8006_v28, %v4063_v63 }
 0x370   : > { %v4032_v62 = vadd.f32 %v5987_v61, %v5675_v41  ;;  %v4064_v50 = vadd.f32 %v4024_v3, %v8308_v22  ;;  %v4097_v47 = vadd.f32 %v8006_v28, %v4065_v29 }
 0x372   : > { %v4066_v52 = vadd.f32 %v4032_v62, %v3518_v48  ;;  %v4096_v15 = vadd.f32 %v8006_v28, %v4064_v50 }
 0x374   : > { %v4098_v13 = vadd.f32 %v8006_v28, %v4066_v52  ;;  %v4846_v54 = vpack.c.bf16 %v4096_v15, %v4095_v35 }
 0x376   : > { %v4851_v59 = vpack.c.bf16 %v4098_v13, %v4097_v47  ;;  %4882 = vst [vmem:[%s7379_s24 + $0xf0] sm:$0xff] %v4846_v54  }
 0x378   : > { %4883 = vst [vmem:[%s7379_s24 + $0xf8] sm:$0xff] %v4851_v59  }
 0x379   : > { %6344 = shalt.err (!%p6341_p5)
}
 0x37a   : > { %s6345_s28 = scalar_lea.hbm %s8139_s4, 4096  ;;  %s6349_s22 = scalar_lea.hbm %s8309_s30, 16384 }
 0x37b   : > { %p6346_p4 = scmp.ne.s32.totalorder %s8139_s4, %s6345_s28  ;;  %p6350_p9 = scmp.lt.s32.totalorder %s8139_s4, %s8309_s30 }
 0x37c   : > { %p6351_p13 = scmp.lt.s32.totalorder %s6349_s22, %s6345_s28 }
 0x37d   : > { %p6347_p6 = pnand %p6346_p4, %p6551_p11 }
 0x37e   : > { %p6352_p10 = por %p6351_p13, %p6350_p9 }
 0x37f   : > { %p6348_p7 = pneg %p6347_p6 }
 0x381   : > { %p6353_p1 = pnand %p6352_p10, %p6348_p7 }
 0x383   : > { %6356 = shalt.err (!%p6353_p1)
}
 0x384   : > { %s6438_s8 = smov 64   ;;  %s6439_s29 = smov 4  }
 0x385   : > { %5998 = dma.vmem_to_hbm [thread:$0]  (%p6551_p11), %s8141_s16, 4096, %s8139_s4, %s4260_s27, %s6438_s8, %s6438_s8, %s6439_s29  }
 0x386 PF: > { %s8310_s23 = sld [smem:[#allocation11_spill]]  ;;  %p6016_p8 = scmp.ge.s32.totalorder %s6431_s19, 2 }
 0x387   : > { %s8311_s5 = sld [smem:[#allocation12_spill]] }
 0x38c   : > { %s4290_s15 = sand.u32 1, %s8310_s23  }
 0x38d   : > { %p8312_p12 = scmp.ne.s32.totalorder %s8311_s5, 0  ;;  %s4291_s10 = scalar_lea.sflag [#allocation4], %s4290_s15 }
 0x38f   : > { %p6009_p2 = pnand %p6016_p8, %p8312_p12 }
 0x391   : > { %p6010_p0 = pneg %p6009_p2 }
 0x393   : > { %6398 = dma.done.wait (%p6010_p0), %s4291_s10, 4096  }
 0x394   : > { %6400 = vsyncadd (%p6010_p0), %s4291_s10, 4294963200  ;;  %s20_s19 = sadd.s32 1, %s6431_s19   ;;  %s8313_s11 = sld [smem:[#allocation13_spill]] }
 0x395   : > { %p17_p3 = scmp.ge.s32.totalorder %s20_s19, 6   ;;  %s8314_s7 = sld [smem:[#allocation14_spill]] }
 0x396   : > { %s8315_s12 = smov %s6407_s13  ;;  %s8316_s13 = smov %s6411_s14 }
 0x397   : > { %s8317_s14 = smov %s6568_s6  ;;  %s8318_s15 = smov %s6423_s17 }
 0x398   : > { %s8319_s16 = smov %s6427_s18  ;;  %19 = sbr.rel (!%p17_p3) target bundleno = 11 (0xb), region = 83 }
 0x39a   : > { %s8320_s17 = smov %s8313_s11 }
 0x39b   : > { %s8321_s18 = smov %s8314_s7 }
 0x39d   :  { %4296 = vsyncpa [#allocation3], 1 }
 0x39e   :  { %4298 = vsyncpa [#allocation3 + $0x1], 1 }
 0x39f   :  { %4299 = vsyncpa [#allocation6], 1 }
 0x3a0   :  { %4300 = vsyncpa [#allocation4], 1 }
 0x3a1   :  { %4302 = vsyncpa [#allocation4 + $0x1], 1 }

</bundles_post_ra>
